<compile_context>
chip_gen: v5e
topology: v5e:2x2
jax: 0.10.0
libtpu: 0.0.40
codegen_flags: <defaults>
</compile_context>

<pallas_src>
import math
import functools

import jax
import jax.numpy as jnp
from jax.experimental import pallas as pl
from jax.experimental.pallas import tpu as pltpu

F32 = jnp.float32
BF16 = jnp.bfloat16


# --------------------------- in-kernel helpers ------------------------------ #

def _layer_norm(y, g, b):
    # f32 LayerNorm over the last dim (eps matches PyTorch default 1e-5).
    mu = jnp.mean(y, axis=-1, keepdims=True)
    d = y - mu
    var = jnp.mean(d * d, axis=-1, keepdims=True)
    return d * jax.lax.rsqrt(var + 1e-5) * g + b


def _mha(q3, k3, v3, wo, bo, bias, nhead):
    # q3: (B, Tq, D) f32, already scaled by 1/sqrt(dk); k3/v3: (B, Tk, D) f32.
    # bias: (B, Tq, Tk) additive f32 or None. wo: (D, D) bf16, bo: (1, D) f32.
    # Per-head scores/PV as B-batched einsums; head contexts concatenated and
    # projected with ONE full-K matmul (review: no per-head K=dk out-proj).
    B, Tq, D = q3.shape
    dk = D // nhead
    parts = []
    for h in range(nhead):                      # nhead is small & static
        sl = slice(h * dk, (h + 1) * dk)
        s = jnp.einsum('bqd,bkd->bqk',
                       q3[:, :, sl].astype(BF16), k3[:, :, sl].astype(BF16),
                       preferred_element_type=F32)          # (B, Tq, Tk) f32
        if bias is not None:
            s = s + bias
        s = s - jnp.max(s, axis=-1, keepdims=True)
        p = jnp.exp(s)
        p = p * pl.reciprocal(jnp.sum(p, axis=-1, keepdims=True), approx=True)
        parts.append(jnp.einsum('bqk,bkd->bqd',
                                p.astype(BF16), v3[:, :, sl].astype(BF16),
                                preferred_element_type=F32))  # (B, Tq, dk)
    ctx = jnp.concatenate(parts, axis=-1)                     # (B, Tq, D) f32
    out = jnp.dot(ctx.reshape(B * Tq, D).astype(BF16), wo,
                  preferred_element_type=F32) + bo            # (B*Tq, D) f32
    return out


# ----------------------------- Pallas kernels ------------------------------- #

def _decoder_layer_kernel(
        x_ref, mem_ref, tmask_ref, pbias_ref,
        wqkv_ref, bqkv_ref, wo1_ref, bo1_ref, g1_ref, b1_ref,
        wq_ref, bq_ref, wkv_ref, bkv_ref, wo2_ref, bo2_ref, g2_ref, b2_ref,
        w1_ref, bf1_ref, w2_ref, bf2_ref, g3_ref, b3_ref,
        o_ref, *, nhead):
    # One fused post-norm TransformerDecoderLayer for the WHOLE batch:
    #   x = LN(x + SelfAttn(x));  x = LN(x + CrossAttn(x, mem));  x = LN(x + FFN(x))
    x = x_ref[...]                                           # (B, T, D) f32
    mem = mem_ref[...]                                       # (B, S, D) f32
    B, T, D = x.shape
    S = mem.shape[1]
    dk = D // nhead
    scale = 1.0 / math.sqrt(dk)

    # ---- self-attention sub-block (fused QKV projection, B folded into M) --
    x2d = x.reshape(B * T, D)
    qkv = jnp.dot(x2d.astype(BF16), wqkv_ref[...],
                  preferred_element_type=F32) + bqkv_ref[...]  # (B*T, 3D)
    q3 = (qkv[:, :D] * scale).reshape(B, T, D)
    k3 = qkv[:, D:2 * D].reshape(B, T, D)
    v3 = qkv[:, 2 * D:].reshape(B, T, D)
    # additive mask built in VMEM (f32): causal/user mask + key-padding bias
    bias = tmask_ref[...][None, :, :] + pbias_ref[...][:, None, :]  # (B, T, T)
    sa = _mha(q3, k3, v3, wo1_ref[...], bo1_ref[...], bias, nhead)  # (B*T, D)
    x2d = _layer_norm(x2d + sa, g1_ref[...], b1_ref[...])

    # ---- cross-attention sub-block (fused KV projection, no mask) ----------
    q3 = ((jnp.dot(x2d.astype(BF16), wq_ref[...],
                   preferred_element_type=F32) + bq_ref[...]) * scale
          ).reshape(B, T, D)
    m2d = mem.reshape(B * S, D)
    kv = jnp.dot(m2d.astype(BF16), wkv_ref[...],
                 preferred_element_type=F32) + bkv_ref[...]    # (B*S, 2D)
    k3 = kv[:, :D].reshape(B, S, D)
    v3 = kv[:, D:].reshape(B, S, D)
    ca = _mha(q3, k3, v3, wo2_ref[...], bo2_ref[...], None, nhead)  # (B*T, D)
    x2d = _layer_norm(x2d + ca, g2_ref[...], b2_ref[...])

    # ---- FFN sub-block (activation='relu') ----------------------------------
    h = jnp.dot(x2d.astype(BF16), w1_ref[...],
                preferred_element_type=F32) + bf1_ref[...]
    h = jnp.maximum(h, 0.0)
    y = x2d + jnp.dot(h.astype(BF16), w2_ref[...],
                      preferred_element_type=F32) + bf2_ref[...]
    y = _layer_norm(y, g3_ref[...], b3_ref[...])

    o_ref[...] = y.reshape(B, T, D)


def _generator_kernel(x_ref, w_ref, b_ref, o_ref):
    # One 128-wide vocab tile: o = x @ w_tile + b_tile  (lane-dense store).
    o_ref[...] = (jnp.dot(x_ref[...].astype(BF16), w_ref[...],
                          preferred_element_type=F32) + b_ref[...])


# ------------------------------ call wrappers ------------------------------- #

def _fs(shape):
    # Full-array BlockSpec with constant block index (grid step independent).
    # TODO(synk): at production sizes these constant-index weight specs should
    # use pipeline_mode=pl.Buffered(1) to avoid double-buffered weight VMEM.
    return pl.BlockSpec(shape, lambda i: (0,) * len(shape))


def decoder_layer_pallas(x, memory, tgt_mask, pad_bias, lp, nhead):
    B, T, D = x.shape
    S = memory.shape[1]
    F = lp["w1"].shape[1]
    kernel = functools.partial(_decoder_layer_kernel, nhead=nhead)
    return pl.pallas_call(
        kernel,
        out_shape=jax.ShapeDtypeStruct((B, T, D), F32),
        grid=(1,),
        in_specs=[
            _fs((B, T, D)), _fs((B, S, D)), _fs((T, T)), _fs((B, T)),
            _fs((D, 3 * D)), _fs((1, 3 * D)), _fs((D, D)), _fs((1, D)),
            _fs((1, D)), _fs((1, D)),
            _fs((D, D)), _fs((1, D)), _fs((D, 2 * D)), _fs((1, 2 * D)),
            _fs((D, D)), _fs((1, D)), _fs((1, D)), _fs((1, D)),
            _fs((D, F)), _fs((1, F)), _fs((F, D)), _fs((1, D)),
            _fs((1, D)), _fs((1, D)),
        ],
        out_specs=_fs((B, T, D)),
        compiler_params=pltpu.CompilerParams(
            dimension_semantics=("arbitrary",)),
    )(x, memory, tgt_mask, pad_bias,
      lp["wqkv"], lp["bqkv"], lp["wo1"], lp["bo1"], lp["g1"], lp["b1"],
      lp["wq"], lp["bq"], lp["wkv"], lp["bkv"], lp["wo2"], lp["bo2"],
      lp["g2"], lp["b2"],
      lp["w1"], lp["bf1"], lp["w2"], lp["bf2"], lp["g3"], lp["b3"])


def generator_pallas(x2d, w, b, tn=128):
    # x2d: (B*T, D) f32; w: (D, Vpad) bf16; b: (1, Vpad) f32. Vocab-tiled grid.
    BT, D = x2d.shape
    Vp = w.shape[1]
    return pl.pallas_call(
        _generator_kernel,
        out_shape=jax.ShapeDtypeStruct((BT, Vp), F32),
        grid=(Vp // tn,),
        in_specs=[
            pl.BlockSpec((BT, D), lambda j: (0, 0)),
            pl.BlockSpec((D, tn), lambda j: (0, j)),
            pl.BlockSpec((1, tn), lambda j: (0, j)),
        ],
        out_specs=pl.BlockSpec((BT, tn), lambda j: (0, j)),
        compiler_params=pltpu.CompilerParams(
            dimension_semantics=("parallel",)),
    )(x2d, w, b)


# ------------------------------ model pieces -------------------------------- #

def make_positional_encoding(max_len, d_model):
    pos = jnp.arange(max_len, dtype=F32)[:, None]
    div = jnp.exp(jnp.arange(0, d_model, 2, dtype=F32)
                  * (-math.log(10000.0) / d_model))
    pe = jnp.zeros((max_len, 1, d_model), F32)
    pe = pe.at[:, 0, 0::2].set(jnp.sin(pos * div))
    pe = pe.at[:, 0, 1::2].set(jnp.cos(pos * div))
    return pe


def transformer_decoder_forward(params, src_emb, tgt_tokens, tgt_mask,
                                tgt_padding_mask, *, nhead, emb_size, vocab):
    # src_emb: (B, D, H, W) NCHW; tgt_tokens: (B, T) int32.
    # Internal layout is batch-major (B, T, D)/(B, S, D).
    B, D, Hh, Ww = src_emb.shape
    S = Hh * Ww
    pe = params["pe"]                                           # (max_len, 1, D)

    memory = jnp.transpose(src_emb.reshape(B, D, S), (0, 2, 1))  # (B, S, D)
    memory = memory + jnp.transpose(pe[:S], (1, 0, 2))

    T = tgt_tokens.shape[1]
    tgt = params["embedding"][tgt_tokens] * math.sqrt(emb_size)  # (B, T, D)
    tgt = tgt + jnp.transpose(pe[:T], (1, 0, 2))

    # key-padding bias kept at (B, T); causal/user mask stays (T, T) — the
    # (B, T, T) additive mask is only ever formed inside the kernel (VMEM).
    pad_bias = jnp.where(tgt_padding_mask, jnp.float32(-1e9),
                         jnp.float32(0.0)).astype(F32)           # (B, T)

    x = tgt
    for lp in params["layers"]:
        x = decoder_layer_pallas(x, memory, tgt_mask, pad_bias, lp, nhead)

    logits_p = generator_pallas(x.reshape(B * T, D),
                                params["gen_w"], params["gen_b"])  # (B*T, Vpad)
    logits = logits_p.reshape(B, T, -1)[:, :, :vocab]
    return jnp.transpose(logits, (1, 0, 2))                      # (T, B, V)


# ---------------------------- parameter init --------------------------------- #

def init_params(key, emb_size, nhead, num_layers, vocab, dff, max_len=5000):
    D = emb_size
    keys = iter(jax.random.split(key, 10 * num_layers + 4))

    def u(shape, dtype=F32):
        return jax.random.uniform(next(keys), shape, F32, -0.1, 0.1).astype(dtype)

    zeros = lambda shape: jnp.zeros(shape, F32)
    ones = lambda shape: jnp.ones(shape, F32)

    layers = []
    for _ in range(num_layers):
        layers.append(dict(
            # matmul weights stored in bf16 (MXU operands); biases/LN in f32
            wqkv=u((D, 3 * D), BF16), bqkv=zeros((1, 3 * D)),
            wo1=u((D, D), BF16), bo1=zeros((1, D)),
            g1=ones((1, D)), b1=zeros((1, D)),
            wq=u((D, D), BF16), bq=zeros((1, D)),
            wkv=u((D, 2 * D), BF16), bkv=zeros((1, 2 * D)),
            wo2=u((D, D), BF16), bo2=zeros((1, D)),
            g2=ones((1, D)), b2=zeros((1, D)),
            w1=u((D, dff), BF16), bf1=zeros((1, dff)),
            w2=u((dff, D), BF16), bf2=zeros((1, D)),
            g3=ones((1, D)), b3=zeros((1, D)),
        ))

    # Generator weight padded to a lane-dense (multiple of 128) vocab.
    vpad = ((vocab + 127) // 128) * 128
    gen_w = jnp.zeros((D, vpad), F32).at[:, :vocab].set(
        jax.random.uniform(next(keys), (D, vocab), F32, -0.1, 0.1)).astype(BF16)
    gen_b = zeros((1, vpad))

    return dict(
        embedding=jax.random.uniform(next(keys), (vocab, D), F32, -0.1, 0.1),
        gen_w=gen_w, gen_b=gen_b,
        layers=layers,
        pe=make_positional_encoding(max_len, D),
    )


# --------------------------------- main -------------------------------------- #

if __name__ == "__main__":
    EMB, NHEAD, NLAYERS, VOCAB, DFF = 32, 4, 2, 50, 64
    B, Hh, Ww, T = 2, 4, 4, 8

    key = jax.random.PRNGKey(0)
    k_param, k_src, k_tok = jax.random.split(key, 3)

    params = init_params(k_param, EMB, NHEAD, NLAYERS, VOCAB, DFF)

    src_emb = jax.random.normal(k_src, (B, EMB, Hh, Ww), F32)          # NCHW
    tgt_tokens = jax.random.randint(k_tok, (B, T), 0, VOCAB, jnp.int32)
    # causal mask (additive float, -1e9 for disallowed positions)
    tgt_mask = jnp.where(jnp.triu(jnp.ones((T, T), bool), k=1),
                         -1e9, 0.0).astype(F32)
    # pad last two target positions of the second batch element
    tgt_padding_mask = jnp.zeros((B, T), bool).at[1, 6:].set(True)

    fwd = jax.jit(functools.partial(transformer_decoder_forward,
                                    nhead=NHEAD, emb_size=EMB, vocab=VOCAB))
    out = fwd(params, src_emb, tgt_tokens, tgt_mask, tgt_padding_mask)
    jax.block_until_ready(out)

    assert out.shape == (T, B, VOCAB), out.shape
    assert bool(jnp.all(jnp.isfinite(out)))
    print("KERNEL_OK")
</pallas_src>

<mosaic_0001>
module attributes {stable_mosaic.version = 11 : i64} {
  func.func @_generator_kernel(%arg0: i32, %arg1: memref<16x32xf32, #tpu.memory_space<vmem>>, %arg2: memref<32x128xbf16, #tpu.memory_space<vmem>>, %arg3: memref<1x128xf32, #tpu.memory_space<vmem>>, %arg4: memref<16x128xf32, #tpu.memory_space<vmem>>) attributes {dimension_semantics = [#tpu.dimension_semantics<parallel>], iteration_bounds = array<i64: 1>, scalar_prefetch = 0 : i64, scratch_operands = 0 : i64, tpu.core_type = #tpu.core_type<tc>, window_params = [{pipeline_mode = #tpu.pipeline_mode<synchronous>, transform_indices = @transform_0, window_bounds = array<i64: 16, 32>}, {transform_indices = @transform_1, window_bounds = array<i64: 32, 128>}, {transform_indices = @transform_2, window_bounds = array<i64: 1, 128>}, {transform_indices = @transform_3, window_bounds = array<i64: 16, 128>}]} {
    %c0 = arith.constant 0 : index
    %c0_0 = arith.constant 0 : index
    %0 = vector.load %arg1[%c0, %c0_0] : memref<16x32xf32, #tpu.memory_space<vmem>>, vector<16x32xf32>
    %1 = arith.truncf %0 : vector<16x32xf32> to vector<16x32xbf16>
    %c0_1 = arith.constant 0 : index
    %c0_2 = arith.constant 0 : index
    %2 = vector.load %arg2[%c0_1, %c0_2] : memref<32x128xbf16, #tpu.memory_space<vmem>>, vector<32x128xbf16>
    %cst = arith.constant dense<0.000000e+00> : vector<16x128xf32>
    %3 = tpu.matmul %1, %2, %cst {dimension_numbers = #tpu.dot_dimension_numbers<[1], [0], [0], [1], [0, 0, 1, 1], [], []>} : vector<16x32xbf16>, vector<32x128xbf16>, vector<16x128xf32> -> vector<16x128xf32>
    %c0_3 = arith.constant 0 : index
    %c0_4 = arith.constant 0 : index
    %4 = vector.load %arg3[%c0_3, %c0_4] : memref<1x128xf32, #tpu.memory_space<vmem>>, vector<1x128xf32>
    %5 = vector.broadcast %4 : vector<1x128xf32> to vector<16x128xf32>
    %6 = arith.addf %3, %5 : vector<16x128xf32>
    %c0_5 = arith.constant 0 : index
    %c0_6 = arith.constant 0 : index
    %7 = vector.load %arg4[%c0_5, %c0_6] : memref<16x128xf32, #tpu.memory_space<vmem>>, vector<16x128xf32>
    tpu.vector_store %arg4[%c0_5, %c0_6], %6 {strides = array<i32>} : memref<16x128xf32, #tpu.memory_space<vmem>>, vector<16x128xf32>,
    return
  }
  func.func @transform_0(%arg0: i32) -> (i32, i32) {
    %c0_i32 = arith.constant 0 : i32
    %c0_i32_0 = arith.constant 0 : i32
    %c0_i32_1 = arith.constant 0 : i32
    return %c0_i32, %c0_i32_0 : i32, i32
  }
  func.func @transform_1(%arg0: i32) -> (i32, i32) {
    %c0_i32 = arith.constant 0 : i32
    %c0_i32_0 = arith.constant 0 : i32
    return %c0_i32, %arg0 : i32, i32
  }
  func.func @transform_2(%arg0: i32) -> (i32, i32) {
    %c0_i32 = arith.constant 0 : i32
    %c0_i32_0 = arith.constant 0 : i32
    return %c0_i32, %arg0 : i32, i32
  }
  func.func @transform_3(%arg0: i32) -> (i32, i32) {
    %c0_i32 = arith.constant 0 : i32
    %c0_i32_0 = arith.constant 0 : i32
    return %c0_i32, %arg0 : i32, i32
  }
}

module attributes {stable_mosaic.version = 11 : i64} {
  func.func @_decoder_layer_kernel(%arg0: i32, %arg1: memref<2x8x32xf32, #tpu.memory_space<vmem>>, %arg2: memref<2x16x32xf32, #tpu.memory_space<vmem>>, %arg3: memref<8x8xf32, #tpu.memory_space<vmem>>, %arg4: memref<2x8xf32, #tpu.memory_space<vmem>>, %arg5: memref<32x96xbf16, #tpu.memory_space<vmem>>, %arg6: memref<1x96xf32, #tpu.memory_space<vmem>>, %arg7: memref<32x32xbf16, #tpu.memory_space<vmem>>, %arg8: memref<1x32xf32, #tpu.memory_space<vmem>>, %arg9: memref<1x32xf32, #tpu.memory_space<vmem>>, %arg10: memref<1x32xf32, #tpu.memory_space<vmem>>, %arg11: memref<32x32xbf16, #tpu.memory_space<vmem>>, %arg12: memref<1x32xf32, #tpu.memory_space<vmem>>, %arg13: memref<32x64xbf16, #tpu.memory_space<vmem>>, %arg14: memref<1x64xf32, #tpu.memory_space<vmem>>, %arg15: memref<32x32xbf16, #tpu.memory_space<vmem>>, %arg16: memref<1x32xf32, #tpu.memory_space<vmem>>, %arg17: memref<1x32xf32, #tpu.memory_space<vmem>>, %arg18: memref<1x32xf32, #tpu.memory_space<vmem>>, %arg19: memref<32x64xbf16, #tpu.memory_space<vmem>>, %arg20: memref<1x64xf32, #tpu.memory_space<vmem>>, %arg21: memref<64x32xbf16, #tpu.memory_space<vmem>>, %arg22: memref<1x32xf32, #tpu.memory_space<vmem>>, %arg23: memref<1x32xf32, #tpu.memory_space<vmem>>, %arg24: memref<1x32xf32, #tpu.memory_space<vmem>>, %arg25: memref<2x8x32xf32, #tpu.memory_space<vmem>>) attributes {dimension_semantics = [#tpu.dimension_semantics<arbitrary>], iteration_bounds = array<i64: 1>, scalar_prefetch = 0 : i64, scratch_operands = 0 : i64, tpu.core_type = #tpu.core_type<tc>, window_params = [{pipeline_mode = #tpu.pipeline_mode<synchronous>, transform_indices = @transform_0, window_bounds = array<i64: 2, 8, 32>}, {pipeline_mode = #tpu.pipeline_mode<synchronous>, transform_indices = @transform_1, window_bounds = array<i64: 2, 16, 32>}, {pipeline_mode = #tpu.pipeline_mode<synchronous>, transform_indices = @transform_2, window_bounds = array<i64: 8, 8>}, {pipeline_mode = #tpu.pipeline_mode<synchronous>, transform_indices = @transform_3, window_bounds = array<i64: 2, 8>}, {pipeline_mode = #tpu.pipeline_mode<synchronous>, transform_indices = @transform_4, window_bounds = array<i64: 32, 96>}, {pipeline_mode = #tpu.pipeline_mode<synchronous>, transform_indices = @transform_5, window_bounds = array<i64: 1, 96>}, {pipeline_mode = #tpu.pipeline_mode<synchronous>, transform_indices = @transform_6, window_bounds = array<i64: 32, 32>}, {pipeline_mode = #tpu.pipeline_mode<synchronous>, transform_indices = @transform_7, window_bounds = array<i64: 1, 32>}, {pipeline_mode = #tpu.pipeline_mode<synchronous>, transform_indices = @transform_8, window_bounds = array<i64: 1, 32>}, {pipeline_mode = #tpu.pipeline_mode<synchronous>, transform_indices = @transform_9, window_bounds = array<i64: 1, 32>}, {pipeline_mode = #tpu.pipeline_mode<synchronous>, transform_indices = @transform_10, window_bounds = array<i64: 32, 32>}, {pipeline_mode = #tpu.pipeline_mode<synchronous>, transform_indices = @transform_11, window_bounds = array<i64: 1, 32>}, {pipeline_mode = #tpu.pipeline_mode<synchronous>, transform_indices = @transform_12, window_bounds = array<i64: 32, 64>}, {pipeline_mode = #tpu.pipeline_mode<synchronous>, transform_indices = @transform_13, window_bounds = array<i64: 1, 64>}, {pipeline_mode = #tpu.pipeline_mode<synchronous>, transform_indices = @transform_14, window_bounds = array<i64: 32, 32>}, {pipeline_mode = #tpu.pipeline_mode<synchronous>, transform_indices = @transform_15, window_bounds = array<i64: 1, 32>}, {pipeline_mode = #tpu.pipeline_mode<synchronous>, transform_indices = @transform_16, window_bounds = array<i64: 1, 32>}, {pipeline_mode = #tpu.pipeline_mode<synchronous>, transform_indices = @transform_17, window_bounds = array<i64: 1, 32>}, {pipeline_mode = #tpu.pipeline_mode<synchronous>, transform_indices = @transform_18, window_bounds = array<i64: 32, 64>}, {pipeline_mode = #tpu.pipeline_mode<synchronous>, transform_indices = @transform_19, window_bounds = array<i64: 1, 64>}, {pipeline_mode = #tpu.pipeline_mode<synchronous>, transform_indices = @transform_20, window_bounds = array<i64: 64, 32>}, {pipeline_mode = #tpu.pipeline_mode<synchronous>, transform_indices = @transform_21, window_bounds = array<i64: 1, 32>}, {pipeline_mode = #tpu.pipeline_mode<synchronous>, transform_indices = @transform_22, window_bounds = array<i64: 1, 32>}, {pipeline_mode = #tpu.pipeline_mode<synchronous>, transform_indices = @transform_23, window_bounds = array<i64: 1, 32>}, {pipeline_mode = #tpu.pipeline_mode<synchronous>, transform_indices = @transform_24, window_bounds = array<i64: 2, 8, 32>}]} {
    %c0 = arith.constant 0 : index
    %c0_0 = arith.constant 0 : index
    %c0_1 = arith.constant 0 : index
    %0 = vector.load %arg1[%c0, %c0_0, %c0_1] : memref<2x8x32xf32, #tpu.memory_space<vmem>>, vector<2x8x32xf32>
    %c0_2 = arith.constant 0 : index
    %c0_3 = arith.constant 0 : index
    %c0_4 = arith.constant 0 : index
    %1 = vector.load %arg2[%c0_2, %c0_3, %c0_4] : memref<2x16x32xf32, #tpu.memory_space<vmem>>, vector<2x16x32xf32>
    %2 = vector.shape_cast %0 : vector<2x8x32xf32> to vector<16x32xf32>
    %3 = arith.truncf %2 : vector<16x32xf32> to vector<16x32xbf16>
    %c0_5 = arith.constant 0 : index
    %c0_6 = arith.constant 0 : index
    %4 = vector.load %arg5[%c0_5, %c0_6] : memref<32x96xbf16, #tpu.memory_space<vmem>>, vector<32x96xbf16>
    %cst = arith.constant dense<0.000000e+00> : vector<16x96xf32>
    %5 = tpu.matmul %3, %4, %cst {dimension_numbers = #tpu.dot_dimension_numbers<[1], [0], [0], [1], [0, 0, 1, 1], [], []>} : vector<16x32xbf16>, vector<32x96xbf16>, vector<16x96xf32> -> vector<16x96xf32>
    %c0_7 = arith.constant 0 : index
    %c0_8 = arith.constant 0 : index
    %6 = vector.load %arg6[%c0_7, %c0_8] : memref<1x96xf32, #tpu.memory_space<vmem>>, vector<1x96xf32>
    %7 = vector.broadcast %6 : vector<1x96xf32> to vector<16x96xf32>
    %8 = arith.addf %5, %7 : vector<16x96xf32>
    %9 = vector.extract_strided_slice %8 {offsets = [0, 0], sizes = [16, 32], strides = [1, 1]} : vector<16x96xf32> to vector<16x32xf32>
    %cst_9 = arith.constant 0.353553385 : f32
    %10 = vector.broadcast %cst_9 : f32 to vector<16x32xf32>
    %11 = arith.mulf %9, %10 : vector<16x32xf32>
    %12 = vector.shape_cast %11 : vector<16x32xf32> to vector<2x8x32xf32>
    %13 = vector.extract_strided_slice %8 {offsets = [0, 32], sizes = [16, 32], strides = [1, 1]} : vector<16x96xf32> to vector<16x32xf32>
    %14 = vector.shape_cast %13 : vector<16x32xf32> to vector<2x8x32xf32>
    %15 = vector.extract_strided_slice %8 {offsets = [0, 64], sizes = [16, 32], strides = [1, 1]} : vector<16x96xf32> to vector<16x32xf32>
    %16 = vector.shape_cast %15 : vector<16x32xf32> to vector<2x8x32xf32>
    %c0_10 = arith.constant 0 : index
    %c0_11 = arith.constant 0 : index
    %17 = vector.load %arg3[%c0_10, %c0_11] : memref<8x8xf32, #tpu.memory_space<vmem>>, vector<8x8xf32>
    %18 = vector.shape_cast %17 : vector<8x8xf32> to vector<1x8x8xf32>
    %c0_12 = arith.constant 0 : index
    %c0_13 = arith.constant 0 : index
    %19 = vector.load %arg4[%c0_12, %c0_13] : memref<2x8xf32, #tpu.memory_space<vmem>>, vector<2x8xf32>
    %20 = vector.shape_cast %19 : vector<2x8xf32> to vector<2x1x8xf32>
    %21 = vector.broadcast %18 : vector<1x8x8xf32> to vector<2x8x8xf32>
    %22 = vector.broadcast %20 : vector<2x1x8xf32> to vector<2x8x8xf32>
    %23 = arith.addf %21, %22 : vector<2x8x8xf32>
    %c0_14 = arith.constant 0 : index
    %c0_15 = arith.constant 0 : index
    %24 = vector.load %arg7[%c0_14, %c0_15] : memref<32x32xbf16, #tpu.memory_space<vmem>>, vector<32x32xbf16>
    %c0_16 = arith.constant 0 : index
    %c0_17 = arith.constant 0 : index
    %25 = vector.load %arg8[%c0_16, %c0_17] : memref<1x32xf32, #tpu.memory_space<vmem>>, vector<1x32xf32>
    %26 = vector.extract_strided_slice %12 {offsets = [0, 0, 0], sizes = [2, 8, 8], strides = [1, 1, 1]} : vector<2x8x32xf32> to vector<2x8x8xf32>
    %27 = arith.truncf %26 : vector<2x8x8xf32> to vector<2x8x8xbf16>
    %28 = vector.extract_strided_slice %14 {offsets = [0, 0, 0], sizes = [2, 8, 8], strides = [1, 1, 1]} : vector<2x8x32xf32> to vector<2x8x8xf32>
    %29 = arith.truncf %28 : vector<2x8x8xf32> to vector<2x8x8xbf16>
    "tpu.trace_start"() <{level = 10 : i32, message = "bqd,bkd->bqk"}> : () -> ()
    %cst_18 = arith.constant dense<0.000000e+00> : vector<2x8x8xf32>
    %30 = tpu.matmul %27, %29, %cst_18 {dimension_numbers = #tpu.dot_dimension_numbers<[2], [2], [1], [1], [0, 0, 0, 1, 1, 1], [0], [0]>} : vector<2x8x8xbf16>, vector<2x8x8xbf16>, vector<2x8x8xf32> -> vector<2x8x8xf32>
    "tpu.trace_stop"() : () -> ()
    %31 = arith.addf %30, %23 : vector<2x8x8xf32>
    %cst_19 = arith.constant dense<0xFF800000> : vector<2x8xf32>
    %32 = vector.multi_reduction <maximumf>, %31, %cst_19 [2] : vector<2x8x8xf32> to vector<2x8xf32>
    %33 = vector.shape_cast %32 : vector<2x8xf32> to vector<2x8x1xf32>
    %34 = vector.broadcast %33 : vector<2x8x1xf32> to vector<2x8x8xf32>
    %35 = arith.subf %31, %34 : vector<2x8x8xf32>
    %36 = math.exp %35 : vector<2x8x8xf32>
    %cst_20 = arith.constant dense<0.000000e+00> : vector<2x8xf32>
    %37 = vector.multi_reduction <add>, %36, %cst_20 [2] : vector<2x8x8xf32> to vector<2x8xf32>
    %38 = vector.shape_cast %37 : vector<2x8xf32> to vector<2x8x1xf32>
    %39 = tpu.reciprocal %38 {approx = true} : vector<2x8x1xf32> -> vector<2x8x1xf32>
    %40 = vector.broadcast %39 : vector<2x8x1xf32> to vector<2x8x8xf32>
    %41 = arith.mulf %36, %40 : vector<2x8x8xf32>
    %42 = arith.truncf %41 : vector<2x8x8xf32> to vector<2x8x8xbf16>
    %43 = vector.extract_strided_slice %16 {offsets = [0, 0, 0], sizes = [2, 8, 8], strides = [1, 1, 1]} : vector<2x8x32xf32> to vector<2x8x8xf32>
    %44 = arith.truncf %43 : vector<2x8x8xf32> to vector<2x8x8xbf16>
    "tpu.trace_start"() <{level = 10 : i32, message = "bqk,bkd->bqd"}> : () -> ()
    %cst_21 = arith.constant dense<0.000000e+00> : vector<2x8x8xf32>
    %45 = tpu.matmul %42, %44, %cst_21 {dimension_numbers = #tpu.dot_dimension_numbers<[2], [1], [1], [2], [0, 0, 0, 1, 1, 2], [0], [0]>} : vector<2x8x8xbf16>, vector<2x8x8xbf16>, vector<2x8x8xf32> -> vector<2x8x8xf32>
    "tpu.trace_stop"() : () -> ()
    %46 = vector.extract_strided_slice %12 {offsets = [0, 0, 8], sizes = [2, 8, 8], strides = [1, 1, 1]} : vector<2x8x32xf32> to vector<2x8x8xf32>
    %47 = arith.truncf %46 : vector<2x8x8xf32> to vector<2x8x8xbf16>
    %48 = vector.extract_strided_slice %14 {offsets = [0, 0, 8], sizes = [2, 8, 8], strides = [1, 1, 1]} : vector<2x8x32xf32> to vector<2x8x8xf32>
    %49 = arith.truncf %48 : vector<2x8x8xf32> to vector<2x8x8xbf16>
    "tpu.trace_start"() <{level = 10 : i32, message = "bqd,bkd->bqk"}> : () -> ()
    %cst_22 = arith.constant dense<0.000000e+00> : vector<2x8x8xf32>
    %50 = tpu.matmul %47, %49, %cst_22 {dimension_numbers = #tpu.dot_dimension_numbers<[2], [2], [1], [1], [0, 0, 0, 1, 1, 1], [0], [0]>} : vector<2x8x8xbf16>, vector<2x8x8xbf16>, vector<2x8x8xf32> -> vector<2x8x8xf32>
    "tpu.trace_stop"() : () -> ()
    %51 = arith.addf %50, %23 : vector<2x8x8xf32>
    %cst_23 = arith.constant dense<0xFF800000> : vector<2x8xf32>
    %52 = vector.multi_reduction <maximumf>, %51, %cst_23 [2] : vector<2x8x8xf32> to vector<2x8xf32>
    %53 = vector.shape_cast %52 : vector<2x8xf32> to vector<2x8x1xf32>
    %54 = vector.broadcast %53 : vector<2x8x1xf32> to vector<2x8x8xf32>
    %55 = arith.subf %51, %54 : vector<2x8x8xf32>
    %56 = math.exp %55 : vector<2x8x8xf32>
    %cst_24 = arith.constant dense<0.000000e+00> : vector<2x8xf32>
    %57 = vector.multi_reduction <add>, %56, %cst_24 [2] : vector<2x8x8xf32> to vector<2x8xf32>
    %58 = vector.shape_cast %57 : vector<2x8xf32> to vector<2x8x1xf32>
    %59 = tpu.reciprocal %58 {approx = true} : vector<2x8x1xf32> -> vector<2x8x1xf32>
    %60 = vector.broadcast %59 : vector<2x8x1xf32> to vector<2x8x8xf32>
    %61 = arith.mulf %56, %60 : vector<2x8x8xf32>
    %62 = arith.truncf %61 : vector<2x8x8xf32> to vector<2x8x8xbf16>
    %63 = vector.extract_strided_slice %16 {offsets = [0, 0, 8], sizes = [2, 8, 8], strides = [1, 1, 1]} : vector<2x8x32xf32> to vector<2x8x8xf32>
    %64 = arith.truncf %63 : vector<2x8x8xf32> to vector<2x8x8xbf16>
    "tpu.trace_start"() <{level = 10 : i32, message = "bqk,bkd->bqd"}> : () -> ()
    %cst_25 = arith.constant dense<0.000000e+00> : vector<2x8x8xf32>
    %65 = tpu.matmul %62, %64, %cst_25 {dimension_numbers = #tpu.dot_dimension_numbers<[2], [1], [1], [2], [0, 0, 0, 1, 1, 2], [0], [0]>} : vector<2x8x8xbf16>, vector<2x8x8xbf16>, vector<2x8x8xf32> -> vector<2x8x8xf32>
    "tpu.trace_stop"() : () -> ()
    %66 = vector.extract_strided_slice %12 {offsets = [0, 0, 16], sizes = [2, 8, 8], strides = [1, 1, 1]} : vector<2x8x32xf32> to vector<2x8x8xf32>
    %67 = arith.truncf %66 : vector<2x8x8xf32> to vector<2x8x8xbf16>
    %68 = vector.extract_strided_slice %14 {offsets = [0, 0, 16], sizes = [2, 8, 8], strides = [1, 1, 1]} : vector<2x8x32xf32> to vector<2x8x8xf32>
    %69 = arith.truncf %68 : vector<2x8x8xf32> to vector<2x8x8xbf16>
    "tpu.trace_start"() <{level = 10 : i32, message = "bqd,bkd->bqk"}> : () -> ()
    %cst_26 = arith.constant dense<0.000000e+00> : vector<2x8x8xf32>
    %70 = tpu.matmul %67, %69, %cst_26 {dimension_numbers = #tpu.dot_dimension_numbers<[2], [2], [1], [1], [0, 0, 0, 1, 1, 1], [0], [0]>} : vector<2x8x8xbf16>, vector<2x8x8xbf16>, vector<2x8x8xf32> -> vector<2x8x8xf32>
    "tpu.trace_stop"() : () -> ()
    %71 = arith.addf %70, %23 : vector<2x8x8xf32>
    %cst_27 = arith.constant dense<0xFF800000> : vector<2x8xf32>
    %72 = vector.multi_reduction <maximumf>, %71, %cst_27 [2] : vector<2x8x8xf32> to vector<2x8xf32>
    %73 = vector.shape_cast %72 : vector<2x8xf32> to vector<2x8x1xf32>
    %74 = vector.broadcast %73 : vector<2x8x1xf32> to vector<2x8x8xf32>
    %75 = arith.subf %71, %74 : vector<2x8x8xf32>
    %76 = math.exp %75 : vector<2x8x8xf32>
    %cst_28 = arith.constant dense<0.000000e+00> : vector<2x8xf32>
    %77 = vector.multi_reduction <add>, %76, %cst_28 [2] : vector<2x8x8xf32> to vector<2x8xf32>
    %78 = vector.shape_cast %77 : vector<2x8xf32> to vector<2x8x1xf32>
    %79 = tpu.reciprocal %78 {approx = true} : vector<2x8x1xf32> -> vector<2x8x1xf32>
    %80 = vector.broadcast %79 : vector<2x8x1xf32> to vector<2x8x8xf32>
    %81 = arith.mulf %76, %80 : vector<2x8x8xf32>
    %82 = arith.truncf %81 : vector<2x8x8xf32> to vector<2x8x8xbf16>
    %83 = vector.extract_strided_slice %16 {offsets = [0, 0, 16], sizes = [2, 8, 8], strides = [1, 1, 1]} : vector<2x8x32xf32> to vector<2x8x8xf32>
    %84 = arith.truncf %83 : vector<2x8x8xf32> to vector<2x8x8xbf16>
    "tpu.trace_start"() <{level = 10 : i32, message = "bqk,bkd->bqd"}> : () -> ()
    %cst_29 = arith.constant dense<0.000000e+00> : vector<2x8x8xf32>
    %85 = tpu.matmul %82, %84, %cst_29 {dimension_numbers = #tpu.dot_dimension_numbers<[2], [1], [1], [2], [0, 0, 0, 1, 1, 2], [0], [0]>} : vector<2x8x8xbf16>, vector<2x8x8xbf16>, vector<2x8x8xf32> -> vector<2x8x8xf32>
    "tpu.trace_stop"() : () -> ()
    %86 = vector.extract_strided_slice %12 {offsets = [0, 0, 24], sizes = [2, 8, 8], strides = [1, 1, 1]} : vector<2x8x32xf32> to vector<2x8x8xf32>
    %87 = arith.truncf %86 : vector<2x8x8xf32> to vector<2x8x8xbf16>
    %88 = vector.extract_strided_slice %14 {offsets = [0, 0, 24], sizes = [2, 8, 8], strides = [1, 1, 1]} : vector<2x8x32xf32> to vector<2x8x8xf32>
    %89 = arith.truncf %88 : vector<2x8x8xf32> to vector<2x8x8xbf16>
    "tpu.trace_start"() <{level = 10 : i32, message = "bqd,bkd->bqk"}> : () -> ()
    %cst_30 = arith.constant dense<0.000000e+00> : vector<2x8x8xf32>
    %90 = tpu.matmul %87, %89, %cst_30 {dimension_numbers = #tpu.dot_dimension_numbers<[2], [2], [1], [1], [0, 0, 0, 1, 1, 1], [0], [0]>} : vector<2x8x8xbf16>, vector<2x8x8xbf16>, vector<2x8x8xf32> -> vector<2x8x8xf32>
    "tpu.trace_stop"() : () -> ()
    %91 = arith.addf %90, %23 : vector<2x8x8xf32>
    %cst_31 = arith.constant dense<0xFF800000> : vector<2x8xf32>
    %92 = vector.multi_reduction <maximumf>, %91, %cst_31 [2] : vector<2x8x8xf32> to vector<2x8xf32>
    %93 = vector.shape_cast %92 : vector<2x8xf32> to vector<2x8x1xf32>
    %94 = vector.broadcast %93 : vector<2x8x1xf32> to vector<2x8x8xf32>
    %95 = arith.subf %91, %94 : vector<2x8x8xf32>
    %96 = math.exp %95 : vector<2x8x8xf32>
    %cst_32 = arith.constant dense<0.000000e+00> : vector<2x8xf32>
    %97 = vector.multi_reduction <add>, %96, %cst_32 [2] : vector<2x8x8xf32> to vector<2x8xf32>
    %98 = vector.shape_cast %97 : vector<2x8xf32> to vector<2x8x1xf32>
    %99 = tpu.reciprocal %98 {approx = true} : vector<2x8x1xf32> -> vector<2x8x1xf32>
    %100 = vector.broadcast %99 : vector<2x8x1xf32> to vector<2x8x8xf32>
    %101 = arith.mulf %96, %100 : vector<2x8x8xf32>
    %102 = arith.truncf %101 : vector<2x8x8xf32> to vector<2x8x8xbf16>
    %103 = vector.extract_strided_slice %16 {offsets = [0, 0, 24], sizes = [2, 8, 8], strides = [1, 1, 1]} : vector<2x8x32xf32> to vector<2x8x8xf32>
    %104 = arith.truncf %103 : vector<2x8x8xf32> to vector<2x8x8xbf16>
    "tpu.trace_start"() <{level = 10 : i32, message = "bqk,bkd->bqd"}> : () -> ()
    %cst_33 = arith.constant dense<0.000000e+00> : vector<2x8x8xf32>
    %105 = tpu.matmul %102, %104, %cst_33 {dimension_numbers = #tpu.dot_dimension_numbers<[2], [1], [1], [2], [0, 0, 0, 1, 1, 2], [0], [0]>} : vector<2x8x8xbf16>, vector<2x8x8xbf16>, vector<2x8x8xf32> -> vector<2x8x8xf32>
    "tpu.trace_stop"() : () -> ()
    %106 = tpu.concatenate %45, %65, %85, %105 in 2 : vector<2x8x8xf32>, vector<2x8x8xf32>, vector<2x8x8xf32>, vector<2x8x8xf32> -> vector<2x8x32xf32>
    %107 = vector.shape_cast %106 : vector<2x8x32xf32> to vector<16x32xf32>
    %108 = arith.truncf %107 : vector<16x32xf32> to vector<16x32xbf16>
    %cst_34 = arith.constant dense<0.000000e+00> : vector<16x32xf32>
    %109 = tpu.matmul %108, %24, %cst_34 {dimension_numbers = #tpu.dot_dimension_numbers<[1], [0], [0], [1], [0, 0, 1, 1], [], []>} : vector<16x32xbf16>, vector<32x32xbf16>, vector<16x32xf32> -> vector<16x32xf32>
    %110 = vector.broadcast %25 : vector<1x32xf32> to vector<16x32xf32>
    %111 = arith.addf %109, %110 : vector<16x32xf32>
    %112 = arith.addf %2, %111 : vector<16x32xf32>
    %c0_35 = arith.constant 0 : index
    %c0_36 = arith.constant 0 : index
    %113 = vector.load %arg9[%c0_35, %c0_36] : memref<1x32xf32, #tpu.memory_space<vmem>>, vector<1x32xf32>
    %c0_37 = arith.constant 0 : index
    %c0_38 = arith.constant 0 : index
    %114 = vector.load %arg10[%c0_37, %c0_38] : memref<1x32xf32, #tpu.memory_space<vmem>>, vector<1x32xf32>
    %cst_39 = arith.constant dense<0.000000e+00> : vector<16xf32>
    %115 = vector.multi_reduction <add>, %112, %cst_39 [1] : vector<16x32xf32> to vector<16xf32>
    %116 = vector.shape_cast %115 : vector<16xf32> to vector<16x1xf32>
    %cst_40 = arith.constant 3.200000e+01 : f32
    %117 = vector.broadcast %cst_40 : f32 to vector<16x1xf32>
    %118 = arith.divf %116, %117 : vector<16x1xf32>
    %119 = vector.broadcast %118 : vector<16x1xf32> to vector<16x32xf32>
    %120 = arith.subf %112, %119 : vector<16x32xf32>
    %121 = arith.mulf %120, %120 : vector<16x32xf32>
    %cst_41 = arith.constant dense<0.000000e+00> : vector<16xf32>
    %122 = vector.multi_reduction <add>, %121, %cst_41 [1] : vector<16x32xf32> to vector<16xf32>
    %123 = vector.shape_cast %122 : vector<16xf32> to vector<16x1xf32>
    %cst_42 = arith.constant 3.200000e+01 : f32
    %124 = vector.broadcast %cst_42 : f32 to vector<16x1xf32>
    %125 = arith.divf %123, %124 : vector<16x1xf32>
    %cst_43 = arith.constant 9.99999974E-6 : f32
    %126 = vector.broadcast %cst_43 : f32 to vector<16x1xf32>
    %127 = arith.addf %125, %126 : vector<16x1xf32>
    %128 = math.rsqrt %127 : vector<16x1xf32>
    %129 = vector.broadcast %128 : vector<16x1xf32> to vector<16x32xf32>
    %130 = arith.mulf %120, %129 : vector<16x32xf32>
    %131 = vector.broadcast %113 : vector<1x32xf32> to vector<16x32xf32>
    %132 = arith.mulf %130, %131 : vector<16x32xf32>
    %133 = vector.broadcast %114 : vector<1x32xf32> to vector<16x32xf32>
    %134 = arith.addf %132, %133 : vector<16x32xf32>
    %135 = arith.truncf %134 : vector<16x32xf32> to vector<16x32xbf16>
    %c0_44 = arith.constant 0 : index
    %c0_45 = arith.constant 0 : index
    %136 = vector.load %arg11[%c0_44, %c0_45] : memref<32x32xbf16, #tpu.memory_space<vmem>>, vector<32x32xbf16>
    %cst_46 = arith.constant dense<0.000000e+00> : vector<16x32xf32>
    %137 = tpu.matmul %135, %136, %cst_46 {dimension_numbers = #tpu.dot_dimension_numbers<[1], [0], [0], [1], [0, 0, 1, 1], [], []>} : vector<16x32xbf16>, vector<32x32xbf16>, vector<16x32xf32> -> vector<16x32xf32>
    %c0_47 = arith.constant 0 : index
    %c0_48 = arith.constant 0 : index
    %138 = vector.load %arg12[%c0_47, %c0_48] : memref<1x32xf32, #tpu.memory_space<vmem>>, vector<1x32xf32>
    %139 = vector.broadcast %138 : vector<1x32xf32> to vector<16x32xf32>
    %140 = arith.addf %137, %139 : vector<16x32xf32>
    %cst_49 = arith.constant 0.353553385 : f32
    %141 = vector.broadcast %cst_49 : f32 to vector<16x32xf32>
    %142 = arith.mulf %140, %141 : vector<16x32xf32>
    %143 = vector.shape_cast %142 : vector<16x32xf32> to vector<2x8x32xf32>
    %144 = vector.shape_cast %1 : vector<2x16x32xf32> to vector<32x32xf32>
    %145 = arith.truncf %144 : vector<32x32xf32> to vector<32x32xbf16>
    %c0_50 = arith.constant 0 : index
    %c0_51 = arith.constant 0 : index
    %146 = vector.load %arg13[%c0_50, %c0_51] : memref<32x64xbf16, #tpu.memory_space<vmem>>, vector<32x64xbf16>
    %cst_52 = arith.constant dense<0.000000e+00> : vector<32x64xf32>
    %147 = tpu.matmul %145, %146, %cst_52 {dimension_numbers = #tpu.dot_dimension_numbers<[1], [0], [0], [1], [0, 0, 1, 1], [], []>} : vector<32x32xbf16>, vector<32x64xbf16>, vector<32x64xf32> -> vector<32x64xf32>
    %c0_53 = arith.constant 0 : index
    %c0_54 = arith.constant 0 : index
    %148 = vector.load %arg14[%c0_53, %c0_54] : memref<1x64xf32, #tpu.memory_space<vmem>>, vector<1x64xf32>
    %149 = vector.broadcast %148 : vector<1x64xf32> to vector<32x64xf32>
    %150 = arith.addf %147, %149 : vector<32x64xf32>
    %151 = vector.extract_strided_slice %150 {offsets = [0, 0], sizes = [32, 32], strides = [1, 1]} : vector<32x64xf32> to vector<32x32xf32>
    %152 = vector.shape_cast %151 : vector<32x32xf32> to vector<2x16x32xf32>
    %153 = vector.extract_strided_slice %150 {offsets = [0, 32], sizes = [32, 32], strides = [1, 1]} : vector<32x64xf32> to vector<32x32xf32>
    %154 = vector.shape_cast %153 : vector<32x32xf32> to vector<2x16x32xf32>
    %c0_55 = arith.constant 0 : index
    %c0_56 = arith.constant 0 : index
    %155 = vector.load %arg15[%c0_55, %c0_56] : memref<32x32xbf16, #tpu.memory_space<vmem>>, vector<32x32xbf16>
    %c0_57 = arith.constant 0 : index
    %c0_58 = arith.constant 0 : index
    %156 = vector.load %arg16[%c0_57, %c0_58] : memref<1x32xf32, #tpu.memory_space<vmem>>, vector<1x32xf32>
    %157 = vector.extract_strided_slice %143 {offsets = [0, 0, 0], sizes = [2, 8, 8], strides = [1, 1, 1]} : vector<2x8x32xf32> to vector<2x8x8xf32>
    %158 = arith.truncf %157 : vector<2x8x8xf32> to vector<2x8x8xbf16>
    %159 = vector.extract_strided_slice %152 {offsets = [0, 0, 0], sizes = [2, 16, 8], strides = [1, 1, 1]} : vector<2x16x32xf32> to vector<2x16x8xf32>
    %160 = arith.truncf %159 : vector<2x16x8xf32> to vector<2x16x8xbf16>
    "tpu.trace_start"() <{level = 10 : i32, message = "bqd,bkd->bqk"}> : () -> ()
    %cst_59 = arith.constant dense<0.000000e+00> : vector<2x8x16xf32>
    %161 = tpu.matmul %158, %160, %cst_59 {dimension_numbers = #tpu.dot_dimension_numbers<[2], [2], [1], [1], [0, 0, 0, 1, 1, 1], [0], [0]>} : vector<2x8x8xbf16>, vector<2x16x8xbf16>, vector<2x8x16xf32> -> vector<2x8x16xf32>
    "tpu.trace_stop"() : () -> ()
    %cst_60 = arith.constant dense<0xFF800000> : vector<2x8xf32>
    %162 = vector.multi_reduction <maximumf>, %161, %cst_60 [2] : vector<2x8x16xf32> to vector<2x8xf32>
    %163 = vector.shape_cast %162 : vector<2x8xf32> to vector<2x8x1xf32>
    %164 = vector.broadcast %163 : vector<2x8x1xf32> to vector<2x8x16xf32>
    %165 = arith.subf %161, %164 : vector<2x8x16xf32>
    %166 = math.exp %165 : vector<2x8x16xf32>
    %cst_61 = arith.constant dense<0.000000e+00> : vector<2x8xf32>
    %167 = vector.multi_reduction <add>, %166, %cst_61 [2] : vector<2x8x16xf32> to vector<2x8xf32>
    %168 = vector.shape_cast %167 : vector<2x8xf32> to vector<2x8x1xf32>
    %169 = tpu.reciprocal %168 {approx = true} : vector<2x8x1xf32> -> vector<2x8x1xf32>
    %170 = vector.broadcast %169 : vector<2x8x1xf32> to vector<2x8x16xf32>
    %171 = arith.mulf %166, %170 : vector<2x8x16xf32>
    %172 = arith.truncf %171 : vector<2x8x16xf32> to vector<2x8x16xbf16>
    %173 = vector.extract_strided_slice %154 {offsets = [0, 0, 0], sizes = [2, 16, 8], strides = [1, 1, 1]} : vector<2x16x32xf32> to vector<2x16x8xf32>
    %174 = arith.truncf %173 : vector<2x16x8xf32> to vector<2x16x8xbf16>
    "tpu.trace_start"() <{level = 10 : i32, message = "bqk,bkd->bqd"}> : () -> ()
    %cst_62 = arith.constant dense<0.000000e+00> : vector<2x8x8xf32>
    %175 = tpu.matmul %172, %174, %cst_62 {dimension_numbers = #tpu.dot_dimension_numbers<[2], [1], [1], [2], [0, 0, 0, 1, 1, 2], [0], [0]>} : vector<2x8x16xbf16>, vector<2x16x8xbf16>, vector<2x8x8xf32> -> vector<2x8x8xf32>
    "tpu.trace_stop"() : () -> ()
    %176 = vector.extract_strided_slice %143 {offsets = [0, 0, 8], sizes = [2, 8, 8], strides = [1, 1, 1]} : vector<2x8x32xf32> to vector<2x8x8xf32>
    %177 = arith.truncf %176 : vector<2x8x8xf32> to vector<2x8x8xbf16>
    %178 = vector.extract_strided_slice %152 {offsets = [0, 0, 8], sizes = [2, 16, 8], strides = [1, 1, 1]} : vector<2x16x32xf32> to vector<2x16x8xf32>
    %179 = arith.truncf %178 : vector<2x16x8xf32> to vector<2x16x8xbf16>
    "tpu.trace_start"() <{level = 10 : i32, message = "bqd,bkd->bqk"}> : () -> ()
    %cst_63 = arith.constant dense<0.000000e+00> : vector<2x8x16xf32>
    %180 = tpu.matmul %177, %179, %cst_63 {dimension_numbers = #tpu.dot_dimension_numbers<[2], [2], [1], [1], [0, 0, 0, 1, 1, 1], [0], [0]>} : vector<2x8x8xbf16>, vector<2x16x8xbf16>, vector<2x8x16xf32> -> vector<2x8x16xf32>
    "tpu.trace_stop"() : () -> ()
    %cst_64 = arith.constant dense<0xFF800000> : vector<2x8xf32>
    %181 = vector.multi_reduction <maximumf>, %180, %cst_64 [2] : vector<2x8x16xf32> to vector<2x8xf32>
    %182 = vector.shape_cast %181 : vector<2x8xf32> to vector<2x8x1xf32>
    %183 = vector.broadcast %182 : vector<2x8x1xf32> to vector<2x8x16xf32>
    %184 = arith.subf %180, %183 : vector<2x8x16xf32>
    %185 = math.exp %184 : vector<2x8x16xf32>
    %cst_65 = arith.constant dense<0.000000e+00> : vector<2x8xf32>
    %186 = vector.multi_reduction <add>, %185, %cst_65 [2] : vector<2x8x16xf32> to vector<2x8xf32>
    %187 = vector.shape_cast %186 : vector<2x8xf32> to vector<2x8x1xf32>
    %188 = tpu.reciprocal %187 {approx = true} : vector<2x8x1xf32> -> vector<2x8x1xf32>
    %189 = vector.broadcast %188 : vector<2x8x1xf32> to vector<2x8x16xf32>
    %190 = arith.mulf %185, %189 : vector<2x8x16xf32>
    %191 = arith.truncf %190 : vector<2x8x16xf32> to vector<2x8x16xbf16>
    %192 = vector.extract_strided_slice %154 {offsets = [0, 0, 8], sizes = [2, 16, 8], strides = [1, 1, 1]} : vector<2x16x32xf32> to vector<2x16x8xf32>
    %193 = arith.truncf %192 : vector<2x16x8xf32> to vector<2x16x8xbf16>
    "tpu.trace_start"() <{level = 10 : i32, message = "bqk,bkd->bqd"}> : () -> ()
    %cst_66 = arith.constant dense<0.000000e+00> : vector<2x8x8xf32>
    %194 = tpu.matmul %191, %193, %cst_66 {dimension_numbers = #tpu.dot_dimension_numbers<[2], [1], [1], [2], [0, 0, 0, 1, 1, 2], [0], [0]>} : vector<2x8x16xbf16>, vector<2x16x8xbf16>, vector<2x8x8xf32> -> vector<2x8x8xf32>
    "tpu.trace_stop"() : () -> ()
    %195 = vector.extract_strided_slice %143 {offsets = [0, 0, 16], sizes = [2, 8, 8], strides = [1, 1, 1]} : vector<2x8x32xf32> to vector<2x8x8xf32>
    %196 = arith.truncf %195 : vector<2x8x8xf32> to vector<2x8x8xbf16>
    %197 = vector.extract_strided_slice %152 {offsets = [0, 0, 16], sizes = [2, 16, 8], strides = [1, 1, 1]} : vector<2x16x32xf32> to vector<2x16x8xf32>
    %198 = arith.truncf %197 : vector<2x16x8xf32> to vector<2x16x8xbf16>
    "tpu.trace_start"() <{level = 10 : i32, message = "bqd,bkd->bqk"}> : () -> ()
    %cst_67 = arith.constant dense<0.000000e+00> : vector<2x8x16xf32>
    %199 = tpu.matmul %196, %198, %cst_67 {dimension_numbers = #tpu.dot_dimension_numbers<[2], [2], [1], [1], [0, 0, 0, 1, 1, 1], [0], [0]>} : vector<2x8x8xbf16>, vector<2x16x8xbf16>, vector<2x8x16xf32> -> vector<2x8x16xf32>
    "tpu.trace_stop"() : () -> ()
    %cst_68 = arith.constant dense<0xFF800000> : vector<2x8xf32>
    %200 = vector.multi_reduction <maximumf>, %199, %cst_68 [2] : vector<2x8x16xf32> to vector<2x8xf32>
    %201 = vector.shape_cast %200 : vector<2x8xf32> to vector<2x8x1xf32>
    %202 = vector.broadcast %201 : vector<2x8x1xf32> to vector<2x8x16xf32>
    %203 = arith.subf %199, %202 : vector<2x8x16xf32>
    %204 = math.exp %203 : vector<2x8x16xf32>
    %cst_69 = arith.constant dense<0.000000e+00> : vector<2x8xf32>
    %205 = vector.multi_reduction <add>, %204, %cst_69 [2] : vector<2x8x16xf32> to vector<2x8xf32>
    %206 = vector.shape_cast %205 : vector<2x8xf32> to vector<2x8x1xf32>
    %207 = tpu.reciprocal %206 {approx = true} : vector<2x8x1xf32> -> vector<2x8x1xf32>
    %208 = vector.broadcast %207 : vector<2x8x1xf32> to vector<2x8x16xf32>
    %209 = arith.mulf %204, %208 : vector<2x8x16xf32>
    %210 = arith.truncf %209 : vector<2x8x16xf32> to vector<2x8x16xbf16>
    %211 = vector.extract_strided_slice %154 {offsets = [0, 0, 16], sizes = [2, 16, 8], strides = [1, 1, 1]} : vector<2x16x32xf32> to vector<2x16x8xf32>
    %212 = arith.truncf %211 : vector<2x16x8xf32> to vector<2x16x8xbf16>
    "tpu.trace_start"() <{level = 10 : i32, message = "bqk,bkd->bqd"}> : () -> ()
    %cst_70 = arith.constant dense<0.000000e+00> : vector<2x8x8xf32>
    %213 = tpu.matmul %210, %212, %cst_70 {dimension_numbers = #tpu.dot_dimension_numbers<[2], [1], [1], [2], [0, 0, 0, 1, 1, 2], [0], [0]>} : vector<2x8x16xbf16>, vector<2x16x8xbf16>, vector<2x8x8xf32> -> vector<2x8x8xf32>
    "tpu.trace_stop"() : () -> ()
    %214 = vector.extract_strided_slice %143 {offsets = [0, 0, 24], sizes = [2, 8, 8], strides = [1, 1, 1]} : vector<2x8x32xf32> to vector<2x8x8xf32>
    %215 = arith.truncf %214 : vector<2x8x8xf32> to vector<2x8x8xbf16>
    %216 = vector.extract_strided_slice %152 {offsets = [0, 0, 24], sizes = [2, 16, 8], strides = [1, 1, 1]} : vector<2x16x32xf32> to vector<2x16x8xf32>
    %217 = arith.truncf %216 : vector<2x16x8xf32> to vector<2x16x8xbf16>
    "tpu.trace_start"() <{level = 10 : i32, message = "bqd,bkd->bqk"}> : () -> ()
    %cst_71 = arith.constant dense<0.000000e+00> : vector<2x8x16xf32>
    %218 = tpu.matmul %215, %217, %cst_71 {dimension_numbers = #tpu.dot_dimension_numbers<[2], [2], [1], [1], [0, 0, 0, 1, 1, 1], [0], [0]>} : vector<2x8x8xbf16>, vector<2x16x8xbf16>, vector<2x8x16xf32> -> vector<2x8x16xf32>
    "tpu.trace_stop"() : () -> ()
    %cst_72 = arith.constant dense<0xFF800000> : vector<2x8xf32>
    %219 = vector.multi_reduction <maximumf>, %218, %cst_72 [2] : vector<2x8x16xf32> to vector<2x8xf32>
    %220 = vector.shape_cast %219 : vector<2x8xf32> to vector<2x8x1xf32>
    %221 = vector.broadcast %220 : vector<2x8x1xf32> to vector<2x8x16xf32>
    %222 = arith.subf %218, %221 : vector<2x8x16xf32>
    %223 = math.exp %222 : vector<2x8x16xf32>
    %cst_73 = arith.constant dense<0.000000e+00> : vector<2x8xf32>
    %224 = vector.multi_reduction <add>, %223, %cst_73 [2] : vector<2x8x16xf32> to vector<2x8xf32>
    %225 = vector.shape_cast %224 : vector<2x8xf32> to vector<2x8x1xf32>
    %226 = tpu.reciprocal %225 {approx = true} : vector<2x8x1xf32> -> vector<2x8x1xf32>
    %227 = vector.broadcast %226 : vector<2x8x1xf32> to vector<2x8x16xf32>
    %228 = arith.mulf %223, %227 : vector<2x8x16xf32>
    %229 = arith.truncf %228 : vector<2x8x16xf32> to vector<2x8x16xbf16>
    %230 = vector.extract_strided_slice %154 {offsets = [0, 0, 24], sizes = [2, 16, 8], strides = [1, 1, 1]} : vector<2x16x32xf32> to vector<2x16x8xf32>
    %231 = arith.truncf %230 : vector<2x16x8xf32> to vector<2x16x8xbf16>
    "tpu.trace_start"() <{level = 10 : i32, message = "bqk,bkd->bqd"}> : () -> ()
    %cst_74 = arith.constant dense<0.000000e+00> : vector<2x8x8xf32>
    %232 = tpu.matmul %229, %231, %cst_74 {dimension_numbers = #tpu.dot_dimension_numbers<[2], [1], [1], [2], [0, 0, 0, 1, 1, 2], [0], [0]>} : vector<2x8x16xbf16>, vector<2x16x8xbf16>, vector<2x8x8xf32> -> vector<2x8x8xf32>
    "tpu.trace_stop"() : () -> ()
    %233 = tpu.concatenate %175, %194, %213, %232 in 2 : vector<2x8x8xf32>, vector<2x8x8xf32>, vector<2x8x8xf32>, vector<2x8x8xf32> -> vector<2x8x32xf32>
    %234 = vector.shape_cast %233 : vector<2x8x32xf32> to vector<16x32xf32>
    %235 = arith.truncf %234 : vector<16x32xf32> to vector<16x32xbf16>
    %cst_75 = arith.constant dense<0.000000e+00> : vector<16x32xf32>
    %236 = tpu.matmul %235, %155, %cst_75 {dimension_numbers = #tpu.dot_dimension_numbers<[1], [0], [0], [1], [0, 0, 1, 1], [], []>} : vector<16x32xbf16>, vector<32x32xbf16>, vector<16x32xf32> -> vector<16x32xf32>
    %237 = vector.broadcast %156 : vector<1x32xf32> to vector<16x32xf32>
    %238 = arith.addf %236, %237 : vector<16x32xf32>
    %239 = arith.addf %134, %238 : vector<16x32xf32>
    %c0_76 = arith.constant 0 : index
    %c0_77 = arith.constant 0 : index
    %240 = vector.load %arg17[%c0_76, %c0_77] : memref<1x32xf32, #tpu.memory_space<vmem>>, vector<1x32xf32>
    %c0_78 = arith.constant 0 : index
    %c0_79 = arith.constant 0 : index
    %241 = vector.load %arg18[%c0_78, %c0_79] : memref<1x32xf32, #tpu.memory_space<vmem>>, vector<1x32xf32>
    %cst_80 = arith.constant dense<0.000000e+00> : vector<16xf32>
    %242 = vector.multi_reduction <add>, %239, %cst_80 [1] : vector<16x32xf32> to vector<16xf32>
    %243 = vector.shape_cast %242 : vector<16xf32> to vector<16x1xf32>
    %cst_81 = arith.constant 3.200000e+01 : f32
    %244 = vector.broadcast %cst_81 : f32 to vector<16x1xf32>
    %245 = arith.divf %243, %244 : vector<16x1xf32>
    %246 = vector.broadcast %245 : vector<16x1xf32> to vector<16x32xf32>
    %247 = arith.subf %239, %246 : vector<16x32xf32>
    %248 = arith.mulf %247, %247 : vector<16x32xf32>
    %cst_82 = arith.constant dense<0.000000e+00> : vector<16xf32>
    %249 = vector.multi_reduction <add>, %248, %cst_82 [1] : vector<16x32xf32> to vector<16xf32>
    %250 = vector.shape_cast %249 : vector<16xf32> to vector<16x1xf32>
    %cst_83 = arith.constant 3.200000e+01 : f32
    %251 = vector.broadcast %cst_83 : f32 to vector<16x1xf32>
    %252 = arith.divf %250, %251 : vector<16x1xf32>
    %cst_84 = arith.constant 9.99999974E-6 : f32
    %253 = vector.broadcast %cst_84 : f32 to vector<16x1xf32>
    %254 = arith.addf %252, %253 : vector<16x1xf32>
    %255 = math.rsqrt %254 : vector<16x1xf32>
    %256 = vector.broadcast %255 : vector<16x1xf32> to vector<16x32xf32>
    %257 = arith.mulf %247, %256 : vector<16x32xf32>
    %258 = vector.broadcast %240 : vector<1x32xf32> to vector<16x32xf32>
    %259 = arith.mulf %257, %258 : vector<16x32xf32>
    %260 = vector.broadcast %241 : vector<1x32xf32> to vector<16x32xf32>
    %261 = arith.addf %259, %260 : vector<16x32xf32>
    %262 = arith.truncf %261 : vector<16x32xf32> to vector<16x32xbf16>
    %c0_85 = arith.constant 0 : index
    %c0_86 = arith.constant 0 : index
    %263 = vector.load %arg19[%c0_85, %c0_86] : memref<32x64xbf16, #tpu.memory_space<vmem>>, vector<32x64xbf16>
    %cst_87 = arith.constant dense<0.000000e+00> : vector<16x64xf32>
    %264 = tpu.matmul %262, %263, %cst_87 {dimension_numbers = #tpu.dot_dimension_numbers<[1], [0], [0], [1], [0, 0, 1, 1], [], []>} : vector<16x32xbf16>, vector<32x64xbf16>, vector<16x64xf32> -> vector<16x64xf32>
    %c0_88 = arith.constant 0 : index
    %c0_89 = arith.constant 0 : index
    %265 = vector.load %arg20[%c0_88, %c0_89] : memref<1x64xf32, #tpu.memory_space<vmem>>, vector<1x64xf32>
    %266 = vector.broadcast %265 : vector<1x64xf32> to vector<16x64xf32>
    %267 = arith.addf %264, %266 : vector<16x64xf32>
    %cst_90 = arith.constant 0.000000e+00 : f32
    %268 = vector.broadcast %cst_90 : f32 to vector<16x64xf32>
    %269 = arith.maximumf %267, %268 : vector<16x64xf32>
    %270 = arith.truncf %269 : vector<16x64xf32> to vector<16x64xbf16>
    %c0_91 = arith.constant 0 : index
    %c0_92 = arith.constant 0 : index
    %271 = vector.load %arg21[%c0_91, %c0_92] : memref<64x32xbf16, #tpu.memory_space<vmem>>, vector<64x32xbf16>
    %cst_93 = arith.constant dense<0.000000e+00> : vector<16x32xf32>
    %272 = tpu.matmul %270, %271, %cst_93 {dimension_numbers = #tpu.dot_dimension_numbers<[1], [0], [0], [1], [0, 0, 1, 1], [], []>} : vector<16x64xbf16>, vector<64x32xbf16>, vector<16x32xf32> -> vector<16x32xf32>
    %273 = arith.addf %261, %272 : vector<16x32xf32>
    %c0_94 = arith.constant 0 : index
    %c0_95 = arith.constant 0 : index
    %274 = vector.load %arg22[%c0_94, %c0_95] : memref<1x32xf32, #tpu.memory_space<vmem>>, vector<1x32xf32>
    %275 = vector.broadcast %274 : vector<1x32xf32> to vector<16x32xf32>
    %276 = arith.addf %273, %275 : vector<16x32xf32>
    %c0_96 = arith.constant 0 : index
    %c0_97 = arith.constant 0 : index
    %277 = vector.load %arg23[%c0_96, %c0_97] : memref<1x32xf32, #tpu.memory_space<vmem>>, vector<1x32xf32>
    %c0_98 = arith.constant 0 : index
    %c0_99 = arith.constant 0 : index
    %278 = vector.load %arg24[%c0_98, %c0_99] : memref<1x32xf32, #tpu.memory_space<vmem>>, vector<1x32xf32>
    %cst_100 = arith.constant dense<0.000000e+00> : vector<16xf32>
    %279 = vector.multi_reduction <add>, %276, %cst_100 [1] : vector<16x32xf32> to vector<16xf32>
    %280 = vector.shape_cast %279 : vector<16xf32> to vector<16x1xf32>
    %cst_101 = arith.constant 3.200000e+01 : f32
    %281 = vector.broadcast %cst_101 : f32 to vector<16x1xf32>
    %282 = arith.divf %280, %281 : vector<16x1xf32>
    %283 = vector.broadcast %282 : vector<16x1xf32> to vector<16x32xf32>
    %284 = arith.subf %276, %283 : vector<16x32xf32>
    %285 = arith.mulf %284, %284 : vector<16x32xf32>
    %cst_102 = arith.constant dense<0.000000e+00> : vector<16xf32>
    %286 = vector.multi_reduction <add>, %285, %cst_102 [1] : vector<16x32xf32> to vector<16xf32>
    %287 = vector.shape_cast %286 : vector<16xf32> to vector<16x1xf32>
    %cst_103 = arith.constant 3.200000e+01 : f32
    %288 = vector.broadcast %cst_103 : f32 to vector<16x1xf32>
    %289 = arith.divf %287, %288 : vector<16x1xf32>
    %cst_104 = arith.constant 9.99999974E-6 : f32
    %290 = vector.broadcast %cst_104 : f32 to vector<16x1xf32>
    %291 = arith.addf %289, %290 : vector<16x1xf32>
    %292 = math.rsqrt %291 : vector<16x1xf32>
    %293 = vector.broadcast %292 : vector<16x1xf32> to vector<16x32xf32>
    %294 = arith.mulf %284, %293 : vector<16x32xf32>
    %295 = vector.broadcast %277 : vector<1x32xf32> to vector<16x32xf32>
    %296 = arith.mulf %294, %295 : vector<16x32xf32>
    %297 = vector.broadcast %278 : vector<1x32xf32> to vector<16x32xf32>
    %298 = arith.addf %296, %297 : vector<16x32xf32>
    %299 = vector.shape_cast %298 : vector<16x32xf32> to vector<2x8x32xf32>
    %c0_105 = arith.constant 0 : index
    %c0_106 = arith.constant 0 : index
    %c0_107 = arith.constant 0 : index
    %300 = vector.load %arg25[%c0_105, %c0_106, %c0_107] : memref<2x8x32xf32, #tpu.memory_space<vmem>>, vector<2x8x32xf32>
    tpu.vector_store %arg25[%c0_105, %c0_106, %c0_107], %299 {strides = array<i32>} : memref<2x8x32xf32, #tpu.memory_space<vmem>>, vector<2x8x32xf32>,
    return
  }
  func.func @transform_0(%arg0: i32) -> (i32, i32, i32) {
    %c0_i32 = arith.constant 0 : i32
    %c0_i32_0 = arith.constant 0 : i32
    %c0_i32_1 = arith.constant 0 : i32
    %c0_i32_2 = arith.constant 0 : i32
    return %c0_i32, %c0_i32_0, %c0_i32_1 : i32, i32, i32
  }
  func.func @transform_1(%arg0: i32) -> (i32, i32, i32) {
    %c0_i32 = arith.constant 0 : i32
    %c0_i32_0 = arith.constant 0 : i32
    %c0_i32_1 = arith.constant 0 : i32
    %c0_i32_2 = arith.constant 0 : i32
    return %c0_i32, %c0_i32_0, %c0_i32_1 : i32, i32, i32
  }
  func.func @transform_2(%arg0: i32) -> (i32, i32) {
    %c0_i32 = arith.constant 0 : i32
    %c0_i32_0 = arith.constant 0 : i32
    %c0_i32_1 = arith.constant 0 : i32
    return %c0_i32, %c0_i32_0 : i32, i32
  }
  func.func @transform_3(%arg0: i32) -> (i32, i32) {
    %c0_i32 = arith.constant 0 : i32
    %c0_i32_0 = arith.constant 0 : i32
    %c0_i32_1 = arith.constant 0 : i32
    return %c0_i32, %c0_i32_0 : i32, i32
  }
  func.func @transform_4(%arg0: i32) -> (i32, i32) {
    %c0_i32 = arith.constant 0 : i32
    %c0_i32_0 = arith.constant 0 : i32
    %c0_i32_1 = arith.constant 0 : i32
    return %c0_i32, %c0_i32_0 : i32, i32
  }
  func.func @transform_5(%arg0: i32) -> (i32, i32) {
    %c0_i32 = arith.constant 0 : i32
    %c0_i32_0 = arith.constant 0 : i32
    %c0_i32_1 = arith.constant 0 : i32
    return %c0_i32, %c0_i32_0 : i32, i32
  }
  func.func @transform_6(%arg0: i32) -> (i32, i32) {
    %c0_i32 = arith.constant 0 : i32
    %c0_i32_0 = arith.constant 0 : i32
    %c0_i32_1 = arith.constant 0 : i32
    return %c0_i32, %c0_i32_0 : i32, i32
  }
  func.func @transform_7(%arg0: i32) -> (i32, i32) {
    %c0_i32 = arith.constant 0 : i32
    %c0_i32_0 = arith.constant 0 : i32
    %c0_i32_1 = arith.constant 0 : i32
    return %c0_i32, %c0_i32_0 : i32, i32
  }
  func.func @transform_8(%arg0: i32) -> (i32, i32) {
    %c0_i32 = arith.constant 0 : i32
    %c0_i32_0 = arith.constant 0 : i32
    %c0_i32_1 = arith.constant 0 : i32
    return %c0_i32, %c0_i32_0 : i32, i32
  }
  func.func @transform_9(%arg0: i32) -> (i32, i32) {
    %c0_i32 = arith.constant 0 : i32
    %c0_i32_0 = arith.constant 0 : i32
    %c0_i32_1 = arith.constant 0 : i32
    return %c0_i32, %c0_i32_0 : i32, i32
  }
  func.func @transform_10(%arg0: i32) -> (i32, i32) {
    %c0_i32 = arith.constant 0 : i32
    %c0_i32_0 = arith.constant 0 : i32
    %c0_i32_1 = arith.constant 0 : i32
    return %c0_i32, %c0_i32_0 : i32, i32
  }
  func.func @transform_11(%arg0: i32) -> (i32, i32) {
    %c0_i32 = arith.constant 0 : i32
    %c0_i32_0 = arith.constant 0 : i32
    %c0_i32_1 = arith.constant 0 : i32
    return %c0_i32, %c0_i32_0 : i32, i32
  }
  func.func @transform_12(%arg0: i32) -> (i32, i32) {
    %c0_i32 = arith.constant 0 : i32
    %c0_i32_0 = arith.constant 0 : i32
    %c0_i32_1 = arith.constant 0 : i32
    return %c0_i32, %c0_i32_0 : i32, i32
  }
  func.func @transform_13(%arg0: i32) -> (i32, i32) {
    %c0_i32 = arith.constant 0 : i32
    %c0_i32_0 = arith.constant 0 : i32
    %c0_i32_1 = arith.constant 0 : i32
    return %c0_i32, %c0_i32_0 : i32, i32
  }
  func.func @transform_14(%arg0: i32) -> (i32, i32) {
    %c0_i32 = arith.constant 0 : i32
    %c0_i32_0 = arith.constant 0 : i32
    %c0_i32_1 = arith.constant 0 : i32
    return %c0_i32, %c0_i32_0 : i32, i32
  }
  func.func @transform_15(%arg0: i32) -> (i32, i32) {
    %c0_i32 = arith.constant 0 : i32
    %c0_i32_0 = arith.constant 0 : i32
    %c0_i32_1 = arith.constant 0 : i32
    return %c0_i32, %c0_i32_0 : i32, i32
  }
  func.func @transform_16(%arg0: i32) -> (i32, i32) {
    %c0_i32 = arith.constant 0 : i32
    %c0_i32_0 = arith.constant 0 : i32
    %c0_i32_1 = arith.constant 0 : i32
    return %c0_i32, %c0_i32_0 : i32, i32
  }
  func.func @transform_17(%arg0: i32) -> (i32, i32) {
    %c0_i32 = arith.constant 0 : i32
    %c0_i32_0 = arith.constant 0 : i32
    %c0_i32_1 = arith.constant 0 : i32
    return %c0_i32, %c0_i32_0 : i32, i32
  }
  func.func @transform_18(%arg0: i32) -> (i32, i32) {
    %c0_i32 = arith.constant 0 : i32
    %c0_i32_0 = arith.constant 0 : i32
    %c0_i32_1 = arith.constant 0 : i32
    return %c0_i32, %c0_i32_0 : i32, i32
  }
  func.func @transform_19(%arg0: i32) -> (i32, i32) {
    %c0_i32 = arith.constant 0 : i32
    %c0_i32_0 = arith.constant 0 : i32
    %c0_i32_1 = arith.constant 0 : i32
    return %c0_i32, %c0_i32_0 : i32, i32
  }
  func.func @transform_20(%arg0: i32) -> (i32, i32) {
    %c0_i32 = arith.constant 0 : i32
    %c0_i32_0 = arith.constant 0 : i32
    %c0_i32_1 = arith.constant 0 : i32
    return %c0_i32, %c0_i32_0 : i32, i32
  }
  func.func @transform_21(%arg0: i32) -> (i32, i32) {
    %c0_i32 = arith.constant 0 : i32
    %c0_i32_0 = arith.constant 0 : i32
    %c0_i32_1 = arith.constant 0 : i32
    return %c0_i32, %c0_i32_0 : i32, i32
  }
  func.func @transform_22(%arg0: i32) -> (i32, i32) {
    %c0_i32 = arith.constant 0 : i32
    %c0_i32_0 = arith.constant 0 : i32
    %c0_i32_1 = arith.constant 0 : i32
    return %c0_i32, %c0_i32_0 : i32, i32
  }
  func.func @transform_23(%arg0: i32) -> (i32, i32) {
    %c0_i32 = arith.constant 0 : i32
    %c0_i32_0 = arith.constant 0 : i32
    %c0_i32_1 = arith.constant 0 : i32
    return %c0_i32, %c0_i32_0 : i32, i32
  }
  func.func @transform_24(%arg0: i32) -> (i32, i32, i32) {
    %c0_i32 = arith.constant 0 : i32
    %c0_i32_0 = arith.constant 0 : i32
    %c0_i32_1 = arith.constant 0 : i32
    %c0_i32_2 = arith.constant 0 : i32
    return %c0_i32, %c0_i32_0, %c0_i32_1 : i32, i32, i32
  }
}

module attributes {stable_mosaic.version = 11 : i64} {
  func.func @_decoder_layer_kernel(%arg0: i32, %arg1: memref<2x8x32xf32, #tpu.memory_space<vmem>>, %arg2: memref<2x16x32xf32, #tpu.memory_space<vmem>>, %arg3: memref<8x8xf32, #tpu.memory_space<vmem>>, %arg4: memref<2x8xf32, #tpu.memory_space<vmem>>, %arg5: memref<32x96xbf16, #tpu.memory_space<vmem>>, %arg6: memref<1x96xf32, #tpu.memory_space<vmem>>, %arg7: memref<32x32xbf16, #tpu.memory_space<vmem>>, %arg8: memref<1x32xf32, #tpu.memory_space<vmem>>, %arg9: memref<1x32xf32, #tpu.memory_space<vmem>>, %arg10: memref<1x32xf32, #tpu.memory_space<vmem>>, %arg11: memref<32x32xbf16, #tpu.memory_space<vmem>>, %arg12: memref<1x32xf32, #tpu.memory_space<vmem>>, %arg13: memref<32x64xbf16, #tpu.memory_space<vmem>>, %arg14: memref<1x64xf32, #tpu.memory_space<vmem>>, %arg15: memref<32x32xbf16, #tpu.memory_space<vmem>>, %arg16: memref<1x32xf32, #tpu.memory_space<vmem>>, %arg17: memref<1x32xf32, #tpu.memory_space<vmem>>, %arg18: memref<1x32xf32, #tpu.memory_space<vmem>>, %arg19: memref<32x64xbf16, #tpu.memory_space<vmem>>, %arg20: memref<1x64xf32, #tpu.memory_space<vmem>>, %arg21: memref<64x32xbf16, #tpu.memory_space<vmem>>, %arg22: memref<1x32xf32, #tpu.memory_space<vmem>>, %arg23: memref<1x32xf32, #tpu.memory_space<vmem>>, %arg24: memref<1x32xf32, #tpu.memory_space<vmem>>, %arg25: memref<2x8x32xf32, #tpu.memory_space<vmem>>) attributes {dimension_semantics = [#tpu.dimension_semantics<arbitrary>], iteration_bounds = array<i64: 1>, scalar_prefetch = 0 : i64, scratch_operands = 0 : i64, tpu.core_type = #tpu.core_type<tc>, window_params = [{pipeline_mode = #tpu.pipeline_mode<synchronous>, transform_indices = @transform_0, window_bounds = array<i64: 2, 8, 32>}, {pipeline_mode = #tpu.pipeline_mode<synchronous>, transform_indices = @transform_1, window_bounds = array<i64: 2, 16, 32>}, {pipeline_mode = #tpu.pipeline_mode<synchronous>, transform_indices = @transform_2, window_bounds = array<i64: 8, 8>}, {pipeline_mode = #tpu.pipeline_mode<synchronous>, transform_indices = @transform_3, window_bounds = array<i64: 2, 8>}, {pipeline_mode = #tpu.pipeline_mode<synchronous>, transform_indices = @transform_4, window_bounds = array<i64: 32, 96>}, {pipeline_mode = #tpu.pipeline_mode<synchronous>, transform_indices = @transform_5, window_bounds = array<i64: 1, 96>}, {pipeline_mode = #tpu.pipeline_mode<synchronous>, transform_indices = @transform_6, window_bounds = array<i64: 32, 32>}, {pipeline_mode = #tpu.pipeline_mode<synchronous>, transform_indices = @transform_7, window_bounds = array<i64: 1, 32>}, {pipeline_mode = #tpu.pipeline_mode<synchronous>, transform_indices = @transform_8, window_bounds = array<i64: 1, 32>}, {pipeline_mode = #tpu.pipeline_mode<synchronous>, transform_indices = @transform_9, window_bounds = array<i64: 1, 32>}, {pipeline_mode = #tpu.pipeline_mode<synchronous>, transform_indices = @transform_10, window_bounds = array<i64: 32, 32>}, {pipeline_mode = #tpu.pipeline_mode<synchronous>, transform_indices = @transform_11, window_bounds = array<i64: 1, 32>}, {pipeline_mode = #tpu.pipeline_mode<synchronous>, transform_indices = @transform_12, window_bounds = array<i64: 32, 64>}, {pipeline_mode = #tpu.pipeline_mode<synchronous>, transform_indices = @transform_13, window_bounds = array<i64: 1, 64>}, {pipeline_mode = #tpu.pipeline_mode<synchronous>, transform_indices = @transform_14, window_bounds = array<i64: 32, 32>}, {pipeline_mode = #tpu.pipeline_mode<synchronous>, transform_indices = @transform_15, window_bounds = array<i64: 1, 32>}, {pipeline_mode = #tpu.pipeline_mode<synchronous>, transform_indices = @transform_16, window_bounds = array<i64: 1, 32>}, {pipeline_mode = #tpu.pipeline_mode<synchronous>, transform_indices = @transform_17, window_bounds = array<i64: 1, 32>}, {pipeline_mode = #tpu.pipeline_mode<synchronous>, transform_indices = @transform_18, window_bounds = array<i64: 32, 64>}, {pipeline_mode = #tpu.pipeline_mode<synchronous>, transform_indices = @transform_19, window_bounds = array<i64: 1, 64>}, {pipeline_mode = #tpu.pipeline_mode<synchronous>, transform_indices = @transform_20, window_bounds = array<i64: 64, 32>}, {pipeline_mode = #tpu.pipeline_mode<synchronous>, transform_indices = @transform_21, window_bounds = array<i64: 1, 32>}, {pipeline_mode = #tpu.pipeline_mode<synchronous>, transform_indices = @transform_22, window_bounds = array<i64: 1, 32>}, {pipeline_mode = #tpu.pipeline_mode<synchronous>, transform_indices = @transform_23, window_bounds = array<i64: 1, 32>}, {pipeline_mode = #tpu.pipeline_mode<synchronous>, transform_indices = @transform_24, window_bounds = array<i64: 2, 8, 32>}]} {
    %c0 = arith.constant 0 : index
    %c0_0 = arith.constant 0 : index
    %c0_1 = arith.constant 0 : index
    %0 = vector.load %arg1[%c0, %c0_0, %c0_1] : memref<2x8x32xf32, #tpu.memory_space<vmem>>, vector<2x8x32xf32>
    %c0_2 = arith.constant 0 : index
    %c0_3 = arith.constant 0 : index
    %c0_4 = arith.constant 0 : index
    %1 = vector.load %arg2[%c0_2, %c0_3, %c0_4] : memref<2x16x32xf32, #tpu.memory_space<vmem>>, vector<2x16x32xf32>
    %2 = vector.shape_cast %0 : vector<2x8x32xf32> to vector<16x32xf32>
    %3 = arith.truncf %2 : vector<16x32xf32> to vector<16x32xbf16>
    %c0_5 = arith.constant 0 : index
    %c0_6 = arith.constant 0 : index
    %4 = vector.load %arg5[%c0_5, %c0_6] : memref<32x96xbf16, #tpu.memory_space<vmem>>, vector<32x96xbf16>
    %cst = arith.constant dense<0.000000e+00> : vector<16x96xf32>
    %5 = tpu.matmul %3, %4, %cst {dimension_numbers = #tpu.dot_dimension_numbers<[1], [0], [0], [1], [0, 0, 1, 1], [], []>} : vector<16x32xbf16>, vector<32x96xbf16>, vector<16x96xf32> -> vector<16x96xf32>
    %c0_7 = arith.constant 0 : index
    %c0_8 = arith.constant 0 : index
    %6 = vector.load %arg6[%c0_7, %c0_8] : memref<1x96xf32, #tpu.memory_space<vmem>>, vector<1x96xf32>
    %7 = vector.broadcast %6 : vector<1x96xf32> to vector<16x96xf32>
    %8 = arith.addf %5, %7 : vector<16x96xf32>
    %9 = vector.extract_strided_slice %8 {offsets = [0, 0], sizes = [16, 32], strides = [1, 1]} : vector<16x96xf32> to vector<16x32xf32>
    %cst_9 = arith.constant 0.353553385 : f32
    %10 = vector.broadcast %cst_9 : f32 to vector<16x32xf32>
    %11 = arith.mulf %9, %10 : vector<16x32xf32>
    %12 = vector.shape_cast %11 : vector<16x32xf32> to vector<2x8x32xf32>
    %13 = vector.extract_strided_slice %8 {offsets = [0, 32], sizes = [16, 32], strides = [1, 1]} : vector<16x96xf32> to vector<16x32xf32>
    %14 = vector.shape_cast %13 : vector<16x32xf32> to vector<2x8x32xf32>
    %15 = vector.extract_strided_slice %8 {offsets = [0, 64], sizes = [16, 32], strides = [1, 1]} : vector<16x96xf32> to vector<16x32xf32>
    %16 = vector.shape_cast %15 : vector<16x32xf32> to vector<2x8x32xf32>
    %c0_10 = arith.constant 0 : index
    %c0_11 = arith.constant 0 : index
    %17 = vector.load %arg3[%c0_10, %c0_11] : memref<8x8xf32, #tpu.memory_space<vmem>>, vector<8x8xf32>
    %18 = vector.shape_cast %17 : vector<8x8xf32> to vector<1x8x8xf32>
    %c0_12 = arith.constant 0 : index
    %c0_13 = arith.constant 0 : index
    %19 = vector.load %arg4[%c0_12, %c0_13] : memref<2x8xf32, #tpu.memory_space<vmem>>, vector<2x8xf32>
    %20 = vector.shape_cast %19 : vector<2x8xf32> to vector<2x1x8xf32>
    %21 = vector.broadcast %18 : vector<1x8x8xf32> to vector<2x8x8xf32>
    %22 = vector.broadcast %20 : vector<2x1x8xf32> to vector<2x8x8xf32>
    %23 = arith.addf %21, %22 : vector<2x8x8xf32>
    %c0_14 = arith.constant 0 : index
    %c0_15 = arith.constant 0 : index
    %24 = vector.load %arg7[%c0_14, %c0_15] : memref<32x32xbf16, #tpu.memory_space<vmem>>, vector<32x32xbf16>
    %c0_16 = arith.constant 0 : index
    %c0_17 = arith.constant 0 : index
    %25 = vector.load %arg8[%c0_16, %c0_17] : memref<1x32xf32, #tpu.memory_space<vmem>>, vector<1x32xf32>
    %26 = vector.extract_strided_slice %12 {offsets = [0, 0, 0], sizes = [2, 8, 8], strides = [1, 1, 1]} : vector<2x8x32xf32> to vector<2x8x8xf32>
    %27 = arith.truncf %26 : vector<2x8x8xf32> to vector<2x8x8xbf16>
    %28 = vector.extract_strided_slice %14 {offsets = [0, 0, 0], sizes = [2, 8, 8], strides = [1, 1, 1]} : vector<2x8x32xf32> to vector<2x8x8xf32>
    %29 = arith.truncf %28 : vector<2x8x8xf32> to vector<2x8x8xbf16>
    "tpu.trace_start"() <{level = 10 : i32, message = "bqd,bkd->bqk"}> : () -> ()
    %cst_18 = arith.constant dense<0.000000e+00> : vector<2x8x8xf32>
    %30 = tpu.matmul %27, %29, %cst_18 {dimension_numbers = #tpu.dot_dimension_numbers<[2], [2], [1], [1], [0, 0, 0, 1, 1, 1], [0], [0]>} : vector<2x8x8xbf16>, vector<2x8x8xbf16>, vector<2x8x8xf32> -> vector<2x8x8xf32>
    "tpu.trace_stop"() : () -> ()
    %31 = arith.addf %30, %23 : vector<2x8x8xf32>
    %cst_19 = arith.constant dense<0xFF800000> : vector<2x8xf32>
    %32 = vector.multi_reduction <maximumf>, %31, %cst_19 [2] : vector<2x8x8xf32> to vector<2x8xf32>
    %33 = vector.shape_cast %32 : vector<2x8xf32> to vector<2x8x1xf32>
    %34 = vector.broadcast %33 : vector<2x8x1xf32> to vector<2x8x8xf32>
    %35 = arith.subf %31, %34 : vector<2x8x8xf32>
    %36 = math.exp %35 : vector<2x8x8xf32>
    %cst_20 = arith.constant dense<0.000000e+00> : vector<2x8xf32>
    %37 = vector.multi_reduction <add>, %36, %cst_20 [2] : vector<2x8x8xf32> to vector<2x8xf32>
    %38 = vector.shape_cast %37 : vector<2x8xf32> to vector<2x8x1xf32>
    %39 = tpu.reciprocal %38 {approx = true} : vector<2x8x1xf32> -> vector<2x8x1xf32>
    %40 = vector.broadcast %39 : vector<2x8x1xf32> to vector<2x8x8xf32>
    %41 = arith.mulf %36, %40 : vector<2x8x8xf32>
    %42 = arith.truncf %41 : vector<2x8x8xf32> to vector<2x8x8xbf16>
    %43 = vector.extract_strided_slice %16 {offsets = [0, 0, 0], sizes = [2, 8, 8], strides = [1, 1, 1]} : vector<2x8x32xf32> to vector<2x8x8xf32>
    %44 = arith.truncf %43 : vector<2x8x8xf32> to vector<2x8x8xbf16>
    "tpu.trace_start"() <{level = 10 : i32, message = "bqk,bkd->bqd"}> : () -> ()
    %cst_21 = arith.constant dense<0.000000e+00> : vector<2x8x8xf32>
    %45 = tpu.matmul %42, %44, %cst_21 {dimension_numbers = #tpu.dot_dimension_numbers<[2], [1], [1], [2], [0, 0, 0, 1, 1, 2], [0], [0]>} : vector<2x8x8xbf16>, vector<2x8x8xbf16>, vector<2x8x8xf32> -> vector<2x8x8xf32>
    "tpu.trace_stop"() : () -> ()
    %46 = vector.extract_strided_slice %12 {offsets = [0, 0, 8], sizes = [2, 8, 8], strides = [1, 1, 1]} : vector<2x8x32xf32> to vector<2x8x8xf32>
    %47 = arith.truncf %46 : vector<2x8x8xf32> to vector<2x8x8xbf16>
    %48 = vector.extract_strided_slice %14 {offsets = [0, 0, 8], sizes = [2, 8, 8], strides = [1, 1, 1]} : vector<2x8x32xf32> to vector<2x8x8xf32>
    %49 = arith.truncf %48 : vector<2x8x8xf32> to vector<2x8x8xbf16>
    "tpu.trace_start"() <{level = 10 : i32, message = "bqd,bkd->bqk"}> : () -> ()
    %cst_22 = arith.constant dense<0.000000e+00> : vector<2x8x8xf32>
    %50 = tpu.matmul %47, %49, %cst_22 {dimension_numbers = #tpu.dot_dimension_numbers<[2], [2], [1], [1], [0, 0, 0, 1, 1, 1], [0], [0]>} : vector<2x8x8xbf16>, vector<2x8x8xbf16>, vector<2x8x8xf32> -> vector<2x8x8xf32>
    "tpu.trace_stop"() : () -> ()
    %51 = arith.addf %50, %23 : vector<2x8x8xf32>
    %cst_23 = arith.constant dense<0xFF800000> : vector<2x8xf32>
    %52 = vector.multi_reduction <maximumf>, %51, %cst_23 [2] : vector<2x8x8xf32> to vector<2x8xf32>
    %53 = vector.shape_cast %52 : vector<2x8xf32> to vector<2x8x1xf32>
    %54 = vector.broadcast %53 : vector<2x8x1xf32> to vector<2x8x8xf32>
    %55 = arith.subf %51, %54 : vector<2x8x8xf32>
    %56 = math.exp %55 : vector<2x8x8xf32>
    %cst_24 = arith.constant dense<0.000000e+00> : vector<2x8xf32>
    %57 = vector.multi_reduction <add>, %56, %cst_24 [2] : vector<2x8x8xf32> to vector<2x8xf32>
    %58 = vector.shape_cast %57 : vector<2x8xf32> to vector<2x8x1xf32>
    %59 = tpu.reciprocal %58 {approx = true} : vector<2x8x1xf32> -> vector<2x8x1xf32>
    %60 = vector.broadcast %59 : vector<2x8x1xf32> to vector<2x8x8xf32>
    %61 = arith.mulf %56, %60 : vector<2x8x8xf32>
    %62 = arith.truncf %61 : vector<2x8x8xf32> to vector<2x8x8xbf16>
    %63 = vector.extract_strided_slice %16 {offsets = [0, 0, 8], sizes = [2, 8, 8], strides = [1, 1, 1]} : vector<2x8x32xf32> to vector<2x8x8xf32>
    %64 = arith.truncf %63 : vector<2x8x8xf32> to vector<2x8x8xbf16>
    "tpu.trace_start"() <{level = 10 : i32, message = "bqk,bkd->bqd"}> : () -> ()
    %cst_25 = arith.constant dense<0.000000e+00> : vector<2x8x8xf32>
    %65 = tpu.matmul %62, %64, %cst_25 {dimension_numbers = #tpu.dot_dimension_numbers<[2], [1], [1], [2], [0, 0, 0, 1, 1, 2], [0], [0]>} : vector<2x8x8xbf16>, vector<2x8x8xbf16>, vector<2x8x8xf32> -> vector<2x8x8xf32>
    "tpu.trace_stop"() : () -> ()
    %66 = vector.extract_strided_slice %12 {offsets = [0, 0, 16], sizes = [2, 8, 8], strides = [1, 1, 1]} : vector<2x8x32xf32> to vector<2x8x8xf32>
    %67 = arith.truncf %66 : vector<2x8x8xf32> to vector<2x8x8xbf16>
    %68 = vector.extract_strided_slice %14 {offsets = [0, 0, 16], sizes = [2, 8, 8], strides = [1, 1, 1]} : vector<2x8x32xf32> to vector<2x8x8xf32>
    %69 = arith.truncf %68 : vector<2x8x8xf32> to vector<2x8x8xbf16>
    "tpu.trace_start"() <{level = 10 : i32, message = "bqd,bkd->bqk"}> : () -> ()
    %cst_26 = arith.constant dense<0.000000e+00> : vector<2x8x8xf32>
    %70 = tpu.matmul %67, %69, %cst_26 {dimension_numbers = #tpu.dot_dimension_numbers<[2], [2], [1], [1], [0, 0, 0, 1, 1, 1], [0], [0]>} : vector<2x8x8xbf16>, vector<2x8x8xbf16>, vector<2x8x8xf32> -> vector<2x8x8xf32>
    "tpu.trace_stop"() : () -> ()
    %71 = arith.addf %70, %23 : vector<2x8x8xf32>
    %cst_27 = arith.constant dense<0xFF800000> : vector<2x8xf32>
    %72 = vector.multi_reduction <maximumf>, %71, %cst_27 [2] : vector<2x8x8xf32> to vector<2x8xf32>
    %73 = vector.shape_cast %72 : vector<2x8xf32> to vector<2x8x1xf32>
    %74 = vector.broadcast %73 : vector<2x8x1xf32> to vector<2x8x8xf32>
    %75 = arith.subf %71, %74 : vector<2x8x8xf32>
    %76 = math.exp %75 : vector<2x8x8xf32>
    %cst_28 = arith.constant dense<0.000000e+00> : vector<2x8xf32>
    %77 = vector.multi_reduction <add>, %76, %cst_28 [2] : vector<2x8x8xf32> to vector<2x8xf32>
    %78 = vector.shape_cast %77 : vector<2x8xf32> to vector<2x8x1xf32>
    %79 = tpu.reciprocal %78 {approx = true} : vector<2x8x1xf32> -> vector<2x8x1xf32>
    %80 = vector.broadcast %79 : vector<2x8x1xf32> to vector<2x8x8xf32>
    %81 = arith.mulf %76, %80 : vector<2x8x8xf32>
    %82 = arith.truncf %81 : vector<2x8x8xf32> to vector<2x8x8xbf16>
    %83 = vector.extract_strided_slice %16 {offsets = [0, 0, 16], sizes = [2, 8, 8], strides = [1, 1, 1]} : vector<2x8x32xf32> to vector<2x8x8xf32>
    %84 = arith.truncf %83 : vector<2x8x8xf32> to vector<2x8x8xbf16>
    "tpu.trace_start"() <{level = 10 : i32, message = "bqk,bkd->bqd"}> : () -> ()
    %cst_29 = arith.constant dense<0.000000e+00> : vector<2x8x8xf32>
    %85 = tpu.matmul %82, %84, %cst_29 {dimension_numbers = #tpu.dot_dimension_numbers<[2], [1], [1], [2], [0, 0, 0, 1, 1, 2], [0], [0]>} : vector<2x8x8xbf16>, vector<2x8x8xbf16>, vector<2x8x8xf32> -> vector<2x8x8xf32>
    "tpu.trace_stop"() : () -> ()
    %86 = vector.extract_strided_slice %12 {offsets = [0, 0, 24], sizes = [2, 8, 8], strides = [1, 1, 1]} : vector<2x8x32xf32> to vector<2x8x8xf32>
    %87 = arith.truncf %86 : vector<2x8x8xf32> to vector<2x8x8xbf16>
    %88 = vector.extract_strided_slice %14 {offsets = [0, 0, 24], sizes = [2, 8, 8], strides = [1, 1, 1]} : vector<2x8x32xf32> to vector<2x8x8xf32>
    %89 = arith.truncf %88 : vector<2x8x8xf32> to vector<2x8x8xbf16>
    "tpu.trace_start"() <{level = 10 : i32, message = "bqd,bkd->bqk"}> : () -> ()
    %cst_30 = arith.constant dense<0.000000e+00> : vector<2x8x8xf32>
    %90 = tpu.matmul %87, %89, %cst_30 {dimension_numbers = #tpu.dot_dimension_numbers<[2], [2], [1], [1], [0, 0, 0, 1, 1, 1], [0], [0]>} : vector<2x8x8xbf16>, vector<2x8x8xbf16>, vector<2x8x8xf32> -> vector<2x8x8xf32>
    "tpu.trace_stop"() : () -> ()
    %91 = arith.addf %90, %23 : vector<2x8x8xf32>
    %cst_31 = arith.constant dense<0xFF800000> : vector<2x8xf32>
    %92 = vector.multi_reduction <maximumf>, %91, %cst_31 [2] : vector<2x8x8xf32> to vector<2x8xf32>
    %93 = vector.shape_cast %92 : vector<2x8xf32> to vector<2x8x1xf32>
    %94 = vector.broadcast %93 : vector<2x8x1xf32> to vector<2x8x8xf32>
    %95 = arith.subf %91, %94 : vector<2x8x8xf32>
    %96 = math.exp %95 : vector<2x8x8xf32>
    %cst_32 = arith.constant dense<0.000000e+00> : vector<2x8xf32>
    %97 = vector.multi_reduction <add>, %96, %cst_32 [2] : vector<2x8x8xf32> to vector<2x8xf32>
    %98 = vector.shape_cast %97 : vector<2x8xf32> to vector<2x8x1xf32>
    %99 = tpu.reciprocal %98 {approx = true} : vector<2x8x1xf32> -> vector<2x8x1xf32>
    %100 = vector.broadcast %99 : vector<2x8x1xf32> to vector<2x8x8xf32>
    %101 = arith.mulf %96, %100 : vector<2x8x8xf32>
    %102 = arith.truncf %101 : vector<2x8x8xf32> to vector<2x8x8xbf16>
    %103 = vector.extract_strided_slice %16 {offsets = [0, 0, 24], sizes = [2, 8, 8], strides = [1, 1, 1]} : vector<2x8x32xf32> to vector<2x8x8xf32>
    %104 = arith.truncf %103 : vector<2x8x8xf32> to vector<2x8x8xbf16>
    "tpu.trace_start"() <{level = 10 : i32, message = "bqk,bkd->bqd"}> : () -> ()
    %cst_33 = arith.constant dense<0.000000e+00> : vector<2x8x8xf32>
    %105 = tpu.matmul %102, %104, %cst_33 {dimension_numbers = #tpu.dot_dimension_numbers<[2], [1], [1], [2], [0, 0, 0, 1, 1, 2], [0], [0]>} : vector<2x8x8xbf16>, vector<2x8x8xbf16>, vector<2x8x8xf32> -> vector<2x8x8xf32>
    "tpu.trace_stop"() : () -> ()
    %106 = tpu.concatenate %45, %65, %85, %105 in 2 : vector<2x8x8xf32>, vector<2x8x8xf32>, vector<2x8x8xf32>, vector<2x8x8xf32> -> vector<2x8x32xf32>
    %107 = vector.shape_cast %106 : vector<2x8x32xf32> to vector<16x32xf32>
    %108 = arith.truncf %107 : vector<16x32xf32> to vector<16x32xbf16>
    %cst_34 = arith.constant dense<0.000000e+00> : vector<16x32xf32>
    %109 = tpu.matmul %108, %24, %cst_34 {dimension_numbers = #tpu.dot_dimension_numbers<[1], [0], [0], [1], [0, 0, 1, 1], [], []>} : vector<16x32xbf16>, vector<32x32xbf16>, vector<16x32xf32> -> vector<16x32xf32>
    %110 = vector.broadcast %25 : vector<1x32xf32> to vector<16x32xf32>
    %111 = arith.addf %109, %110 : vector<16x32xf32>
    %112 = arith.addf %2, %111 : vector<16x32xf32>
    %c0_35 = arith.constant 0 : index
    %c0_36 = arith.constant 0 : index
    %113 = vector.load %arg9[%c0_35, %c0_36] : memref<1x32xf32, #tpu.memory_space<vmem>>, vector<1x32xf32>
    %c0_37 = arith.constant 0 : index
    %c0_38 = arith.constant 0 : index
    %114 = vector.load %arg10[%c0_37, %c0_38] : memref<1x32xf32, #tpu.memory_space<vmem>>, vector<1x32xf32>
    %cst_39 = arith.constant dense<0.000000e+00> : vector<16xf32>
    %115 = vector.multi_reduction <add>, %112, %cst_39 [1] : vector<16x32xf32> to vector<16xf32>
    %116 = vector.shape_cast %115 : vector<16xf32> to vector<16x1xf32>
    %cst_40 = arith.constant 3.200000e+01 : f32
    %117 = vector.broadcast %cst_40 : f32 to vector<16x1xf32>
    %118 = arith.divf %116, %117 : vector<16x1xf32>
    %119 = vector.broadcast %118 : vector<16x1xf32> to vector<16x32xf32>
    %120 = arith.subf %112, %119 : vector<16x32xf32>
    %121 = arith.mulf %120, %120 : vector<16x32xf32>
    %cst_41 = arith.constant dense<0.000000e+00> : vector<16xf32>
    %122 = vector.multi_reduction <add>, %121, %cst_41 [1] : vector<16x32xf32> to vector<16xf32>
    %123 = vector.shape_cast %122 : vector<16xf32> to vector<16x1xf32>
    %cst_42 = arith.constant 3.200000e+01 : f32
    %124 = vector.broadcast %cst_42 : f32 to vector<16x1xf32>
    %125 = arith.divf %123, %124 : vector<16x1xf32>
    %cst_43 = arith.constant 9.99999974E-6 : f32
    %126 = vector.broadcast %cst_43 : f32 to vector<16x1xf32>
    %127 = arith.addf %125, %126 : vector<16x1xf32>
    %128 = math.rsqrt %127 : vector<16x1xf32>
    %129 = vector.broadcast %128 : vector<16x1xf32> to vector<16x32xf32>
    %130 = arith.mulf %120, %129 : vector<16x32xf32>
    %131 = vector.broadcast %113 : vector<1x32xf32> to vector<16x32xf32>
    %132 = arith.mulf %130, %131 : vector<16x32xf32>
    %133 = vector.broadcast %114 : vector<1x32xf32> to vector<16x32xf32>
    %134 = arith.addf %132, %133 : vector<16x32xf32>
    %135 = arith.truncf %134 : vector<16x32xf32> to vector<16x32xbf16>
    %c0_44 = arith.constant 0 : index
    %c0_45 = arith.constant 0 : index
    %136 = vector.load %arg11[%c0_44, %c0_45] : memref<32x32xbf16, #tpu.memory_space<vmem>>, vector<32x32xbf16>
    %cst_46 = arith.constant dense<0.000000e+00> : vector<16x32xf32>
    %137 = tpu.matmul %135, %136, %cst_46 {dimension_numbers = #tpu.dot_dimension_numbers<[1], [0], [0], [1], [0, 0, 1, 1], [], []>} : vector<16x32xbf16>, vector<32x32xbf16>, vector<16x32xf32> -> vector<16x32xf32>
    %c0_47 = arith.constant 0 : index
    %c0_48 = arith.constant 0 : index
    %138 = vector.load %arg12[%c0_47, %c0_48] : memref<1x32xf32, #tpu.memory_space<vmem>>, vector<1x32xf32>
    %139 = vector.broadcast %138 : vector<1x32xf32> to vector<16x32xf32>
    %140 = arith.addf %137, %139 : vector<16x32xf32>
    %cst_49 = arith.constant 0.353553385 : f32
    %141 = vector.broadcast %cst_49 : f32 to vector<16x32xf32>
    %142 = arith.mulf %140, %141 : vector<16x32xf32>
    %143 = vector.shape_cast %142 : vector<16x32xf32> to vector<2x8x32xf32>
    %144 = vector.shape_cast %1 : vector<2x16x32xf32> to vector<32x32xf32>
    %145 = arith.truncf %144 : vector<32x32xf32> to vector<32x32xbf16>
    %c0_50 = arith.constant 0 : index
    %c0_51 = arith.constant 0 : index
    %146 = vector.load %arg13[%c0_50, %c0_51] : memref<32x64xbf16, #tpu.memory_space<vmem>>, vector<32x64xbf16>
    %cst_52 = arith.constant dense<0.000000e+00> : vector<32x64xf32>
    %147 = tpu.matmul %145, %146, %cst_52 {dimension_numbers = #tpu.dot_dimension_numbers<[1], [0], [0], [1], [0, 0, 1, 1], [], []>} : vector<32x32xbf16>, vector<32x64xbf16>, vector<32x64xf32> -> vector<32x64xf32>
    %c0_53 = arith.constant 0 : index
    %c0_54 = arith.constant 0 : index
    %148 = vector.load %arg14[%c0_53, %c0_54] : memref<1x64xf32, #tpu.memory_space<vmem>>, vector<1x64xf32>
    %149 = vector.broadcast %148 : vector<1x64xf32> to vector<32x64xf32>
    %150 = arith.addf %147, %149 : vector<32x64xf32>
    %151 = vector.extract_strided_slice %150 {offsets = [0, 0], sizes = [32, 32], strides = [1, 1]} : vector<32x64xf32> to vector<32x32xf32>
    %152 = vector.shape_cast %151 : vector<32x32xf32> to vector<2x16x32xf32>
    %153 = vector.extract_strided_slice %150 {offsets = [0, 32], sizes = [32, 32], strides = [1, 1]} : vector<32x64xf32> to vector<32x32xf32>
    %154 = vector.shape_cast %153 : vector<32x32xf32> to vector<2x16x32xf32>
    %c0_55 = arith.constant 0 : index
    %c0_56 = arith.constant 0 : index
    %155 = vector.load %arg15[%c0_55, %c0_56] : memref<32x32xbf16, #tpu.memory_space<vmem>>, vector<32x32xbf16>
    %c0_57 = arith.constant 0 : index
    %c0_58 = arith.constant 0 : index
    %156 = vector.load %arg16[%c0_57, %c0_58] : memref<1x32xf32, #tpu.memory_space<vmem>>, vector<1x32xf32>
    %157 = vector.extract_strided_slice %143 {offsets = [0, 0, 0], sizes = [2, 8, 8], strides = [1, 1, 1]} : vector<2x8x32xf32> to vector<2x8x8xf32>
    %158 = arith.truncf %157 : vector<2x8x8xf32> to vector<2x8x8xbf16>
    %159 = vector.extract_strided_slice %152 {offsets = [0, 0, 0], sizes = [2, 16, 8], strides = [1, 1, 1]} : vector<2x16x32xf32> to vector<2x16x8xf32>
    %160 = arith.truncf %159 : vector<2x16x8xf32> to vector<2x16x8xbf16>
    "tpu.trace_start"() <{level = 10 : i32, message = "bqd,bkd->bqk"}> : () -> ()
    %cst_59 = arith.constant dense<0.000000e+00> : vector<2x8x16xf32>
    %161 = tpu.matmul %158, %160, %cst_59 {dimension_numbers = #tpu.dot_dimension_numbers<[2], [2], [1], [1], [0, 0, 0, 1, 1, 1], [0], [0]>} : vector<2x8x8xbf16>, vector<2x16x8xbf16>, vector<2x8x16xf32> -> vector<2x8x16xf32>
    "tpu.trace_stop"() : () -> ()
    %cst_60 = arith.constant dense<0xFF800000> : vector<2x8xf32>
    %162 = vector.multi_reduction <maximumf>, %161, %cst_60 [2] : vector<2x8x16xf32> to vector<2x8xf32>
    %163 = vector.shape_cast %162 : vector<2x8xf32> to vector<2x8x1xf32>
    %164 = vector.broadcast %163 : vector<2x8x1xf32> to vector<2x8x16xf32>
    %165 = arith.subf %161, %164 : vector<2x8x16xf32>
    %166 = math.exp %165 : vector<2x8x16xf32>
    %cst_61 = arith.constant dense<0.000000e+00> : vector<2x8xf32>
    %167 = vector.multi_reduction <add>, %166, %cst_61 [2] : vector<2x8x16xf32> to vector<2x8xf32>
    %168 = vector.shape_cast %167 : vector<2x8xf32> to vector<2x8x1xf32>
    %169 = tpu.reciprocal %168 {approx = true} : vector<2x8x1xf32> -> vector<2x8x1xf32>
    %170 = vector.broadcast %169 : vector<2x8x1xf32> to vector<2x8x16xf32>
    %171 = arith.mulf %166, %170 : vector<2x8x16xf32>
    %172 = arith.truncf %171 : vector<2x8x16xf32> to vector<2x8x16xbf16>
    %173 = vector.extract_strided_slice %154 {offsets = [0, 0, 0], sizes = [2, 16, 8], strides = [1, 1, 1]} : vector<2x16x32xf32> to vector<2x16x8xf32>
    %174 = arith.truncf %173 : vector<2x16x8xf32> to vector<2x16x8xbf16>
    "tpu.trace_start"() <{level = 10 : i32, message = "bqk,bkd->bqd"}> : () -> ()
    %cst_62 = arith.constant dense<0.000000e+00> : vector<2x8x8xf32>
    %175 = tpu.matmul %172, %174, %cst_62 {dimension_numbers = #tpu.dot_dimension_numbers<[2], [1], [1], [2], [0, 0, 0, 1, 1, 2], [0], [0]>} : vector<2x8x16xbf16>, vector<2x16x8xbf16>, vector<2x8x8xf32> -> vector<2x8x8xf32>
    "tpu.trace_stop"() : () -> ()
    %176 = vector.extract_strided_slice %143 {offsets = [0, 0, 8], sizes = [2, 8, 8], strides = [1, 1, 1]} : vector<2x8x32xf32> to vector<2x8x8xf32>
    %177 = arith.truncf %176 : vector<2x8x8xf32> to vector<2x8x8xbf16>
    %178 = vector.extract_strided_slice %152 {offsets = [0, 0, 8], sizes = [2, 16, 8], strides = [1, 1, 1]} : vector<2x16x32xf32> to vector<2x16x8xf32>
    %179 = arith.truncf %178 : vector<2x16x8xf32> to vector<2x16x8xbf16>
    "tpu.trace_start"() <{level = 10 : i32, message = "bqd,bkd->bqk"}> : () -> ()
    %cst_63 = arith.constant dense<0.000000e+00> : vector<2x8x16xf32>
    %180 = tpu.matmul %177, %179, %cst_63 {dimension_numbers = #tpu.dot_dimension_numbers<[2], [2], [1], [1], [0, 0, 0, 1, 1, 1], [0], [0]>} : vector<2x8x8xbf16>, vector<2x16x8xbf16>, vector<2x8x16xf32> -> vector<2x8x16xf32>
    "tpu.trace_stop"() : () -> ()
    %cst_64 = arith.constant dense<0xFF800000> : vector<2x8xf32>
    %181 = vector.multi_reduction <maximumf>, %180, %cst_64 [2] : vector<2x8x16xf32> to vector<2x8xf32>
    %182 = vector.shape_cast %181 : vector<2x8xf32> to vector<2x8x1xf32>
    %183 = vector.broadcast %182 : vector<2x8x1xf32> to vector<2x8x16xf32>
    %184 = arith.subf %180, %183 : vector<2x8x16xf32>
    %185 = math.exp %184 : vector<2x8x16xf32>
    %cst_65 = arith.constant dense<0.000000e+00> : vector<2x8xf32>
    %186 = vector.multi_reduction <add>, %185, %cst_65 [2] : vector<2x8x16xf32> to vector<2x8xf32>
    %187 = vector.shape_cast %186 : vector<2x8xf32> to vector<2x8x1xf32>
    %188 = tpu.reciprocal %187 {approx = true} : vector<2x8x1xf32> -> vector<2x8x1xf32>
    %189 = vector.broadcast %188 : vector<2x8x1xf32> to vector<2x8x16xf32>
    %190 = arith.mulf %185, %189 : vector<2x8x16xf32>
    %191 = arith.truncf %190 : vector<2x8x16xf32> to vector<2x8x16xbf16>
    %192 = vector.extract_strided_slice %154 {offsets = [0, 0, 8], sizes = [2, 16, 8], strides = [1, 1, 1]} : vector<2x16x32xf32> to vector<2x16x8xf32>
    %193 = arith.truncf %192 : vector<2x16x8xf32> to vector<2x16x8xbf16>
    "tpu.trace_start"() <{level = 10 : i32, message = "bqk,bkd->bqd"}> : () -> ()
    %cst_66 = arith.constant dense<0.000000e+00> : vector<2x8x8xf32>
    %194 = tpu.matmul %191, %193, %cst_66 {dimension_numbers = #tpu.dot_dimension_numbers<[2], [1], [1], [2], [0, 0, 0, 1, 1, 2], [0], [0]>} : vector<2x8x16xbf16>, vector<2x16x8xbf16>, vector<2x8x8xf32> -> vector<2x8x8xf32>
    "tpu.trace_stop"() : () -> ()
    %195 = vector.extract_strided_slice %143 {offsets = [0, 0, 16], sizes = [2, 8, 8], strides = [1, 1, 1]} : vector<2x8x32xf32> to vector<2x8x8xf32>
    %196 = arith.truncf %195 : vector<2x8x8xf32> to vector<2x8x8xbf16>
    %197 = vector.extract_strided_slice %152 {offsets = [0, 0, 16], sizes = [2, 16, 8], strides = [1, 1, 1]} : vector<2x16x32xf32> to vector<2x16x8xf32>
    %198 = arith.truncf %197 : vector<2x16x8xf32> to vector<2x16x8xbf16>
    "tpu.trace_start"() <{level = 10 : i32, message = "bqd,bkd->bqk"}> : () -> ()
    %cst_67 = arith.constant dense<0.000000e+00> : vector<2x8x16xf32>
    %199 = tpu.matmul %196, %198, %cst_67 {dimension_numbers = #tpu.dot_dimension_numbers<[2], [2], [1], [1], [0, 0, 0, 1, 1, 1], [0], [0]>} : vector<2x8x8xbf16>, vector<2x16x8xbf16>, vector<2x8x16xf32> -> vector<2x8x16xf32>
    "tpu.trace_stop"() : () -> ()
    %cst_68 = arith.constant dense<0xFF800000> : vector<2x8xf32>
    %200 = vector.multi_reduction <maximumf>, %199, %cst_68 [2] : vector<2x8x16xf32> to vector<2x8xf32>
    %201 = vector.shape_cast %200 : vector<2x8xf32> to vector<2x8x1xf32>
    %202 = vector.broadcast %201 : vector<2x8x1xf32> to vector<2x8x16xf32>
    %203 = arith.subf %199, %202 : vector<2x8x16xf32>
    %204 = math.exp %203 : vector<2x8x16xf32>
    %cst_69 = arith.constant dense<0.000000e+00> : vector<2x8xf32>
    %205 = vector.multi_reduction <add>, %204, %cst_69 [2] : vector<2x8x16xf32> to vector<2x8xf32>
    %206 = vector.shape_cast %205 : vector<2x8xf32> to vector<2x8x1xf32>
    %207 = tpu.reciprocal %206 {approx = true} : vector<2x8x1xf32> -> vector<2x8x1xf32>
    %208 = vector.broadcast %207 : vector<2x8x1xf32> to vector<2x8x16xf32>
    %209 = arith.mulf %204, %208 : vector<2x8x16xf32>
    %210 = arith.truncf %209 : vector<2x8x16xf32> to vector<2x8x16xbf16>
    %211 = vector.extract_strided_slice %154 {offsets = [0, 0, 16], sizes = [2, 16, 8], strides = [1, 1, 1]} : vector<2x16x32xf32> to vector<2x16x8xf32>
    %212 = arith.truncf %211 : vector<2x16x8xf32> to vector<2x16x8xbf16>
    "tpu.trace_start"() <{level = 10 : i32, message = "bqk,bkd->bqd"}> : () -> ()
    %cst_70 = arith.constant dense<0.000000e+00> : vector<2x8x8xf32>
    %213 = tpu.matmul %210, %212, %cst_70 {dimension_numbers = #tpu.dot_dimension_numbers<[2], [1], [1], [2], [0, 0, 0, 1, 1, 2], [0], [0]>} : vector<2x8x16xbf16>, vector<2x16x8xbf16>, vector<2x8x8xf32> -> vector<2x8x8xf32>
    "tpu.trace_stop"() : () -> ()
    %214 = vector.extract_strided_slice %143 {offsets = [0, 0, 24], sizes = [2, 8, 8], strides = [1, 1, 1]} : vector<2x8x32xf32> to vector<2x8x8xf32>
    %215 = arith.truncf %214 : vector<2x8x8xf32> to vector<2x8x8xbf16>
    %216 = vector.extract_strided_slice %152 {offsets = [0, 0, 24], sizes = [2, 16, 8], strides = [1, 1, 1]} : vector<2x16x32xf32> to vector<2x16x8xf32>
    %217 = arith.truncf %216 : vector<2x16x8xf32> to vector<2x16x8xbf16>
    "tpu.trace_start"() <{level = 10 : i32, message = "bqd,bkd->bqk"}> : () -> ()
    %cst_71 = arith.constant dense<0.000000e+00> : vector<2x8x16xf32>
    %218 = tpu.matmul %215, %217, %cst_71 {dimension_numbers = #tpu.dot_dimension_numbers<[2], [2], [1], [1], [0, 0, 0, 1, 1, 1], [0], [0]>} : vector<2x8x8xbf16>, vector<2x16x8xbf16>, vector<2x8x16xf32> -> vector<2x8x16xf32>
    "tpu.trace_stop"() : () -> ()
    %cst_72 = arith.constant dense<0xFF800000> : vector<2x8xf32>
    %219 = vector.multi_reduction <maximumf>, %218, %cst_72 [2] : vector<2x8x16xf32> to vector<2x8xf32>
    %220 = vector.shape_cast %219 : vector<2x8xf32> to vector<2x8x1xf32>
    %221 = vector.broadcast %220 : vector<2x8x1xf32> to vector<2x8x16xf32>
    %222 = arith.subf %218, %221 : vector<2x8x16xf32>
    %223 = math.exp %222 : vector<2x8x16xf32>
    %cst_73 = arith.constant dense<0.000000e+00> : vector<2x8xf32>
    %224 = vector.multi_reduction <add>, %223, %cst_73 [2] : vector<2x8x16xf32> to vector<2x8xf32>
    %225 = vector.shape_cast %224 : vector<2x8xf32> to vector<2x8x1xf32>
    %226 = tpu.reciprocal %225 {approx = true} : vector<2x8x1xf32> -> vector<2x8x1xf32>
    %227 = vector.broadcast %226 : vector<2x8x1xf32> to vector<2x8x16xf32>
    %228 = arith.mulf %223, %227 : vector<2x8x16xf32>
    %229 = arith.truncf %228 : vector<2x8x16xf32> to vector<2x8x16xbf16>
    %230 = vector.extract_strided_slice %154 {offsets = [0, 0, 24], sizes = [2, 16, 8], strides = [1, 1, 1]} : vector<2x16x32xf32> to vector<2x16x8xf32>
    %231 = arith.truncf %230 : vector<2x16x8xf32> to vector<2x16x8xbf16>
    "tpu.trace_start"() <{level = 10 : i32, message = "bqk,bkd->bqd"}> : () -> ()
    %cst_74 = arith.constant dense<0.000000e+00> : vector<2x8x8xf32>
    %232 = tpu.matmul %229, %231, %cst_74 {dimension_numbers = #tpu.dot_dimension_numbers<[2], [1], [1], [2], [0, 0, 0, 1, 1, 2], [0], [0]>} : vector<2x8x16xbf16>, vector<2x16x8xbf16>, vector<2x8x8xf32> -> vector<2x8x8xf32>
    "tpu.trace_stop"() : () -> ()
    %233 = tpu.concatenate %175, %194, %213, %232 in 2 : vector<2x8x8xf32>, vector<2x8x8xf32>, vector<2x8x8xf32>, vector<2x8x8xf32> -> vector<2x8x32xf32>
    %234 = vector.shape_cast %233 : vector<2x8x32xf32> to vector<16x32xf32>
    %235 = arith.truncf %234 : vector<16x32xf32> to vector<16x32xbf16>
    %cst_75 = arith.constant dense<0.000000e+00> : vector<16x32xf32>
    %236 = tpu.matmul %235, %155, %cst_75 {dimension_numbers = #tpu.dot_dimension_numbers<[1], [0], [0], [1], [0, 0, 1, 1], [], []>} : vector<16x32xbf16>, vector<32x32xbf16>, vector<16x32xf32> -> vector<16x32xf32>
    %237 = vector.broadcast %156 : vector<1x32xf32> to vector<16x32xf32>
    %238 = arith.addf %236, %237 : vector<16x32xf32>
    %239 = arith.addf %134, %238 : vector<16x32xf32>
    %c0_76 = arith.constant 0 : index
    %c0_77 = arith.constant 0 : index
    %240 = vector.load %arg17[%c0_76, %c0_77] : memref<1x32xf32, #tpu.memory_space<vmem>>, vector<1x32xf32>
    %c0_78 = arith.constant 0 : index
    %c0_79 = arith.constant 0 : index
    %241 = vector.load %arg18[%c0_78, %c0_79] : memref<1x32xf32, #tpu.memory_space<vmem>>, vector<1x32xf32>
    %cst_80 = arith.constant dense<0.000000e+00> : vector<16xf32>
    %242 = vector.multi_reduction <add>, %239, %cst_80 [1] : vector<16x32xf32> to vector<16xf32>
    %243 = vector.shape_cast %242 : vector<16xf32> to vector<16x1xf32>
    %cst_81 = arith.constant 3.200000e+01 : f32
    %244 = vector.broadcast %cst_81 : f32 to vector<16x1xf32>
    %245 = arith.divf %243, %244 : vector<16x1xf32>
    %246 = vector.broadcast %245 : vector<16x1xf32> to vector<16x32xf32>
    %247 = arith.subf %239, %246 : vector<16x32xf32>
    %248 = arith.mulf %247, %247 : vector<16x32xf32>
    %cst_82 = arith.constant dense<0.000000e+00> : vector<16xf32>
    %249 = vector.multi_reduction <add>, %248, %cst_82 [1] : vector<16x32xf32> to vector<16xf32>
    %250 = vector.shape_cast %249 : vector<16xf32> to vector<16x1xf32>
    %cst_83 = arith.constant 3.200000e+01 : f32
    %251 = vector.broadcast %cst_83 : f32 to vector<16x1xf32>
    %252 = arith.divf %250, %251 : vector<16x1xf32>
    %cst_84 = arith.constant 9.99999974E-6 : f32
    %253 = vector.broadcast %cst_84 : f32 to vector<16x1xf32>
    %254 = arith.addf %252, %253 : vector<16x1xf32>
    %255 = math.rsqrt %254 : vector<16x1xf32>
    %256 = vector.broadcast %255 : vector<16x1xf32> to vector<16x32xf32>
    %257 = arith.mulf %247, %256 : vector<16x32xf32>
    %258 = vector.broadcast %240 : vector<1x32xf32> to vector<16x32xf32>
    %259 = arith.mulf %257, %258 : vector<16x32xf32>
    %260 = vector.broadcast %241 : vector<1x32xf32> to vector<16x32xf32>
    %261 = arith.addf %259, %260 : vector<16x32xf32>
    %262 = arith.truncf %261 : vector<16x32xf32> to vector<16x32xbf16>
    %c0_85 = arith.constant 0 : index
    %c0_86 = arith.constant 0 : index
    %263 = vector.load %arg19[%c0_85, %c0_86] : memref<32x64xbf16, #tpu.memory_space<vmem>>, vector<32x64xbf16>
    %cst_87 = arith.constant dense<0.000000e+00> : vector<16x64xf32>
    %264 = tpu.matmul %262, %263, %cst_87 {dimension_numbers = #tpu.dot_dimension_numbers<[1], [0], [0], [1], [0, 0, 1, 1], [], []>} : vector<16x32xbf16>, vector<32x64xbf16>, vector<16x64xf32> -> vector<16x64xf32>
    %c0_88 = arith.constant 0 : index
    %c0_89 = arith.constant 0 : index
    %265 = vector.load %arg20[%c0_88, %c0_89] : memref<1x64xf32, #tpu.memory_space<vmem>>, vector<1x64xf32>
    %266 = vector.broadcast %265 : vector<1x64xf32> to vector<16x64xf32>
    %267 = arith.addf %264, %266 : vector<16x64xf32>
    %cst_90 = arith.constant 0.000000e+00 : f32
    %268 = vector.broadcast %cst_90 : f32 to vector<16x64xf32>
    %269 = arith.maximumf %267, %268 : vector<16x64xf32>
    %270 = arith.truncf %269 : vector<16x64xf32> to vector<16x64xbf16>
    %c0_91 = arith.constant 0 : index
    %c0_92 = arith.constant 0 : index
    %271 = vector.load %arg21[%c0_91, %c0_92] : memref<64x32xbf16, #tpu.memory_space<vmem>>, vector<64x32xbf16>
    %cst_93 = arith.constant dense<0.000000e+00> : vector<16x32xf32>
    %272 = tpu.matmul %270, %271, %cst_93 {dimension_numbers = #tpu.dot_dimension_numbers<[1], [0], [0], [1], [0, 0, 1, 1], [], []>} : vector<16x64xbf16>, vector<64x32xbf16>, vector<16x32xf32> -> vector<16x32xf32>
    %273 = arith.addf %261, %272 : vector<16x32xf32>
    %c0_94 = arith.constant 0 : index
    %c0_95 = arith.constant 0 : index
    %274 = vector.load %arg22[%c0_94, %c0_95] : memref<1x32xf32, #tpu.memory_space<vmem>>, vector<1x32xf32>
    %275 = vector.broadcast %274 : vector<1x32xf32> to vector<16x32xf32>
    %276 = arith.addf %273, %275 : vector<16x32xf32>
    %c0_96 = arith.constant 0 : index
    %c0_97 = arith.constant 0 : index
    %277 = vector.load %arg23[%c0_96, %c0_97] : memref<1x32xf32, #tpu.memory_space<vmem>>, vector<1x32xf32>
    %c0_98 = arith.constant 0 : index
    %c0_99 = arith.constant 0 : index
    %278 = vector.load %arg24[%c0_98, %c0_99] : memref<1x32xf32, #tpu.memory_space<vmem>>, vector<1x32xf32>
    %cst_100 = arith.constant dense<0.000000e+00> : vector<16xf32>
    %279 = vector.multi_reduction <add>, %276, %cst_100 [1] : vector<16x32xf32> to vector<16xf32>
    %280 = vector.shape_cast %279 : vector<16xf32> to vector<16x1xf32>
    %cst_101 = arith.constant 3.200000e+01 : f32
    %281 = vector.broadcast %cst_101 : f32 to vector<16x1xf32>
    %282 = arith.divf %280, %281 : vector<16x1xf32>
    %283 = vector.broadcast %282 : vector<16x1xf32> to vector<16x32xf32>
    %284 = arith.subf %276, %283 : vector<16x32xf32>
    %285 = arith.mulf %284, %284 : vector<16x32xf32>
    %cst_102 = arith.constant dense<0.000000e+00> : vector<16xf32>
    %286 = vector.multi_reduction <add>, %285, %cst_102 [1] : vector<16x32xf32> to vector<16xf32>
    %287 = vector.shape_cast %286 : vector<16xf32> to vector<16x1xf32>
    %cst_103 = arith.constant 3.200000e+01 : f32
    %288 = vector.broadcast %cst_103 : f32 to vector<16x1xf32>
    %289 = arith.divf %287, %288 : vector<16x1xf32>
    %cst_104 = arith.constant 9.99999974E-6 : f32
    %290 = vector.broadcast %cst_104 : f32 to vector<16x1xf32>
    %291 = arith.addf %289, %290 : vector<16x1xf32>
    %292 = math.rsqrt %291 : vector<16x1xf32>
    %293 = vector.broadcast %292 : vector<16x1xf32> to vector<16x32xf32>
    %294 = arith.mulf %284, %293 : vector<16x32xf32>
    %295 = vector.broadcast %277 : vector<1x32xf32> to vector<16x32xf32>
    %296 = arith.mulf %294, %295 : vector<16x32xf32>
    %297 = vector.broadcast %278 : vector<1x32xf32> to vector<16x32xf32>
    %298 = arith.addf %296, %297 : vector<16x32xf32>
    %299 = vector.shape_cast %298 : vector<16x32xf32> to vector<2x8x32xf32>
    %c0_105 = arith.constant 0 : index
    %c0_106 = arith.constant 0 : index
    %c0_107 = arith.constant 0 : index
    %300 = vector.load %arg25[%c0_105, %c0_106, %c0_107] : memref<2x8x32xf32, #tpu.memory_space<vmem>>, vector<2x8x32xf32>
    tpu.vector_store %arg25[%c0_105, %c0_106, %c0_107], %299 {strides = array<i32>} : memref<2x8x32xf32, #tpu.memory_space<vmem>>, vector<2x8x32xf32>,
    return
  }
  func.func @transform_0(%arg0: i32) -> (i32, i32, i32) {
    %c0_i32 = arith.constant 0 : i32
    %c0_i32_0 = arith.constant 0 : i32
    %c0_i32_1 = arith.constant 0 : i32
    %c0_i32_2 = arith.constant 0 : i32
    return %c0_i32, %c0_i32_0, %c0_i32_1 : i32, i32, i32
  }
  func.func @transform_1(%arg0: i32) -> (i32, i32, i32) {
    %c0_i32 = arith.constant 0 : i32
    %c0_i32_0 = arith.constant 0 : i32
    %c0_i32_1 = arith.constant 0 : i32
    %c0_i32_2 = arith.constant 0 : i32
    return %c0_i32, %c0_i32_0, %c0_i32_1 : i32, i32, i32
  }
  func.func @transform_2(%arg0: i32) -> (i32, i32) {
    %c0_i32 = arith.constant 0 : i32
    %c0_i32_0 = arith.constant 0 : i32
    %c0_i32_1 = arith.constant 0 : i32
    return %c0_i32, %c0_i32_0 : i32, i32
  }
  func.func @transform_3(%arg0: i32) -> (i32, i32) {
    %c0_i32 = arith.constant 0 : i32
    %c0_i32_0 = arith.constant 0 : i32
    %c0_i32_1 = arith.constant 0 : i32
    return %c0_i32, %c0_i32_0 : i32, i32
  }
  func.func @transform_4(%arg0: i32) -> (i32, i32) {
    %c0_i32 = arith.constant 0 : i32
    %c0_i32_0 = arith.constant 0 : i32
    %c0_i32_1 = arith.constant 0 : i32
    return %c0_i32, %c0_i32_0 : i32, i32
  }
  func.func @transform_5(%arg0: i32) -> (i32, i32) {
    %c0_i32 = arith.constant 0 : i32
    %c0_i32_0 = arith.constant 0 : i32
    %c0_i32_1 = arith.constant 0 : i32
    return %c0_i32, %c0_i32_0 : i32, i32
  }
  func.func @transform_6(%arg0: i32) -> (i32, i32) {
    %c0_i32 = arith.constant 0 : i32
    %c0_i32_0 = arith.constant 0 : i32
    %c0_i32_1 = arith.constant 0 : i32
    return %c0_i32, %c0_i32_0 : i32, i32
  }
  func.func @transform_7(%arg0: i32) -> (i32, i32) {
    %c0_i32 = arith.constant 0 : i32
    %c0_i32_0 = arith.constant 0 : i32
    %c0_i32_1 = arith.constant 0 : i32
    return %c0_i32, %c0_i32_0 : i32, i32
  }
  func.func @transform_8(%arg0: i32) -> (i32, i32) {
    %c0_i32 = arith.constant 0 : i32
    %c0_i32_0 = arith.constant 0 : i32
    %c0_i32_1 = arith.constant 0 : i32
    return %c0_i32, %c0_i32_0 : i32, i32
  }
  func.func @transform_9(%arg0: i32) -> (i32, i32) {
    %c0_i32 = arith.constant 0 : i32
    %c0_i32_0 = arith.constant 0 : i32
    %c0_i32_1 = arith.constant 0 : i32
    return %c0_i32, %c0_i32_0 : i32, i32
  }
  func.func @transform_10(%arg0: i32) -> (i32, i32) {
    %c0_i32 = arith.constant 0 : i32
    %c0_i32_0 = arith.constant 0 : i32
    %c0_i32_1 = arith.constant 0 : i32
    return %c0_i32, %c0_i32_0 : i32, i32
  }
  func.func @transform_11(%arg0: i32) -> (i32, i32) {
    %c0_i32 = arith.constant 0 : i32
    %c0_i32_0 = arith.constant 0 : i32
    %c0_i32_1 = arith.constant 0 : i32
    return %c0_i32, %c0_i32_0 : i32, i32
  }
  func.func @transform_12(%arg0: i32) -> (i32, i32) {
    %c0_i32 = arith.constant 0 : i32
    %c0_i32_0 = arith.constant 0 : i32
    %c0_i32_1 = arith.constant 0 : i32
    return %c0_i32, %c0_i32_0 : i32, i32
  }
  func.func @transform_13(%arg0: i32) -> (i32, i32) {
    %c0_i32 = arith.constant 0 : i32
    %c0_i32_0 = arith.constant 0 : i32
    %c0_i32_1 = arith.constant 0 : i32
    return %c0_i32, %c0_i32_0 : i32, i32
  }
  func.func @transform_14(%arg0: i32) -> (i32, i32) {
    %c0_i32 = arith.constant 0 : i32
    %c0_i32_0 = arith.constant 0 : i32
    %c0_i32_1 = arith.constant 0 : i32
    return %c0_i32, %c0_i32_0 : i32, i32
  }
  func.func @transform_15(%arg0: i32) -> (i32, i32) {
    %c0_i32 = arith.constant 0 : i32
    %c0_i32_0 = arith.constant 0 : i32
    %c0_i32_1 = arith.constant 0 : i32
    return %c0_i32, %c0_i32_0 : i32, i32
  }
  func.func @transform_16(%arg0: i32) -> (i32, i32) {
    %c0_i32 = arith.constant 0 : i32
    %c0_i32_0 = arith.constant 0 : i32
    %c0_i32_1 = arith.constant 0 : i32
    return %c0_i32, %c0_i32_0 : i32, i32
  }
  func.func @transform_17(%arg0: i32) -> (i32, i32) {
    %c0_i32 = arith.constant 0 : i32
    %c0_i32_0 = arith.constant 0 : i32
    %c0_i32_1 = arith.constant 0 : i32
    return %c0_i32, %c0_i32_0 : i32, i32
  }
  func.func @transform_18(%arg0: i32) -> (i32, i32) {
    %c0_i32 = arith.constant 0 : i32
    %c0_i32_0 = arith.constant 0 : i32
    %c0_i32_1 = arith.constant 0 : i32
    return %c0_i32, %c0_i32_0 : i32, i32
  }
  func.func @transform_19(%arg0: i32) -> (i32, i32) {
    %c0_i32 = arith.constant 0 : i32
    %c0_i32_0 = arith.constant 0 : i32
    %c0_i32_1 = arith.constant 0 : i32
    return %c0_i32, %c0_i32_0 : i32, i32
  }
  func.func @transform_20(%arg0: i32) -> (i32, i32) {
    %c0_i32 = arith.constant 0 : i32
    %c0_i32_0 = arith.constant 0 : i32
    %c0_i32_1 = arith.constant 0 : i32
    return %c0_i32, %c0_i32_0 : i32, i32
  }
  func.func @transform_21(%arg0: i32) -> (i32, i32) {
    %c0_i32 = arith.constant 0 : i32
    %c0_i32_0 = arith.constant 0 : i32
    %c0_i32_1 = arith.constant 0 : i32
    return %c0_i32, %c0_i32_0 : i32, i32
  }
  func.func @transform_22(%arg0: i32) -> (i32, i32) {
    %c0_i32 = arith.constant 0 : i32
    %c0_i32_0 = arith.constant 0 : i32
    %c0_i32_1 = arith.constant 0 : i32
    return %c0_i32, %c0_i32_0 : i32, i32
  }
  func.func @transform_23(%arg0: i32) -> (i32, i32) {
    %c0_i32 = arith.constant 0 : i32
    %c0_i32_0 = arith.constant 0 : i32
    %c0_i32_1 = arith.constant 0 : i32
    return %c0_i32, %c0_i32_0 : i32, i32
  }
  func.func @transform_24(%arg0: i32) -> (i32, i32, i32) {
    %c0_i32 = arith.constant 0 : i32
    %c0_i32_0 = arith.constant 0 : i32
    %c0_i32_1 = arith.constant 0 : i32
    %c0_i32_2 = arith.constant 0 : i32
    return %c0_i32, %c0_i32_0, %c0_i32_1 : i32, i32, i32
  }
}

</mosaic_0001>

<bundles_post_ra>
// kernel: transformer_decoder_forward.5
= control target key start
LH: loop header
LB: loop body
LE: loop exit
PB: predicated region body
PF: predicated region fallthrough
CT: control target
= control target key end

     0   :  { %vm38_vm0 = vcmask 261120   ;;  %s115_s1 = inlined_call_operand.vmem [shape: bf16[32,128], index: 1, kind: input, shape index: {}]   ;;  %s116_s0 = inlined_call_operand.vmem [shape: f32[16,32], index: 0, kind: input, shape index: {}]   ;;  %s117_s2 = inlined_call_operand.vmem [shape: f32[1,128], index: 2, kind: input, shape index: {}]   ;;  %s118_s3 = inlined_call_operand.vmem [shape: f32[16,128], index: 3, kind: output, shape index: {}]  }
   0x1   :  { %v72_v0 = vld [vmem:[%s115_s1 + $0x8] sm:$0xff]  ;;  %v71_v1 = vld [vmem:[%s115_s1] sm:$0xff] }
   0x2   :  { %48 = vmatpush.bf16.msra.mxu0 %v72_v0  ;;  %v15_v2 = vld [vmem:[%s116_s0] sm:$0xff]  ;;  %v16_v3 = vld [vmem:[%s116_s0 + $0x8] sm:$0xff] }
   0x3   :  { %v17_v4 = vpack.c.bf16 %v16_v3, %v15_v2  ;;  %v73_v5 = vld [vmem:[%s117_s2] ss:$0 sm:$0xff] }
   0x6   :  { %49 = vmatpush.bf16.msra.mxu0 %v71_v1 }
   0x9   :  { %70 = vmatmul.msk.bf16.vlgmr.msra.gmra.mxu0 %vm38_vm0, %v17_v4 }
  0x86   :  { %v51_v6 = vpop.f32.mrf.mxu0 }
  0x87   :  { %v52_v7 = vadd.f32 %v73_v5, %v51_v6 }
  0x89   :  { %56 = vst [vmem:[%s118_s3] sm:$0xff] %v52_v7 }
  0x8e   :  { %v53_v8 = vpop.f32.mrf.mxu0 }
  0x8f   :  { %v54_v9 = vadd.f32 %v73_v5, %v53_v8 }
  0x91   :  { %57 = vst [vmem:[%s118_s3 + $0x8] sm:$0xff] %v54_v9 }

// kernel: transformer_decoder_forward.4
= control target key start
LH: loop header
LB: loop body
LE: loop exit
PB: predicated region body
PF: predicated region fallthrough
CT: control target
= control target key end

     0   :  { %s2499_s0 = inlined_call_operand.vmem [shape: f32[2,8,32], index: 0, kind: input, shape index: {}]   ;;  %s2500_s1 = inlined_call_operand.vmem [shape: f32[2,16,32], index: 1, kind: input, shape index: {}]   ;;  %s2501_s2 = inlined_call_operand.vmem [shape: f32[8,8], index: 2, kind: input, shape index: {}]   ;;  %s2502_s3 = inlined_call_operand.vmem [shape: f32[2,8], index: 3, kind: input, shape index: {}]   ;;  %s2503_s4 = inlined_call_operand.vmem [shape: bf16[32,96], index: 4, kind: input, shape index: {}]   ;;  %s2504_s5 = inlined_call_operand.vmem [shape: f32[1,96], index: 5, kind: input, shape index: {}]   ;;  %s2505_s6 = inlined_call_operand.vmem [shape: bf16[32,32], index: 6, kind: input, shape index: {}]   ;;  %s2506_s7 = inlined_call_operand.vmem [shape: f32[1,32], index: 7, kind: input, shape index: {}]   ;;  %s2507_s8 = inlined_call_operand.vmem [shape: f32[1,32], index: 8, kind: input, shape index: {}]   ;;  %s2508_s9 = inlined_call_operand.vmem [shape: f32[1,32], index: 9, kind: input, shape index: {}]   ;;  %s2509_s10 = inlined_call_operand.vmem [shape: bf16[32,32], index: 10, kind: input, shape index: {}]   ;;  %s2510_s11 = inlined_call_operand.vmem [shape: f32[1,32], index: 11, kind: input, shape index: {}]   ;;  %s2511_s12 = inlined_call_operand.vmem [shape: bf16[32,64], index: 12, kind: input, shape index: {}]   ;;  %s2512_s13 = inlined_call_operand.vmem [shape: f32[1,64], index: 13, kind: input, shape index: {}]   ;;  %s2513_s14 = inlined_call_operand.vmem [shape: bf16[32,32], index: 14, kind: input, shape index: {}]   ;;  %s2514_s15 = inlined_call_operand.vmem [shape: f32[1,32], index: 15, kind: input, shape index: {}]   ;;  %s2515_s16 = inlined_call_operand.vmem [shape: f32[1,32], index: 16, kind: input, shape index: {}]   ;;  %s2516_s17 = inlined_call_operand.vmem [shape: f32[1,32], index: 17, kind: input, shape index: {}]   ;;  %s2517_s18 = inlined_call_operand.vmem [shape: bf16[32,64], index: 18, kind: input, shape index: {}]   ;;  %s2518_s19 = inlined_call_operand.hbm [shape: f32[1,64], index: 19, kind: input, shape index: {}]   ;;  %s2519_s20 = inlined_call_operand.vmem [shape: bf16[64,32], index: 20, kind: input, shape index: {}]   ;;  %s2520_s21 = inlined_call_operand.hbm [shape: f32[1,32], index: 21, kind: input, shape index: {}]   ;;  %s2521_s22 = inlined_call_operand.hbm [shape: f32[1,32], index: 22, kind: input, shape index: {}]   ;;  %s2522_s23 = inlined_call_operand.hbm [shape: f32[1,32], index: 23, kind: input, shape index: {}]   ;;  %s2523_s24 = inlined_call_operand.vmem [shape: f32[2,8,32], index: 24, kind: output, shape index: {}]  }
   0x1   :  { %2528 = sst [smem:[#allocation12_spill]] %s2499_s0 }
   0x2   :  { %2529 = sst [smem:[#allocation13_spill]] %s2500_s1 }
   0x3   :  { %2530 = sst [smem:[#allocation14_spill]] %s2501_s2 }
   0x4   :  { %2531 = sst [smem:[#allocation15_spill]] %s2502_s3 }
   0x5   :  { %2532 = sst [smem:[#allocation16_spill]] %s2503_s4 }
   0x6   :  { %2533 = sst [smem:[#allocation17_spill]] %s2504_s5 }
   0x7   :  { %2534 = sst [smem:[#allocation18_spill]] %s2505_s6 }
   0x8   :  { %2535 = sst [smem:[#allocation19_spill]] %s2506_s7 }
   0x9   :  { %2536 = sst [smem:[#allocation20_spill]] %s2507_s8 }
   0xa   :  { %29 = vsyncpa [#allocation3], 0 }
   0xb   :  { %30 = vsyncpa [#allocation5], 0  ;;  %s88_s27 = sshll.u32 %s2520_s21, 4  ;;  %s89_s27 = int_to_ptr.hbm [resolvable:$true] %s88_s27 }
   0xc   :  { %31 = vsyncpa [#allocation8], 0  ;;  %s1972_s28 = smov [#allocation4]   ;;  %s75_s0 = sshll.u32 %s2518_s19, 4  ;;  %s76_s0 = int_to_ptr.hbm [resolvable:$true] %s75_s0 }
   0xd   :  { %s90_s6 = sshll.u32 %s1972_s28, 4  ;;  %s1973_s7 = smov [#allocation2]   ;;  %s91_s6 = int_to_ptr.vmem [resolvable:$true] %s90_s6 }
   0xe   :  { %93 = dma.hbm_to_vmem [thread:$0]  %s89_s27, 16, %s91_s6, [#allocation5]  }
   0xf   :  { %s77_s30 = sshll.u32 %s1973_s7, 4  ;;  %s99_s8 = sshll.u32 %s2521_s22, 4  ;;  %s78_s30 = int_to_ptr.vmem [resolvable:$true] %s77_s30  ;;  %s100_s8 = int_to_ptr.hbm [resolvable:$true] %s99_s8 }
  0x10   :  { %80 = dma.hbm_to_vmem [thread:$0]  %s76_s0, 16, %s78_s30, [#allocation3]  }
  0x11   :  { %s110_s1 = sshll.u32 %s2522_s23, 4  ;;  %s1974_s5 = smov [#allocation6]   ;;  %s111_s1 = int_to_ptr.hbm [resolvable:$true] %s110_s1 }
  0x12   :  { %s101_s26 = sshll.u32 %s1974_s5, 4  ;;  %s1975_s19 = smov [#allocation7]   ;;  %s102_s26 = int_to_ptr.vmem [resolvable:$true] %s101_s26 }
  0x13   :  { %104 = dma.hbm_to_vmem [thread:$0]  %s100_s8, 16, %s102_s26, [#allocation5]  }
  0x14   :  { %s112_s27 = sshll.u32 %s1975_s19, 4  ;;  %s113_s27 = int_to_ptr.vmem [resolvable:$true] %s112_s27 }
  0x15   :  { %115 = dma.hbm_to_vmem [thread:$0]  %s111_s1, 16, %s113_s27, [#allocation8]  }
  0x16   :  { %1966 = dma.done.wait [#allocation3], 16  }
  0x17   :  { %1967 = vsyncadd [#allocation3], 4294967280 }
  0x18   :  { %1968 = dma.done.wait [#allocation5], 32  }
  0x19   :  { %1969 = vsyncadd [#allocation5], 4294967264 }
  0x1a   :  { %1970 = dma.done.wait [#allocation8], 16  }
  0x1b   :  { %1971 = vsyncadd [#allocation8], 4294967280  ;;  %s2537_s6 = sld [smem:[#allocation16_spill]]  ;;  %vm160_vm0 = vcmask 261120   ;;  %s1976_s4 = smov 88   ;;  %vm204_vm1 = vcmask 64512  }
  0x1c   :  { %s2538_s7 = sld [smem:[#allocation12_spill]]  ;;  %s1977_s1 = smov 96   ;;  %vm277_vm2 = vcmask 1043456   ;;  %vm683_vm3 = vcmask 130048   ;;  %vm686_vm4 = vcmask 195584  }
  0x1d   :  { %s2539_s21 = sld [smem:[#allocation17_spill]]  ;;  %s1978_s5 = smov 120  }
  0x1e   :  { %s1979_s26 = smov 80   ;;  %s1980_s19 = smov 112  }
  0x1f   :  { %s1981_s27 = smov 72   ;;  %s1982_s22 = smov 104  }
  0x20   :  { %s2540_s23 = sld [smem:[#allocation15_spill]]  ;;  %s1984_s30 = smov 56  }
  0x21   :  { %v1715_v0 = vld [vmem:[%s2537_s6 + $0x8] sm:$0xff]  ;;  %v1714_v1 = vld [vmem:[%s2537_s6] sm:$0xff]  ;;  %s2541_s0 = sld [smem:[#allocation14_spill]]  ;;  %s1985_s3 = smov 48  }
  0x22   :  { %v2137_v2 = vld [vmem:[%s2538_s7] sm:$0xff]  ;;  %v2142_v3 = vld [vmem:[%s2538_s7 + $0x8] sm:$0xff]  ;;  %170 = vmatpush.bf16.msra.mxu0 %v1715_v0  ;;  %s1983_s7 = smov 64   ;;  %s1986_s25 = smov 40  }
  0x23   :  { %v139_v4 = vpack.c.bf16 %v2142_v3, %v2137_v2  ;;  %v1779_v5 = vld [vmem:[%s2539_s21] ss:$0 sm:$0xff]  ;;  %s1987_s8 = smov 8   ;;  %s1988_s21 = smov 16  }
  0x24   :  { %s1989_s28 = smov 24   ;;  %s2542_s2 = sld [smem:[#allocation18_spill]] }
  0x26   :  { %171 = vmatpush.bf16.msra.mxu0 %v1714_v1  ;;  %v181_v46 = vld [vmem:[%s2540_s23] sm:$0x3] }
  0x27   :  { %v184_v47 = vperm.slane %v181_v46, 0  ;;  %v180_v48 = vld [vmem:[%s2541_s0] sm:$0xff]  ;;  %v183_v56 = vrot.slane %v181_v46, 1 }
  0x29   :  { %1618 = vmatmul.msk.bf16.vlgmr.msra.gmra.mxu0 %vm160_vm0, %v139_v4  ;;  %v188_v49 = vadd.f32 %v184_v47, %v180_v48  ;;  %v185_v57 = vperm.slane %v183_v56, 0 }
  0x2b   :  { %v189_v60 = vadd.f32 %v185_v57, %v180_v48 }
  0xa6   :  { %v173_v6 = vpop.f32.mrf.mxu0 }
  0xa7   :  { %v174_v7 = vadd.f32 %v1779_v5, %v173_v6 }
  0xa9   :  { %v178_v8 = vmul.f32 0.35355338, %v174_v7  ;;  %v197_v9 = vpack.c.bf16 %v174_v7, %v174_v7 }
  0xab   :  { %v195_v10 = vpack.c.bf16 %v178_v8, %v178_v8  ;;  %v200_v11 = vunpack.c.l.b16 %v197_v9 }
  0xad   :  { %v2150_v12 = vpack.c.b16 %v200_v11, %v200_v11  ;;  %v316_v13 = vunpack.c.l.b16 %v195_v10 }
  0xae   :  { %v175_v14 = vpop.f32.mrf.mxu0 }
  0xaf   :  { %v176_v15 = vadd.f32 %v1779_v5, %v175_v14  ;;  %320 = vrot.lane.b32.xlu1 %v2150_v12, %s1976_s4  ;;  %202 = vrot.lane.b32.xlu0 %v2150_v12, %s1977_s1  ;;  %v317_v16 = vpack.c.b16 %v316_v13, %v316_v13 }
  0xb1   :  { %v179_v17 = vmul.f32 0.35355338, %v176_v15  ;;  %v198_v18 = vpack.c.bf16 %v176_v15, %v176_v15  ;;  %318 = vrot.lane.b32.xlu2 %v317_v16, %s1978_s5 }
  0xb3   :  { %v196_v19 = vpack.c.bf16 %v179_v17, %v179_v17  ;;  %v225_v20 = vunpack.c.l.b16 %v198_v18 }
  0xb5   :  { %v2157_v21 = vpack.c.b16 %v225_v20, %v225_v20  ;;  %v342_v22 = vunpack.c.l.b16 %v196_v19 }
  0xb7   :  { %346 = vrot.lane.b32.xlu1 %v2157_v21, %s1976_s4  ;;  %227 = vrot.lane.b32.xlu0 %v2157_v21, %s1977_s1  ;;  %v343_v23 = vpack.c.b16 %v342_v22, %v342_v22 }
  0xb9   :  { %344 = vrot.lane.b32.xlu2 %v343_v23, %s1978_s5 }
  0xbf   :  { %458 = vrot.lane.b32.xlu1 %v2157_v21, %s1979_s26  ;;  %435 = vrot.lane.b32.xlu0 %v2150_v12, %s1979_s26 }
  0xc1   :  { %433 = vrot.lane.b32.xlu2 %v317_v16, %s1980_s19 }
  0xc7   :  { %547 = vrot.lane.b32.xlu1 %v2150_v12, %s1981_s27  ;;  %456 = vrot.lane.b32.xlu0 %v343_v23, %s1980_s19 }
  0xc9   :  { %570 = vrot.lane.b32.xlu2 %v2157_v21, %s1981_s27 }
  0xcf   :  { %568 = vrot.lane.b32.xlu1 %v343_v23, %s1982_s22  ;;  %545 = vrot.lane.b32.xlu0 %v317_v16, %s1982_s22 }
 0x10b   :  { %v319_v24 = vpop.permute.xlu2 %318 }
 0x113   :  { %v345_v29 = vpop.permute.xlu2 %344 }
 0x11b   :  { %v434_v34 = vpop.permute.xlu2 %433 }
 0x121   :  { %v321_v25 = vpop.permute.xlu1 %320  ;;  %v203_v26 = vpop.permute.xlu0 %202 }
 0x122   :  { %v209_v27 = vsel %vm204_vm1, %v203_v26, 0  ;;  %v326_v28 = vsel %vm204_vm1, %v321_v25, 0 }
 0x123   :  { %218 = vmatpush.bf16.xpose.msra.mxu1 %v209_v27  ;;  %335 = vmatpush.bf16.xpose.msrb.mxu0 %v326_v28  ;;  %v571_v39 = vpop.permute.xlu2 %570 }
 0x124   :  { %v576_v41 = vsel %vm204_vm1, %v571_v39, 0 }
 0x129   :  { %v347_v30 = vpop.permute.xlu1 %346  ;;  %v228_v31 = vpop.permute.xlu0 %227 }
 0x12a   :  { %1619 = vmatmul.msk.bf16.vlgmr.msra.gmra.mxu1 %vm204_vm1, %v195_v10  ;;  %1623 = vmatmul.msk.bf16.vlgmr.msrb.gmra.mxu0 %vm204_vm1, %v319_v24  ;;  %v233_v32 = vsel %vm204_vm1, %v228_v31, 0  ;;  %v352_v33 = vsel %vm204_vm1, %v347_v30, 0 }
 0x12b   :  { %242 = vmatpush.bf16.xpose.msra.mxu2 %v233_v32  ;;  %361 = vmatpush.bf16.xpose.msrb.mxu1 %v352_v33 }
 0x131   :  { %v459_v35 = vpop.permute.xlu1 %458  ;;  %v436_v36 = vpop.permute.xlu0 %435 }
 0x132   :  { %v464_v37 = vsel %vm204_vm1, %v459_v35, 0  ;;  %v441_v38 = vsel %vm204_vm1, %v436_v36, 0  ;;  %1620 = vmatmul.msk.bf16.vlgmr.msra.gmra.mxu2 %vm204_vm1, %v196_v19 }
 0x133   :  { %450 = vmatpush.bf16.xpose.msra.mxu0 %v441_v38  ;;  %473 = vmatpush.bf16.xpose.msra.mxu1 %v464_v37 }
 0x139   :  { %v548_v40 = vpop.permute.xlu1 %547  ;;  %v457_v43 = vpop.permute.xlu0 %456 }
 0x13a   :  { %v553_v42 = vsel %vm204_vm1, %v548_v40, 0  ;;  %1624 = vmatmul.msk.bf16.vlgmr.msrb.gmra.mxu1 %vm204_vm1, %v345_v29  ;;  %1627 = vmatmul.msk.bf16.vlgmr.msra.gmra.mxu0 %vm204_vm1, %v434_v34 }
 0x13b   :  { %585 = vmatpush.bf16.xpose.msrb.mxu1 %v576_v41  ;;  %562 = vmatpush.bf16.xpose.msrb.mxu0 %v553_v42 }
 0x141   :  { %v546_v44 = vpop.permute.xlu0 %545  ;;  %v569_v45 = vpop.permute.xlu1 %568 }
 0x14a   :  { %1628 = vmatmul.msk.bf16.vlgmr.msra.gmra.mxu1 %vm204_vm1, %v457_v43  ;;  %1631 = vmatmul.msk.bf16.vlgmr.msrb.gmra.mxu0 %vm204_vm1, %v546_v44 }
 0x15a   :  { %1632 = vmatmul.msk.bf16.vlgmr.msrb.gmra.mxu1 %vm204_vm1, %v569_v45 }
 0x1a7   :  { %v220_v50 = vpop.f32.mrf.mxu1  ;;  %v337_v51 = vpop.f32.mrf.mxu0 }
 0x1a8   :  { %v221_v52 = vadd.f32 %v220_v50, %v188_v49  ;;  %v338_v53 = vadd.f32 %v337_v51, %v188_v49 }
 0x1aa   :  { %v367_v54 = vsel %vm204_vm1, %v338_v53, -inf  ;;  %v248_v55 = vsel %vm204_vm1, %v221_v52, -inf }
 0x1ab   :  { %368 = vmax.xlane.f32.xlu1 %v367_v54  ;;  %249 = vmax.xlane.f32.xlu2 %v248_v55 }
 0x1af   :  { %v222_v58 = vpop.f32.mrf.mxu1  ;;  %v339_v59 = vpop.f32.mrf.mxu0 }
 0x1b5   :  { %v244_v61 = vpop.f32.mrf.mxu2 }
 0x1b6   :  { %v245_v62 = vadd.f32 %v244_v61, %v189_v60 }
 0x1b7   :  { %v363_v63 = vpop.f32.mrf.mxu1  ;;  %v452_v0 = vpop.f32.mrf.mxu0 }
 0x1b8   :  { %v364_v1 = vadd.f32 %v363_v63, %v189_v60  ;;  %v2200_v4 = vadd.f32 %v452_v0, %v188_v49  ;;  %v251_v5 = vsel %vm204_vm1, %v245_v62, -inf }
 0x1b9   :  { %252 = vmax.xlane.f32.xlu0 %v251_v5 }
 0x1ba   :  { %v370_v6 = vsel %vm204_vm1, %v364_v1, -inf  ;;  %v479_v23 = vsel %vm204_vm1, %v2200_v4, -inf }
 0x1bb   :  { %371 = vmax.xlane.f32.xlu2 %v370_v6 }
 0x1bd   :  { %v246_v7 = vpop.f32.mrf.mxu2 }
 0x1bf   :  { %v365_v8 = vpop.f32.mrf.mxu1  ;;  %v454_v9 = vpop.f32.mrf.mxu0 }
 0x1c4   :  { %294 = vrot.lane.b32.xlu1 %v2157_v21, %s1983_s7 }
 0x1c7   :  { %v475_v10 = vpop.f32.mrf.mxu1  ;;  %v564_v11 = vpop.f32.mrf.mxu0 }
 0x1c8   :  { %v476_v18 = vadd.f32 %v475_v10, %v189_v60  ;;  %v565_v22 = vadd.f32 %v564_v11, %v188_v49 }
 0x1ca   :  { %v482_v20 = vsel %vm204_vm1, %v476_v18, -inf  ;;  %v591_v24 = vsel %vm204_vm1, %v565_v22, -inf }
 0x1cc   :  { %412 = vrot.lane.b32.xlu1 %v2157_v21, %s1984_s30 }
 0x1cd   :  { %391 = vrot.lane.b32.xlu0 %v2150_v12, %s1984_s30 }
 0x1cf   :  { %v477_v13 = vpop.f32.mrf.mxu1  ;;  %v566_v14 = vpop.f32.mrf.mxu0 }
 0x1d3   :  { %272 = vrot.lane.b32.xlu2 %v2150_v12, %s1983_s7  ;;  %s2544_s7 = sld [smem:[#allocation13_spill]] }
 0x1d7   :  { %v587_v15 = vpop.f32.mrf.mxu1 }
 0x1d8   :  { %v588_v17 = vadd.f32 %v587_v15, %v189_v60 }
 0x1da   :  { %v594_v19 = vsel %vm204_vm1, %v588_v17, -inf }
 0x1df   :  { %v589_v16 = vpop.f32.mrf.mxu1 }
 0x1f6   :  { %595 = vmax.xlane.f32.xlu1 %v594_v19 }
 0x1f7   :  { %483 = vmax.xlane.f32.xlu0 %v482_v20 }
 0x1fc   :  { %480 = vmax.xlane.f32.xlu2 %v479_v23 }
 0x1ff   :  { %592 = vmax.xlane.f32.xlu0 %v591_v24 }
 0x21e   :  { %v369_v25 = vpop.xlane.xlu1 %368  ;;  %v250_v26 = vpop.xlane.xlu2 %249 }
 0x21f   :  { %v373_v27 = vsub.f32 %v338_v53, %v369_v25  ;;  %v254_v28 = vsub.f32 %v221_v52, %v250_v26 }
 0x221   :  { %v375_v29 = vmul.f32 1.442695, %v373_v27  ;;  %v256_v30 = vmul.f32 1.442695, %v254_v28 }
 0x223   :  { %1792 = vpow2.f32 %v375_v29 }
 0x224   :  { %1794 = vpow2.f32 %v256_v30 }
 0x229   :  { %v2213_v31 = vpop.eup %1792 }
 0x22a   :  { %v2215_v32 = vpop.eup %1794  ;;  %v379_v33 = vsel %vm204_vm1, %v2213_v31, 0.0 }
 0x22b   :  { %380 = vadd.xlane.f32.xlu0 %v379_v33  ;;  %v260_v34 = vsel %vm204_vm1, %v2215_v32, 0.0 }
 0x22c   :  { %261 = vadd.xlane.f32.xlu1 %v260_v34  ;;  %v253_v35 = vpop.xlane.xlu0 %252 }
 0x22d   :  { %v255_v36 = vsub.f32 %v245_v62, %v253_v35 }
 0x22e   :  { %v372_v37 = vpop.xlane.xlu2 %371 }
 0x22f   :  { %v258_v38 = vmul.f32 1.442695, %v255_v36  ;;  %v374_v39 = vsub.f32 %v364_v1, %v372_v37 }
 0x231   :  { %1796 = vpow2.f32 %v258_v38  ;;  %v377_v40 = vmul.f32 1.442695, %v374_v39 }
 0x233   :  { %1798 = vpow2.f32 %v377_v40 }
 0x236   :  { %v295_v41 = vpop.permute.xlu1 %294  ;;  %v273_v42 = vpop.permute.xlu2 %272 }
 0x237   :  { %v2221_v43 = vpop.eup %1796  ;;  %v279_v44 = vsel %vm277_vm2, %v273_v42, 0  ;;  %v300_v45 = vsel %vm277_vm2, %v295_v41, 0 }
 0x238   :  { %288 = vmatpush.bf16.msra.mxu3 %v279_v44  ;;  %v263_v46 = vsel %vm204_vm1, %v2221_v43, 0.0 }
 0x239   :  { %v2227_v47 = vpop.eup %1798  ;;  %264 = vadd.xlane.f32.xlu0 %v263_v46 }
 0x23a   :  { %v382_v48 = vsel %vm204_vm1, %v2227_v47, 0.0 }
 0x23b   :  { %383 = vadd.xlane.f32.xlu2 %v382_v48 }
 0x23c   :  { %309 = vmatpush.bf16.msrb.mxu3 %v300_v45 }
 0x23e   :  { %v413_v51 = vpop.permute.xlu1 %412 }
 0x23f   :  { %v392_v49 = vpop.permute.xlu0 %391  ;;  %v418_v19 = vsel %vm277_vm2, %v413_v51, 0 }
 0x240   :  { %v397_v50 = vsel %vm277_vm2, %v392_v49, 0 }
 0x241   :  { %406 = vmatpush.bf16.msrb.mxu2 %v397_v50 }
 0x245   :  { %524 = vrot.lane.b32.xlu1 %v2157_v21, %s1985_s3 }
 0x253   :  { %503 = vrot.lane.b32.xlu2 %v2150_v12, %s1985_s3  ;;  %s2543_s3 = sld [smem:[#allocation19_spill]] }
 0x269   :  { %v596_v52 = vpop.xlane.xlu1 %595 }
 0x26a   :  { %v598_v53 = vsub.f32 %v588_v17, %v596_v52  ;;  %v484_v54 = vpop.xlane.xlu0 %483 }
 0x26b   :  { %v486_v55 = vsub.f32 %v476_v18, %v484_v54 }
 0x26c   :  { %v601_v57 = vmul.f32 1.442695, %v598_v53 }
 0x26d   :  { %v489_v56 = vmul.f32 1.442695, %v486_v55 }
 0x26f   :  { %1800 = vpow2.f32 %v489_v56  ;;  %v481_v58 = vpop.xlane.xlu2 %480 }
 0x270   :  { %v485_v59 = vsub.f32 %v2200_v4, %v481_v58  ;;  %1802 = vpow2.f32 %v601_v57 }
 0x272   :  { %v487_v60 = vmul.f32 1.442695, %v485_v59  ;;  %v593_v61 = vpop.xlane.xlu0 %592 }
 0x273   :  { %v597_v62 = vsub.f32 %v565_v22, %v593_v61 }
 0x274   :  { %1804 = vpow2.f32 %v487_v60 }
 0x275   :  { %v1801_v63 = vpop.eup %1800  ;;  %v599_v0 = vmul.f32 1.442695, %v597_v62 }
 0x276   :  { %v494_v1 = vsel %vm204_vm1, %v1801_v63, 0.0  ;;  %v2236_v5 = vpop.eup %1802 }
 0x277   :  { %1806 = vpow2.f32 %v599_v0  ;;  %495 = vadd.xlane.f32.xlu0 %v494_v1  ;;  %v606_v7 = vsel %vm204_vm1, %v2236_v5, 0.0 }
 0x27a   :  { %v1805_v6 = vpop.eup %1804 }
 0x27b   :  { %v491_v8 = vsel %vm204_vm1, %v1805_v6, 0.0 }
 0x27c   :  { %607 = vadd.xlane.f32.xlu2 %v606_v7  ;;  %492 = vadd.xlane.f32.xlu1 %v491_v8 }
 0x27d   :  { %v1807_v4 = vpop.eup %1806 }
 0x27e   :  { %v603_v9 = vsel %vm204_vm1, %v1807_v4, 0.0 }
 0x27f   :  { %604 = vadd.xlane.f32.xlu0 %v603_v9  ;;  %v1716_v9 = vld [vmem:[%s2542_s2] sm:$0xff] }
 0x293   :  { %615 = vrot.lane.b32.xlu0 %v2150_v12, %s1986_s25 }
 0x295   :  { %636 = vrot.lane.b32.xlu1 %v2157_v21, %s1986_s25 }
 0x29e   :  { %v381_v10 = vpop.xlane.xlu0 %380 }
 0x29f   :  { %1808 = vrcp.f32 %v381_v10  ;;  %v262_v11 = vpop.xlane.xlu1 %261 }
 0x2a0   :  { %1810 = vrcp.f32 %v262_v11 }
 0x2a5   :  { %v1809_v13 = vpop.eup %1808 }
 0x2a6   :  { %v1811_v14 = vpop.eup %1810  ;;  %v387_v15 = vmul.f32 %v1809_v13, %v2213_v31 }
 0x2a7   :  { %v268_v16 = vmul.f32 %v1811_v14, %v2215_v32 }
 0x2a8   :  { %v389_v17 = vpack.c.bf16 %v387_v15, %v387_v15 }
 0x2a9   :  { %v270_v18 = vpack.c.bf16 %v268_v16, %v268_v16 }
 0x2aa   :  { %1625 = vmatmul.msk.bf16.vlgmr.msrb.gmra.mxu2 %vm204_vm1, %v389_v17 }
 0x2ab   :  { %1621 = vmatmul.msk.bf16.vlgmr.msra.gmra.mxu3 %vm204_vm1, %v270_v18 }
 0x2ac   :  { %427 = vmatpush.bf16.msra.mxu3 %v418_v19  ;;  %v265_v12 = vpop.xlane.xlu0 %264 }
 0x2ad   :  { %1812 = vrcp.f32 %v265_v12 }
 0x2ae   :  { %v384_v21 = vpop.xlane.xlu2 %383 }
 0x2af   :  { %1814 = vrcp.f32 %v384_v21 }
 0x2b3   :  { %v1813_v20 = vpop.eup %1812 }
 0x2b4   :  { %v269_v22 = vmul.f32 %v1813_v20, %v2221_v43 }
 0x2b5   :  { %v1815_v28 = vpop.eup %1814 }
 0x2b6   :  { %v504_v23 = vpop.permute.xlu2 %503  ;;  %v271_v26 = vpack.c.bf16 %v269_v22, %v269_v22  ;;  %v388_v29 = vmul.f32 %v1815_v28, %v2227_v47 }
 0x2b7   :  { %v509_v24 = vsel %vm277_vm2, %v504_v23, 0  ;;  %v525_v25 = vpop.permute.xlu1 %524 }
 0x2b8   :  { %518 = vmatpush.bf16.msra.mxu2 %v509_v24  ;;  %v530_v27 = vsel %vm277_vm2, %v525_v25, 0  ;;  %v390_v30 = vpack.c.bf16 %v388_v29, %v388_v29 }
 0x2bb   :  { %1622 = vmatmul.msk.bf16.vlgmr.msrb.gmra.mxu3 %vm204_vm1, %v271_v26  ;;  %v1780_v26 = vld [vmem:[%s2543_s3] ss:$0 sm:$0xff] }
 0x2bc   :  { %539 = vmatpush.bf16.msrb.mxu3 %v530_v27 }
 0x2cb   :  { %1626 = vmatmul.msk.bf16.vlgmr.msra.gmra.mxu3 %vm204_vm1, %v390_v30 }
 0x2ea   :  { %v496_v31 = vpop.xlane.xlu0 %495 }
 0x2eb   :  { %1816 = vrcp.f32 %v496_v31 }
 0x2ef   :  { %v493_v32 = vpop.xlane.xlu1 %492  ;;  %v608_v40 = vpop.xlane.xlu2 %607 }
 0x2f0   :  { %1818 = vrcp.f32 %v493_v32 }
 0x2f1   :  { %v1817_v33 = vpop.eup %1816 }
 0x2f2   :  { %v500_v34 = vmul.f32 %v1817_v33, %v1801_v63  ;;  %v605_v39 = vpop.xlane.xlu0 %604 }
 0x2f3   :  { %1820 = vrcp.f32 %v605_v39 }
 0x2f4   :  { %v502_v35 = vpack.c.bf16 %v500_v34, %v500_v34  ;;  %1822 = vrcp.f32 %v608_v40  ;;  %v136_v40 = vld [vmem:[%s2544_s7 + $0x8] sm:$0xff] }
 0x2f6   :  { %v1819_v36 = vpop.eup %1818  ;;  %1630 = vmatmul.msk.bf16.vlgmr.msrb.gmra.mxu3 %vm204_vm1, %v502_v35  ;;  %v1990_v35 = vmov 32.0  }
 0x2f7   :  { %v499_v37 = vmul.f32 %v1819_v36, %v1805_v6  ;;  %1824 = vrcp.f32 %v1990_v35 }
 0x2f9   :  { %v501_v38 = vpack.c.bf16 %v499_v37, %v499_v37  ;;  %v1821_v41 = vpop.eup %1820 }
 0x2fa   :  { %v1823_v42 = vpop.eup %1822  ;;  %v611_v43 = vmul.f32 %v1821_v41, %v1807_v4  ;;  %v1717_v4 = vld [vmem:[%s2542_s2 + $0x8] sm:$0xff] }
 0x2fb   :  { %1629 = vmatmul.msk.bf16.vlgmr.msra.gmra.mxu2 %vm204_vm1, %v501_v38  ;;  %v612_v45 = vmul.f32 %v1823_v42, %v2236_v5  ;;  %714 = vmatpush.bf16.msra.mxu0 %v1717_v4  ;;  %v1721_v38 = vld [vmem:[%s2511_s12 + $0x8] sm:$0xff] }
 0x2fc   :  { %v613_v49 = vpack.c.bf16 %v611_v43, %v611_v43 }
 0x2fd   :  { %v614_v50 = vpack.c.bf16 %v612_v45, %v612_v45  ;;  %v1825_v36 = vpop.eup %1824 }
 0x2fe   :  { %v733_v37 = vmul.f32 32.0, %v1825_v36  ;;  %vm737_vm5 = vweird.f32 %v1825_v36 }
 0x2ff   :  { %715 = vmatpush.bf16.msra.mxu0 %v1716_v9 }
 0x300   :  { %v734_v39 = vsub.f32 1.0, %v733_v37 }
 0x302   :  { %v735_v42 = vmul.f32 %v1825_v36, %v734_v39 }
 0x304   :  { %v736_v43 = vadd.f32 %v1825_v36, %v735_v42 }
 0x305   :  { %v616_v44 = vpop.permute.xlu0 %615 }
 0x306   :  { %v621_v46 = vsel %vm277_vm2, %v616_v44, 0  ;;  %v2298_v44 = vsel %vm737_vm5, %v1825_v36, %v736_v43 }
 0x307   :  { %v637_v47 = vpop.permute.xlu1 %636  ;;  %630 = vmatpush.bf16.msrb.mxu2 %v621_v46 }
 0x308   :  { %v642_v48 = vsel %vm277_vm2, %v637_v47, 0  ;;  %v137_v47 = vld [vmem:[%s2544_s7 + $0x10] sm:$0xff] }
 0x309   :  { %651 = vmatpush.bf16.msra.mxu3 %v642_v48  ;;  %v138_v48 = vld [vmem:[%s2544_s7 + $0x18] sm:$0xff] }
 0x30b   :  { %1633 = vmatmul.msk.bf16.vlgmr.msrb.gmra.mxu2 %vm204_vm1, %v613_v49 }
 0x30c   :  { %1634 = vmatmul.msk.bf16.vlgmr.msra.gmra.mxu3 %vm204_vm1, %v614_v50  ;;  %861 = vmatpush.bf16.msra.mxu2 %v1721_v38 }
 0x32d   :  { %v408_v51 = vpop.f32.mrf.mxu2 }
 0x32e   :  { %v290_v52 = vpop.f32.mrf.mxu3 }
 0x335   :  { %v410_v53 = vpop.f32.mrf.mxu2 }
 0x336   :  { %v292_v54 = vpop.f32.mrf.mxu3 }
 0x33e   :  { %v311_v55 = vpop.f32.mrf.mxu3 }
 0x346   :  { %v313_v56 = vpop.f32.mrf.mxu3 }
 0x34e   :  { %v429_v57 = vpop.f32.mrf.mxu3 }
 0x34f   :  { %v1749_v58 = vpack.i.bf16 %v429_v57, %v408_v51  ;;  %v828_v51 = vpack.c.bf16 %v138_v48, %v137_v47 }
 0x351   :  { %1750 = vrot.lane.b32.xlu0 %v1749_v58, %s1987_s8 }
 0x356   :  { %v431_v59 = vpop.f32.mrf.mxu3 }
 0x357   :  { %v1719_v59 = vld [vmem:[%s2509_s10 + $0x8] sm:$0xff] }
 0x358   :  { %817 = vmatpush.bf16.msra.mxu1 %v1719_v59 }
 0x379   :  { %v541_v60 = vpop.f32.mrf.mxu3 }
 0x37e   :  { %v520_v61 = vpop.f32.mrf.mxu2 }
 0x37f   :  { %v1754_v62 = vpack.i.bf16 %v541_v60, %v520_v61 }
 0x381   :  { %v543_v63 = vpop.f32.mrf.mxu3  ;;  %1755 = vrot.lane.b32.xlu1 %v1754_v62, %s1988_s21  ;;  %v1718_v62 = vld [vmem:[%s2509_s10] sm:$0xff] }
 0x382   :  { %818 = vmatpush.bf16.msra.mxu1 %v1718_v62 }
 0x386   :  { %v522_v0 = vpop.f32.mrf.mxu2 }
 0x38e   :  { %v632_v1 = vpop.f32.mrf.mxu2 }
 0x38f   :  { %v653_v5 = vpop.f32.mrf.mxu3 }
 0x390   :  { %v1759_v6 = vpack.i.bf16 %v653_v5, %v632_v1  ;;  %v1783_v1 = vld [vmem:[%s2512_s13] ss:$0 sm:$0xff] }
 0x392   :  { %1760 = vrot.lane.b32.xlu0 %v1759_v6, %s1989_s28 }
 0x396   :  { %v634_v7 = vpop.f32.mrf.mxu2 }
 0x397   :  { %v655_v8 = vpop.f32.mrf.mxu3 }
 0x3c3   :  { %v1751_v10 = vpop.permute.xlu0 %1750 }
 0x3c4   :  { %v1753_v13 = vunpack.i.h.bf16 %v1751_v10  ;;  %v1752_v14 = vunpack.i.l.bf16 %v1751_v10 }
 0x3c6   :  { %v682_v18 = vsel %vm204_vm1, %v311_v55, %v1753_v13  ;;  %v681_v19 = vsel %vm204_vm1, %v290_v52, %v1752_v14 }
 0x3f3   :  { %v1756_v11 = vpop.permute.xlu1 %1755 }
 0x3f4   :  { %v1758_v15 = vunpack.i.h.bf16 %v1756_v11  ;;  %v1757_v16 = vunpack.i.l.bf16 %v1756_v11 }
 0x3f6   :  { %v685_v20 = vsel %vm683_vm3, %v682_v18, %v1758_v15  ;;  %v684_v22 = vsel %vm683_vm3, %v681_v19, %v1757_v16 }
 0x404   :  { %v1761_v17 = vpop.permute.xlu0 %1760 }
 0x405   :  { %v1763_v12 = vunpack.i.h.bf16 %v1761_v17  ;;  %v1762_v21 = vunpack.i.l.bf16 %v1761_v17 }
 0x407   :  { %v688_v23 = vsel %vm686_vm4, %v685_v20, %v1763_v12  ;;  %v687_v24 = vsel %vm686_vm4, %v684_v22, %v1762_v21 }
 0x408   :  { %v689_v25 = vpack.c.bf16 %v688_v23, %v687_v24 }
 0x40a   :  { %1643 = vmatmul.msk.bf16.vlgmr.msra.gmra.mxu0 %vm160_vm0, %v689_v25 }
 0x487   :  { %v717_v27 = vpop.f32.mrf.mxu0 }
 0x488   :  { %v718_v28 = vadd.f32 %v1780_v26, %v717_v27 }
 0x48a   :  { %v722_v29 = vadd.f32 %v718_v28, %v2137_v2  ;;  %v1720_v2 = vld [vmem:[%s2511_s12] sm:$0xff]  ;;  %s2545_s12 = sld [smem:[#allocation20_spill]] }
 0x48b   :  { %862 = vmatpush.bf16.msra.mxu2 %v1720_v2 }
 0x48c   :  { %v726_v30 = vsel %vm160_vm0, %v722_v29, 0.0 }
 0x48d   :  { %727 = vadd.xlane.f32.xlu1 %v726_v30 }
 0x48f   :  { %v719_v31 = vpop.f32.mrf.mxu0 }
 0x490   :  { %v720_v32 = vadd.f32 %v1780_v26, %v719_v31 }
 0x492   :  { %v723_v33 = vadd.f32 %v720_v32, %v2142_v3  ;;  %v135_v3 = vld [vmem:[%s2544_s7] sm:$0xff] }
 0x493   :  { %v827_v41 = vpack.c.bf16 %v136_v40, %v135_v3 }
 0x494   :  { %v729_v34 = vsel %vm160_vm0, %v723_v33, 0.0 }
 0x495   :  { %730 = vadd.xlane.f32.xlu2 %v729_v34  ;;  %1661 = vmatmul.msk.bf16.vlgmr.msra.gmra.mxu2 %vm160_vm0, %v827_v41  ;;  %v1782_v34 = vld [vmem:[%s2508_s9] ss:$0 sm:$0xff] }
 0x4a5   :  { %1662 = vmatmul.msk.bf16.gmra.mxu2 %vm160_vm0, %v828_v51 }
 0x500   :  { %v728_v45 = vpop.xlane.xlu1 %727 }
 0x501   :  { %v739_v46 = vmul.f32 %v2298_v44, %v728_v45 }
 0x503   :  { %v741_v49 = vsub.f32 %v722_v29, %v739_v46  ;;  %v1781_v29 = vld [vmem:[%s2545_s12] ss:$0 sm:$0xff] }
 0x505   :  { %v743_v50 = vmul.f32 %v741_v49, %v741_v49 }
 0x507   :  { %v745_v52 = vsel %vm160_vm0, %v743_v50, 0.0  ;;  %v1784_v50 = vld [vmem:[%s2510_s11] ss:$0 sm:$0xff] }
 0x508   :  { %v731_v53 = vpop.xlane.xlu2 %730  ;;  %746 = vadd.xlane.f32.xlu0 %v745_v52 }
 0x509   :  { %v740_v54 = vmul.f32 %v2298_v44, %v731_v53 }
 0x50b   :  { %v742_v55 = vsub.f32 %v723_v33, %v740_v54 }
 0x50d   :  { %v744_v56 = vmul.f32 %v742_v55, %v742_v55 }
 0x50f   :  { %v748_v57 = vsel %vm160_vm0, %v744_v56, 0.0 }
 0x510   :  { %749 = vadd.xlane.f32.xlu2 %v748_v57 }
 0x518   :  { %v864_v63 = vpop.f32.mrf.mxu2 }
 0x519   :  { %v865_v6 = vadd.f32 %v1783_v1, %v864_v63 }
 0x51b   :  { %v881_v10 = vpack.c.bf16 %v865_v6, %v865_v6 }
 0x51d   :  { %v887_v16 = vunpack.c.l.b16 %v881_v10 }
 0x520   :  { %v866_v11 = vpop.f32.mrf.mxu2 }
 0x521   :  { %v867_v14 = vadd.f32 %v1783_v1, %v866_v11 }
 0x523   :  { %v882_v17 = vpack.c.bf16 %v867_v14, %v867_v14 }
 0x525   :  { %v888_v21 = vunpack.c.l.b16 %v882_v17 }
 0x527   :  { %v2322_v22 = vpack.c.b16 %v888_v21, %v887_v16 }
 0x528   :  { %v869_v23 = vpop.f32.mrf.mxu2 }
 0x529   :  { %1000 = vrot.lane.b32.xlu1 %v2322_v22, %s1978_s5  ;;  %957 = vrot.lane.b32.xlu2 %v2322_v22, %s1977_s1  ;;  %v894_v26 = vsel %vm204_vm1, %v2322_v22, 0  ;;  %v870_v28 = vadd.f32 %v1783_v1, %v869_v23 }
 0x52a   :  { %903 = vmatpush.bf16.xpose.msrb.mxu3 %v894_v26 }
 0x52b   :  { %v883_v33 = vpack.c.bf16 %v870_v28, %v870_v28 }
 0x52d   :  { %v911_v2 = vunpack.c.l.b16 %v883_v33 }
 0x530   :  { %v871_v37 = vpop.f32.mrf.mxu2 }
 0x531   :  { %v872_v38 = vadd.f32 %v1783_v1, %v871_v37 }
 0x533   :  { %v884_v3 = vpack.c.bf16 %v872_v38, %v872_v38 }
 0x535   :  { %v912_v42 = vunpack.c.l.b16 %v884_v3 }
 0x537   :  { %v2342_v45 = vpack.c.b16 %v912_v42, %v911_v2 }
 0x539   :  { %1026 = vrot.lane.b32.xlu0 %v2342_v45, %s1978_s5  ;;  %v918_v46 = vsel %vm204_vm1, %v2342_v45, 0 }
 0x53a   :  { %927 = vmatpush.bf16.xpose.msrb.mxu0 %v918_v46 }
 0x541   :  { %1111 = vrot.lane.b32.xlu0 %v2322_v22, %s1980_s19 }
 0x57b   :  { %v747_v58 = vpop.xlane.xlu0 %746 }
 0x57c   :  { %v751_v60 = vmul.f32 %v747_v58, %v2298_v44 }
 0x57e   :  { %v753_v61 = vadd.f32 1e-05, %v751_v60 }
 0x580   :  { %1826 = vrsqrt.f32 %v753_v61  ;;  %vm761_vm7 = vweird.f32 %v753_v61 }
 0x583   :  { %v750_v0 = vpop.xlane.xlu2 %749 }
 0x584   :  { %v752_v5 = vmul.f32 %v750_v0, %v2298_v44 }
 0x586   :  { %v1827_v7 = vpop.eup %1826  ;;  %v754_v8 = vadd.f32 1e-05, %v752_v5 }
 0x587   :  { %v756_v4 = vmul.f32 %v1827_v7, %v753_v61  ;;  %vm762_vm6 = vweird.f32 %v1827_v7 }
 0x588   :  { %1828 = vrsqrt.f32 %v754_v8  ;;  %vm763_vm8 = vmor %vm761_vm7, %vm762_vm6  ;;  %vm771_vm10 = vweird.f32 %v754_v8 }
 0x589   :  { %v757_v9 = vmul.f32 %v1827_v7, %v756_v4 }
 0x58b   :  { %v758_v13 = vmul.f32 0.5, %v757_v9  ;;  %v958_v47 = vpop.permute.xlu2 %957 }
 0x58c   :  { %970 = vmatpush.bf16.msrb.mxu1 %v958_v47 }
 0x58d   :  { %v759_v15 = vsub.f32 1.5, %v758_v13 }
 0x58e   :  { %v1829_v18 = vpop.eup %1828 }
 0x58f   :  { %v760_v19 = vmul.f32 %v1827_v7, %v759_v15  ;;  %v766_v12 = vmul.f32 %v1829_v18, %v754_v8  ;;  %vm772_vm9 = vweird.f32 %v1829_v18 }
 0x590   :  { %vm773_vm11 = vmor %vm771_vm10, %vm772_vm9 }
 0x591   :  { %v767_v20 = vmul.f32 %v1829_v18, %v766_v12  ;;  %v764_v24 = vsel %vm763_vm8, %v1827_v7, %v760_v19 }
 0x592   :  { %v775_v30 = vmul.f32 %v764_v24, %v741_v49 }
 0x593   :  { %v768_v25 = vmul.f32 0.5, %v767_v20 }
 0x594   :  { %v780_v35 = vmul.f32 %v1781_v29, %v775_v30 }
 0x595   :  { %v769_v27 = vsub.f32 1.5, %v768_v25 }
 0x596   :  { %v2336_v40 = vadd.f32 %v1782_v34, %v780_v35 }
 0x597   :  { %v770_v31 = vmul.f32 %v1829_v18, %v769_v27 }
 0x599   :  { %v774_v32 = vsel %vm773_vm11, %v1829_v18, %v770_v31 }
 0x59a   :  { %v776_v36 = vmul.f32 %v774_v32, %v742_v55 }
 0x59b   :  { %v1001_v54 = vpop.permute.xlu1 %1000 }
 0x59c   :  { %v781_v39 = vmul.f32 %v1781_v29, %v776_v36  ;;  %v1006_v55 = vsel %vm204_vm1, %v1001_v54, 0 }
 0x59d   :  { %1015 = vmatpush.bf16.xpose.msra.mxu0 %v1006_v55 }
 0x59e   :  { %v2338_v41 = vadd.f32 %v1782_v34, %v781_v39 }
 0x5a0   :  { %v787_v43 = vpack.c.bf16 %v2338_v41, %v2336_v40 }
 0x5a2   :  { %1652 = vmatmul.msk.bf16.vlgmr.msra.gmra.mxu1 %vm160_vm0, %v787_v43 }
 0x5ab   :  { %v1027_v48 = vpop.permute.xlu0 %1026 }
 0x5ac   :  { %v1032_v49 = vsel %vm204_vm1, %v1027_v48, 0 }
 0x5ad   :  { %1041 = vmatpush.bf16.xpose.msra.mxu1 %v1032_v49 }
 0x5b3   :  { %v1112_v59 = vpop.permute.xlu0 %1111 }
 0x5b4   :  { %v1117_v62 = vsel %vm204_vm1, %v1112_v59, 0 }
 0x61f   :  { %v820_v51 = vpop.f32.mrf.mxu1 }
 0x620   :  { %v821_v52 = vadd.f32 %v1784_v50, %v820_v51 }
 0x622   :  { %v825_v53 = vmul.f32 0.35355338, %v821_v52 }
 0x624   :  { %v879_v56 = vpack.c.bf16 %v825_v53, %v825_v53 }
 0x626   :  { %1663 = vmatmul.msk.bf16.vlgmr.msrb.gmra.mxu3 %vm204_vm1, %v879_v56  ;;  %v996_v1 = vunpack.c.l.b16 %v879_v56 }
 0x627   :  { %v822_v57 = vpop.f32.mrf.mxu1 }
 0x628   :  { %v823_v58 = vadd.f32 %v1784_v50, %v822_v57  ;;  %v997_v5 = vpack.c.b16 %v996_v1, %v996_v1 }
 0x62a   :  { %v826_v60 = vmul.f32 0.35355338, %v823_v58 }
 0x62c   :  { %v880_v61 = vpack.c.bf16 %v826_v60, %v826_v60 }
 0x62e   :  { %v1022_v63 = vunpack.c.l.b16 %v880_v61  ;;  %1664 = vmatmul.msk.bf16.vlgmr.msrb.gmra.mxu0 %vm204_vm1, %v880_v61 }
 0x62f   :  { %1126 = vmatpush.bf16.xpose.msrb.mxu0 %v1117_v62 }
 0x630   :  { %v1023_v0 = vpack.c.b16 %v1022_v63, %v1022_v63 }
 0x632   :  { %1132 = vrot.lane.b32.xlu0 %v1023_v0, %s1980_s19  ;;  %1024 = vrot.lane.b32.xlu1 %v1023_v0, %s1978_s5 }
 0x63a   :  { %1217 = vrot.lane.b32.xlu0 %v997_v5, %s1982_s22  ;;  %1109 = vrot.lane.b32.xlu1 %v997_v5, %s1980_s19 }
 0x642   :  { %1242 = vrot.lane.b32.xlu1 %v2342_v45, %s1982_s22 }
 0x6a4   :  { %v1025_v18 = vpop.permute.xlu1 %1024  ;;  %v1133_v33 = vpop.permute.xlu0 %1132 }
 0x6a9   :  { %v905_v6 = vpop.f32.mrf.mxu3 }
 0x6aa   :  { %v933_v7 = vsel %vm683_vm3, %v905_v6, -inf }
 0x6ab   :  { %v929_v8 = vpop.f32.mrf.mxu0  ;;  %934 = vmax.xlane.f32.xlu2 %v933_v7 }
 0x6ac   :  { %v936_v4 = vsel %vm683_vm3, %v929_v8, -inf  ;;  %v1110_v19 = vpop.permute.xlu1 %1109  ;;  %v1218_v2 = vpop.permute.xlu0 %1217 }
 0x6ad   :  { %937 = vmax.xlane.f32.xlu1 %v936_v4 }
 0x6b1   :  { %v907_v9 = vpop.f32.mrf.mxu3 }
 0x6b3   :  { %v931_v10 = vpop.f32.mrf.mxu0 }
 0x6b4   :  { %v1243_v12 = vpop.permute.xlu1 %1242 }
 0x6b5   :  { %v1248_v3 = vsel %vm204_vm1, %v1243_v12, 0 }
 0x6c3   :  { %998 = vrot.lane.b32.xlu2 %v997_v5, %s1978_s5 }
 0x71e   :  { %v935_v11 = vpop.xlane.xlu2 %934 }
 0x71f   :  { %v939_v13 = vsub.f32 %v905_v6, %v935_v11 }
 0x720   :  { %v938_v21 = vpop.xlane.xlu1 %937 }
 0x721   :  { %v941_v14 = vmul.f32 1.442695, %v939_v13  ;;  %v940_v20 = vsub.f32 %v929_v8, %v938_v21 }
 0x723   :  { %1830 = vpow2.f32 %v941_v14  ;;  %v943_v24 = vmul.f32 1.442695, %v940_v20 }
 0x726   :  { %v999_v15 = vpop.permute.xlu2 %998 }
 0x727   :  { %1667 = vmatmul.msk.bf16.vlgmr.msra.gmra.mxu0 %vm204_vm1, %v999_v15 }
 0x729   :  { %v1831_v16 = vpop.eup %1830 }
 0x72a   :  { %v945_v17 = vsel %vm683_vm3, %v1831_v16, 0.0 }
 0x72b   :  { %946 = vadd.xlane.f32.xlu2 %v945_v17 }
 0x737   :  { %1671 = vmatmul.msk.bf16.vlgmr.msrb.gmra.mxu0 %vm204_vm1, %v1110_v19 }
 0x743   :  { %1134 = vrot.lane.b32.xlu2 %v2342_v45, %s1980_s19 }
 0x74b   :  { %1219 = vrot.lane.b32.xlu2 %v2322_v22, %s1982_s22 }
 0x753   :  { %1240 = vrot.lane.b32.xlu2 %v1023_v0, %s1982_s22 }
 0x79e   :  { %v947_v23 = vpop.xlane.xlu2 %946 }
 0x79f   :  { %1832 = vrcp.f32 %v947_v23 }
 0x7a0   :  { %1834 = vpow2.f32 %v943_v24 }
 0x7a4   :  { %v1017_v25 = vpop.f32.mrf.mxu0 }
 0x7a5   :  { %v1833_v26 = vpop.eup %1832  ;;  %v1047_v27 = vsel %vm683_vm3, %v1017_v25, -inf }
 0x7a6   :  { %v953_v28 = vmul.f32 %v1833_v26, %v1831_v16  ;;  %1048 = vmax.xlane.f32.xlu0 %v1047_v27  ;;  %v1135_v29 = vpop.permute.xlu2 %1134  ;;  %v2377_v31 = vpop.eup %1834 }
 0x7a7   :  { %v1140_v32 = vsel %vm204_vm1, %v1135_v29, 0  ;;  %v948_v35 = vsel %vm683_vm3, %v2377_v31, 0.0 }
 0x7a8   :  { %v955_v30 = vpack.c.bf16 %v953_v28, %v953_v28 }
 0x7aa   :  { %1665 = vmatmul.msk.bf16.vlgmr.msrb.gmra.mxu1 %vm683_vm3, %v955_v30 }
 0x7ab   :  { %1149 = vmatpush.bf16.xpose.msrb.mxu1 %v1140_v32 }
 0x7ac   :  { %v1019_v34 = vpop.f32.mrf.mxu0 }
 0x7ae   :  { %949 = vadd.xlane.f32.xlu0 %v948_v35  ;;  %v1220_v36 = vpop.permute.xlu2 %1219 }
 0x7af   :  { %v1225_v37 = vsel %vm204_vm1, %v1220_v36, 0 }
 0x7b0   :  { %1234 = vmatpush.bf16.xpose.msra.mxu0 %v1225_v37 }
 0x7b4   :  { %v1128_v38 = vpop.f32.mrf.mxu0 }
 0x7b5   :  { %v1155_v39 = vsel %vm683_vm3, %v1128_v38, -inf }
 0x7b6   :  { %1156 = vmax.xlane.f32.xlu1 %v1155_v39  ;;  %v1241_v43 = vpop.permute.xlu2 %1240 }
 0x7b7   :  { %1675 = vmatmul.msk.bf16.vlgmr.msra.gmra.mxu0 %vm204_vm1, %v1218_v2 }
 0x7ba   :  { %1668 = vmatmul.msk.bf16.vlgmr.msra.gmra.mxu1 %vm204_vm1, %v1025_v18 }
 0x7bb   :  { %1257 = vmatpush.bf16.xpose.msra.mxu1 %v1248_v3 }
 0x7bc   :  { %v1130_v42 = vpop.f32.mrf.mxu0 }
 0x7ca   :  { %1672 = vmatmul.msk.bf16.vlgmr.msrb.gmra.mxu1 %vm204_vm1, %v1133_v33 }
 0x7da   :  { %1676 = vmatmul.msk.bf16.vlgmr.msra.gmra.mxu1 %vm204_vm1, %v1241_v43 }
 0x819   :  { %v1049_v46 = vpop.xlane.xlu0 %1048 }
 0x81a   :  { %v1053_v47 = vsub.f32 %v1017_v25, %v1049_v46 }
 0x81c   :  { %v1055_v48 = vmul.f32 1.442695, %v1053_v47 }
 0x81e   :  { %1836 = vpow2.f32 %v1055_v48 }
 0x821   :  { %v950_v10 = vpop.xlane.xlu0 %949 }
 0x824   :  { %v1837_v49 = vpop.eup %1836 }
 0x825   :  { %v1059_v50 = vsel %vm683_vm3, %v1837_v49, 0.0 }
 0x826   :  { %1060 = vadd.xlane.f32.xlu1 %v1059_v50 }
 0x827   :  { %v2391_v51 = vpop.f32.mrf.mxu1 }
 0x829   :  { %v1157_v0 = vpop.xlane.xlu1 %1156 }
 0x82a   :  { %v1161_v1 = vsub.f32 %v1128_v38, %v1157_v0 }
 0x82c   :  { %v1163_v6 = vmul.f32 1.442695, %v1161_v1 }
 0x82e   :  { %1838 = vpow2.f32 %v1163_v6 }
 0x82f   :  { %v974_v52 = vpop.f32.mrf.mxu1 }
 0x834   :  { %v1236_v53 = vpop.f32.mrf.mxu0  ;;  %v1839_v7 = vpop.eup %1838 }
 0x835   :  { %v1263_v54 = vsel %vm683_vm3, %v1236_v53, -inf  ;;  %v1167_v8 = vsel %vm683_vm3, %v1839_v7, 0.0 }
 0x836   :  { %1264 = vmax.xlane.f32.xlu2 %v1263_v54 }
 0x837   :  { %v1043_v55 = vpop.f32.mrf.mxu1 }
 0x838   :  { %v1050_v57 = vsel %vm683_vm3, %v1043_v55, -inf }
 0x83c   :  { %v1238_v56 = vpop.f32.mrf.mxu0 }
 0x83e   :  { %1051 = vmax.xlane.f32.xlu2 %v1050_v57 }
 0x83f   :  { %1071 = vrot.lane.b32.xlu1 %v2322_v22, %s1976_s4  ;;  %v1045_v58 = vpop.f32.mrf.mxu1 }
 0x847   :  { %1179 = vrot.lane.b32.xlu1 %v2322_v22, %s1979_s26  ;;  %v1151_v59 = vpop.f32.mrf.mxu1 }
 0x848   :  { %v1158_v60 = vsel %vm683_vm3, %v1151_v59, -inf }
 0x849   :  { %1159 = vmax.xlane.f32.xlu0 %v1158_v60 }
 0x84f   :  { %v1153_v61 = vpop.f32.mrf.mxu1 }
 0x856   :  { %976 = vrot.lane.b32.xlu2 %v2342_v45, %s1977_s1 }
 0x857   :  { %v1259_v62 = vpop.f32.mrf.mxu1 }
 0x858   :  { %v1266_v5 = vsel %vm683_vm3, %v1259_v62, -inf }
 0x85d   :  { %1090 = vrot.lane.b32.xlu0 %v2342_v45, %s1976_s4 }
 0x85f   :  { %v1261_v63 = vpop.f32.mrf.mxu1 }
 0x871   :  { %1267 = vmax.xlane.f32.xlu1 %v1266_v5 }
 0x87f   :  { %1168 = vadd.xlane.f32.xlu2 %v1167_v8 }
 0x88a   :  { %1198 = vrot.lane.b32.xlu1 %v2342_v45, %s1979_s26 }
 0x899   :  { %v1061_v4 = vpop.xlane.xlu1 %1060 }
 0x89a   :  { %1840 = vrcp.f32 %v1061_v4 }
 0x89b   :  { %1842 = vrcp.f32 %v950_v10 }
 0x8a0   :  { %v1841_v13 = vpop.eup %1840 }
 0x8a1   :  { %v1067_v15 = vmul.f32 %v1841_v13, %v1837_v49  ;;  %v1843_v19 = vpop.eup %1842 }
 0x8a2   :  { %v954_v24 = vmul.f32 %v1843_v19, %v2377_v31 }
 0x8a3   :  { %v1069_v12 = vpack.c.bf16 %v1067_v15, %v1067_v15 }
 0x8a4   :  { %v956_v27 = vpack.c.bf16 %v954_v24, %v954_v24 }
 0x8a9   :  { %v1265_v9 = vpop.xlane.xlu2 %1264 }
 0x8aa   :  { %v1269_v11 = vsub.f32 %v1236_v53, %v1265_v9 }
 0x8ac   :  { %v1271_v14 = vmul.f32 1.442695, %v1269_v11 }
 0x8ae   :  { %1844 = vpow2.f32 %v1271_v14 }
 0x8b1   :  { %v1072_v16 = vpop.permute.xlu1 %1071  ;;  %v1052_v17 = vpop.xlane.xlu2 %1051 }
 0x8b2   :  { %v1054_v18 = vsub.f32 %v1043_v55, %v1052_v17  ;;  %1084 = vmatpush.bf16.msrb.mxu2 %v1072_v16 }
 0x8b4   :  { %v2408_v21 = vpop.eup %1844  ;;  %v1057_v20 = vmul.f32 1.442695, %v1054_v18 }
 0x8b5   :  { %1669 = vmatmul.msk.bf16.vlgmr.msrb.gmra.mxu2 %vm683_vm3, %v1069_v12  ;;  %v1275_v23 = vsel %vm683_vm3, %v2408_v21, 0.0 }
 0x8b6   :  { %1846 = vpow2.f32 %v1057_v20  ;;  %1276 = vadd.xlane.f32.xlu1 %v1275_v23  ;;  %v1722_v20 = vld [vmem:[%s2513_s14] sm:$0xff] }
 0x8b9   :  { %v1180_v25 = vpop.permute.xlu1 %1179  ;;  %v977_v26 = vpop.permute.xlu2 %976 }
 0x8ba   :  { %989 = vmatpush.bf16.msra.mxu3 %v977_v26  ;;  %1192 = vmatpush.bf16.msra.mxu2 %v1180_v25 }
 0x8bc   :  { %v1847_v28 = vpop.eup %1846  ;;  %v1160_v29 = vpop.xlane.xlu0 %1159 }
 0x8bd   :  { %v1162_v30 = vsub.f32 %v1151_v59, %v1160_v29  ;;  %1666 = vmatmul.msk.bf16.vlgmr.msra.gmra.mxu3 %vm683_vm3, %v956_v27  ;;  %v1062_v32 = vsel %vm683_vm3, %v1847_v28, 0.0 }
 0x8be   :  { %1063 = vadd.xlane.f32.xlu0 %v1062_v32 }
 0x8bf   :  { %v1165_v33 = vmul.f32 1.442695, %v1162_v30 }
 0x8c1   :  { %1848 = vpow2.f32 %v1165_v33 }
 0x8c7   :  { %v1849_v34 = vpop.eup %1848 }
 0x8c8   :  { %v1170_v35 = vsel %vm683_vm3, %v1849_v34, 0.0 }
 0x8c9   :  { %1171 = vadd.xlane.f32.xlu0 %v1170_v35 }
 0x8cf   :  { %v1091_v31 = vpop.permute.xlu0 %1090 }
 0x8d0   :  { %1103 = vmatpush.bf16.msrb.mxu3 %v1091_v31 }
 0x8dd   :  { %1306 = vrot.lane.b32.xlu0 %v2342_v45, %s1981_s27 }
 0x8e4   :  { %v1268_v36 = vpop.xlane.xlu1 %1267 }
 0x8e5   :  { %v1270_v37 = vsub.f32 %v1259_v62, %v1268_v36 }
 0x8e7   :  { %v1273_v38 = vmul.f32 1.442695, %v1270_v37 }
 0x8e9   :  { %1850 = vpow2.f32 %v1273_v38 }
 0x8ef   :  { %v1851_v39 = vpop.eup %1850 }
 0x8f0   :  { %v1278_v2 = vsel %vm683_vm3, %v1851_v39, 0.0 }
 0x8f1   :  { %1279 = vadd.xlane.f32.xlu2 %v1278_v2 }
 0x8f2   :  { %v1169_v3 = vpop.xlane.xlu2 %1168 }
 0x8f3   :  { %1852 = vrcp.f32 %v1169_v3 }
 0x8f9   :  { %v1853_v42 = vpop.eup %1852 }
 0x8fa   :  { %v1175_v43 = vmul.f32 %v1853_v42, %v1839_v7 }
 0x8fc   :  { %v1177_v46 = vpack.c.bf16 %v1175_v43, %v1175_v43  ;;  %v1199_v47 = vpop.permute.xlu1 %1198 }
 0x8fd   :  { %1211 = vmatpush.bf16.msra.mxu3 %v1199_v47 }
 0x8fe   :  { %1673 = vmatmul.msk.bf16.vlgmr.msra.gmra.mxu2 %vm683_vm3, %v1177_v46 }
 0x909   :  { %1287 = vrot.lane.b32.xlu2 %v2322_v22, %s1981_s27 }
 0x929   :  { %v1277_v22 = vpop.xlane.xlu1 %1276 }
 0x931   :  { %v1064_v45 = vpop.xlane.xlu0 %1063 }
 0x932   :  { %1854 = vrcp.f32 %v1064_v45 }
 0x938   :  { %v1855_v48 = vpop.eup %1854  ;;  %v1086_v49 = vpop.f32.mrf.mxu2 }
 0x939   :  { %v1068_v50 = vmul.f32 %v1855_v48, %v1847_v28 }
 0x93b   :  { %v1070_v52 = vpack.c.bf16 %v1068_v50, %v1068_v50 }
 0x93c   :  { %v1172_v53 = vpop.xlane.xlu0 %1171 }
 0x93d   :  { %1670 = vmatmul.msk.bf16.vlgmr.msrb.gmra.mxu3 %vm683_vm3, %v1070_v52  ;;  %1856 = vrcp.f32 %v1172_v53 }
 0x93e   :  { %1858 = vrcp.f32 %v1277_v22  ;;  %v1724_v22 = vld [vmem:[%s2517_s18] sm:$0xff] }
 0x940   :  { %v991_v54 = vpop.f32.mrf.mxu3  ;;  %v1088_v55 = vpop.f32.mrf.mxu2 }
 0x943   :  { %v1857_v56 = vpop.eup %1856 }
 0x944   :  { %v1176_v57 = vmul.f32 %v1857_v56, %v1849_v34  ;;  %v1859_v62 = vpop.eup %1858 }
 0x945   :  { %v1283_v63 = vmul.f32 %v1859_v62, %v2408_v21  ;;  %v1723_v21 = vld [vmem:[%s2513_s14 + $0x8] sm:$0xff] }
 0x946   :  { %v1178_v59 = vpack.c.bf16 %v1176_v57, %v1176_v57  ;;  %1380 = vmatpush.bf16.msrb.mxu0 %v1723_v21 }
 0x947   :  { %v1285_v6 = vpack.c.bf16 %v1283_v63, %v1283_v63 }
 0x948   :  { %v993_v58 = vpop.f32.mrf.mxu3 }
 0x949   :  { %v1725_v58 = vld [vmem:[%s2517_s18 + $0x8] sm:$0xff] }
 0x94a   :  { %1381 = vmatpush.bf16.msrb.mxu0 %v1722_v20  ;;  %1476 = vmatpush.bf16.msrb.mxu1 %v1725_v58 }
 0x94d   :  { %1674 = vmatmul.msk.bf16.vlgmr.msra.gmra.mxu3 %vm683_vm3, %v1178_v59 }
 0x94e   :  { %1477 = vmatpush.bf16.msrb.mxu1 %v1724_v22 }
 0x94f   :  { %v1307_v60 = vpop.permute.xlu0 %1306 }
 0x950   :  { %1319 = vmatpush.bf16.msrb.mxu3 %v1307_v60 }
 0x964   :  { %v1280_v61 = vpop.xlane.xlu2 %1279 }
 0x965   :  { %1860 = vrcp.f32 %v1280_v61 }
 0x96b   :  { %v1861_v0 = vpop.eup %1860 }
 0x96c   :  { %v1284_v1 = vmul.f32 %v1861_v0, %v1851_v39  ;;  %v1288_v5 = vpop.permute.xlu2 %1287  ;;  %v1785_v39 = vld [vmem:[%s2514_s15] ss:$0 sm:$0xff] }
 0x96d   :  { %1300 = vmatpush.bf16.msrb.mxu2 %v1288_v5 }
 0x96e   :  { %v1286_v7 = vpack.c.bf16 %v1284_v1, %v1284_v1 }
 0x970   :  { %1677 = vmatmul.msk.bf16.vlgmr.msrb.gmra.mxu2 %vm683_vm3, %v1285_v6  ;;  %1678 = vmatmul.msk.bf16.vlgmr.msrb.gmra.mxu3 %vm683_vm3, %v1286_v7 }
 0x981   :  { %v1194_v8 = vpop.f32.mrf.mxu2 }
 0x989   :  { %v1196_v4 = vpop.f32.mrf.mxu2 }
 0x9c0   :  { %v1105_v9 = vpop.f32.mrf.mxu3 }
 0x9c1   :  { %v1764_v10 = vpack.i.bf16 %v1105_v9, %v1086_v49 }
 0x9c3   :  { %1765 = vrot.lane.b32.xlu2 %v1764_v10, %s1987_s8 }
 0x9c8   :  { %v1107_v11 = vpop.f32.mrf.mxu3 }
 0x9d0   :  { %v1213_v13 = vpop.f32.mrf.mxu3 }
 0x9d1   :  { %v1769_v14 = vpack.i.bf16 %v1213_v13, %v1194_v8 }
 0x9d3   :  { %1770 = vrot.lane.b32.xlu0 %v1769_v14, %s1988_s21 }
 0x9d8   :  { %v1215_v15 = vpop.f32.mrf.mxu3 }
 0x9d9   :  { %v1786_v15 = vld [vmem:[%s2515_s16] ss:$0 sm:$0xff] }
 0x9f3   :  { %v1302_v16 = vpop.f32.mrf.mxu2  ;;  %v1321_v17 = vpop.f32.mrf.mxu3 }
 0x9f4   :  { %v1774_v18 = vpack.i.bf16 %v1321_v17, %v1302_v16 }
 0x9f6   :  { %1775 = vrot.lane.b32.xlu1 %v1774_v18, %s1989_s28 }
 0x9fb   :  { %v1304_v19 = vpop.f32.mrf.mxu2  ;;  %v1323_v12 = vpop.f32.mrf.mxu3 }
 0x9fc   :  { %v1787_v19 = vld [vmem:[%s2516_s17] ss:$0 sm:$0xff] }
 0xa1d   :  { %v1766_v23 = vpop.permute.xlu2 %1765 }
 0xa1e   :  { %v1768_v25 = vunpack.i.h.bf16 %v1766_v23  ;;  %v1767_v26 = vunpack.i.l.bf16 %v1766_v23 }
 0xa20   :  { %v1350_v30 = vsel %vm204_vm1, %v991_v54, %v1768_v25  ;;  %v1349_v32 = vsel %vm204_vm1, %v2391_v51, %v1767_v26  ;;  %v1729_v26 = vld [vmem:[%s2519_s20 + $0x18] sm:$0xff] }
 0xa21   :  { %1527 = vmatpush.bf16.msra.mxu2 %v1729_v26 }
 0xa45   :  { %v1771_v24 = vpop.permute.xlu0 %1770 }
 0xa46   :  { %v1773_v27 = vunpack.i.h.bf16 %v1771_v24  ;;  %v1772_v28 = vunpack.i.l.bf16 %v1771_v24 }
 0xa48   :  { %v1352_v35 = vsel %vm683_vm3, %v1350_v30, %v1773_v27  ;;  %v1351_v31 = vsel %vm683_vm3, %v1349_v32, %v1772_v28  ;;  %v1728_v27 = vld [vmem:[%s2519_s20 + $0x10] sm:$0xff]  ;;  %v1727_v28 = vld [vmem:[%s2519_s20 + $0x8] sm:$0xff]  ;;  %v1788_v32 = vld [vmem:[#allocation2] ss:$0 sm:$0xff]  ;;  %vm1519_vm3 = vcmask 523264  }
 0xa49   :  { %1528 = vmatpush.bf16.msra.mxu2 %v1728_v27 }
 0xa4d   :  { %1529 = vmatpush.bf16.msra.mxu2 %v1727_v28 }
 0xa68   :  { %v1776_v29 = vpop.permute.xlu1 %1775 }
 0xa69   :  { %v1778_v33 = vunpack.i.h.bf16 %v1776_v29  ;;  %v1777_v34 = vunpack.i.l.bf16 %v1776_v29  ;;  %v1726_v29 = vld [vmem:[%s2519_s20] sm:$0xff] }
 0xa6a   :  { %1530 = vmatpush.bf16.msra.mxu2 %v1726_v29 }
 0xa6b   :  { %v1354_v36 = vsel %vm686_vm4, %v1352_v35, %v1778_v33  ;;  %v1353_v37 = vsel %vm686_vm4, %v1351_v31, %v1777_v34 }
 0xa6c   :  { %v1355_v38 = vpack.c.bf16 %v1354_v36, %v1353_v37 }
 0xa6e   :  { %1687 = vmatmul.msk.bf16.vlgmr.msrb.gmra.mxu0 %vm160_vm0, %v1355_v38  ;;  %v1789_v38 = vld [vmem:[#allocation4] ss:$0 sm:$0xff] }
 0xaeb   :  { %v1383_v2 = vpop.f32.mrf.mxu0 }
 0xaec   :  { %v1384_v3 = vadd.f32 %v1785_v39, %v1383_v2 }
 0xaee   :  { %v1388_v51 = vadd.f32 %v1384_v3, %v2336_v40 }
 0xaf0   :  { %v1392_v42 = vsel %vm160_vm0, %v1388_v51, 0.0 }
 0xaf1   :  { %1393 = vadd.xlane.f32.xlu2 %v1392_v42 }
 0xaf3   :  { %v1385_v43 = vpop.f32.mrf.mxu0 }
 0xaf4   :  { %v1386_v46 = vadd.f32 %v1785_v39, %v1385_v43 }
 0xaf6   :  { %v1389_v47 = vadd.f32 %v1386_v46, %v2338_v41 }
 0xaf8   :  { %v1395_v45 = vsel %vm160_vm0, %v1389_v47, 0.0 }
 0xaf9   :  { %1396 = vadd.xlane.f32.xlu0 %v1395_v45 }
 0xb64   :  { %v1394_v48 = vpop.xlane.xlu2 %1393 }
 0xb65   :  { %v1398_v49 = vmul.f32 %v1394_v48, %v2298_v44 }
 0xb67   :  { %v1400_v50 = vsub.f32 %v1388_v51, %v1398_v49 }
 0xb69   :  { %v1402_v52 = vmul.f32 %v1400_v50, %v1400_v50 }
 0xb6b   :  { %v1404_v53 = vsel %vm160_vm0, %v1402_v52, 0.0 }
 0xb6c   :  { %v1397_v54 = vpop.xlane.xlu0 %1396  ;;  %1405 = vadd.xlane.f32.xlu1 %v1404_v53 }
 0xb6d   :  { %v1399_v40 = vmul.f32 %v1397_v54, %v2298_v44 }
 0xb6f   :  { %v1401_v55 = vsub.f32 %v1389_v47, %v1399_v40 }
 0xb71   :  { %v1403_v56 = vmul.f32 %v1401_v55, %v1401_v55 }
 0xb73   :  { %v1407_v57 = vsel %vm160_vm0, %v1403_v56, 0.0 }
 0xb74   :  { %1408 = vadd.xlane.f32.xlu2 %v1407_v57 }
 0xbdf   :  { %v1406_v41 = vpop.xlane.xlu1 %1405 }
 0xbe0   :  { %v1410_v59 = vmul.f32 %v1406_v41, %v2298_v44 }
 0xbe2   :  { %v1412_v60 = vadd.f32 1e-05, %v1410_v59 }
 0xbe4   :  { %1862 = vrsqrt.f32 %v1412_v60  ;;  %vm1420_vm13 = vweird.f32 %v1412_v60 }
 0xbe7   :  { %v1409_v61 = vpop.xlane.xlu2 %1408 }
 0xbe8   :  { %v1411_v62 = vmul.f32 %v1409_v61, %v2298_v44 }
 0xbea   :  { %v1863_v63 = vpop.eup %1862  ;;  %v1413_v0 = vadd.f32 1e-05, %v1411_v62 }
 0xbeb   :  { %v1415_v1 = vmul.f32 %v1863_v63, %v1412_v60  ;;  %vm1421_vm12 = vweird.f32 %v1863_v63 }
 0xbec   :  { %1864 = vrsqrt.f32 %v1413_v0  ;;  %vm1422_vm14 = vmor %vm1420_vm13, %vm1421_vm12  ;;  %vm1430_vm1 = vweird.f32 %v1413_v0 }
 0xbed   :  { %v1416_v5 = vmul.f32 %v1863_v63, %v1415_v1 }
 0xbef   :  { %v1417_v6 = vmul.f32 0.5, %v1416_v5 }
 0xbf1   :  { %v1418_v7 = vsub.f32 1.5, %v1417_v6 }
 0xbf2   :  { %v1865_v8 = vpop.eup %1864 }
 0xbf3   :  { %v1419_v4 = vmul.f32 %v1863_v63, %v1418_v7  ;;  %v1425_v9 = vmul.f32 %v1865_v8, %v1413_v0  ;;  %vm1431_vm15 = vweird.f32 %v1865_v8 }
 0xbf4   :  { %vm1432_vm2 = vmor %vm1430_vm1, %vm1431_vm15 }
 0xbf5   :  { %v1426_v10 = vmul.f32 %v1865_v8, %v1425_v9  ;;  %v1423_v11 = vsel %vm1422_vm14, %v1863_v63, %v1419_v4 }
 0xbf6   :  { %v1434_v16 = vmul.f32 %v1423_v11, %v1400_v50 }
 0xbf7   :  { %v1427_v13 = vmul.f32 0.5, %v1426_v10  ;;  %v1791_v10 = vld [vmem:[#allocation7] ss:$0 sm:$0xff] }
 0xbf8   :  { %v1439_v12 = vmul.f32 %v1786_v15, %v1434_v16 }
 0xbf9   :  { %v1428_v14 = vsub.f32 1.5, %v1427_v13 }
 0xbfa   :  { %v1444_v23 = vadd.f32 %v1787_v19, %v1439_v12 }
 0xbfb   :  { %v1429_v17 = vmul.f32 %v1865_v8, %v1428_v14 }
 0xbfd   :  { %v1433_v18 = vsel %vm1432_vm2, %v1865_v8, %v1429_v17  ;;  %v1790_v8 = vld [vmem:[#allocation6] ss:$0 sm:$0xff] }
 0xbfe   :  { %v1435_v21 = vmul.f32 %v1433_v18, %v1401_v55 }
 0xc00   :  { %v1440_v20 = vmul.f32 %v1786_v15, %v1435_v21 }
 0xc02   :  { %v1445_v24 = vadd.f32 %v1787_v19, %v1440_v20 }
 0xc04   :  { %v1446_v25 = vpack.c.bf16 %v1445_v24, %v1444_v23 }
 0xc06   :  { %1696 = vmatmul.msk.bf16.vlgmr.msrb.gmra.mxu1 %vm160_vm0, %v1446_v25 }
 0xc83   :  { %v1479_v30 = vpop.f32.mrf.mxu1 }
 0xc84   :  { %v1480_v33 = vadd.f32 %v1788_v32, %v1479_v30 }
 0xc86   :  { %v1484_v31 = vmax.f32 %v1480_v33, 0.0 }
 0xc8b   :  { %v1481_v34 = vpop.f32.mrf.mxu1 }
 0xc8c   :  { %v1482_v35 = vadd.f32 %v1788_v32, %v1481_v34 }
 0xc8e   :  { %v1485_v36 = vmax.f32 %v1482_v35, 0.0 }
 0xc90   :  { %v1486_v37 = vpack.c.bf16 %v1485_v36, %v1484_v31 }
 0xc92   :  { %1713 = vmatmul.msk.bf16.vlgmr.msra.gmra.mxu2 %vm1519_vm3, %v1486_v37 }
 0xd15   :  { %v1532_v39 = vpop.f32.mrf.mxu2 }
 0xd16   :  { %v1537_v2 = vadd.f32 %v1532_v39, %v1444_v23 }
 0xd18   :  { %v1543_v3 = vadd.f32 %v1789_v38, %v1537_v2 }
 0xd1a   :  { %v1547_v51 = vsel %vm160_vm0, %v1543_v3, 0.0 }
 0xd1b   :  { %1548 = vadd.xlane.f32.xlu0 %v1547_v51 }
 0xd1d   :  { %v1534_v42 = vpop.f32.mrf.mxu2 }
 0xd1e   :  { %v1538_v43 = vadd.f32 %v1534_v42, %v1445_v24 }
 0xd20   :  { %v1544_v46 = vadd.f32 %v1789_v38, %v1538_v43 }
 0xd22   :  { %v1550_v47 = vsel %vm160_vm0, %v1544_v46, 0.0 }
 0xd23   :  { %1551 = vadd.xlane.f32.xlu2 %v1550_v47 }
 0xd8e   :  { %v1549_v45 = vpop.xlane.xlu0 %1548 }
 0xd8f   :  { %v1553_v48 = vmul.f32 %v1549_v45, %v2298_v44 }
 0xd91   :  { %v1555_v49 = vsub.f32 %v1543_v3, %v1553_v48 }
 0xd93   :  { %v1557_v50 = vmul.f32 %v1555_v49, %v1555_v49 }
 0xd95   :  { %v1559_v52 = vsel %vm160_vm0, %v1557_v50, 0.0 }
 0xd96   :  { %1560 = vadd.xlane.f32.xlu0 %v1559_v52  ;;  %v1552_v53 = vpop.xlane.xlu2 %1551 }
 0xd97   :  { %v1554_v54 = vmul.f32 %v1552_v53, %v2298_v44 }
 0xd99   :  { %v1556_v40 = vsub.f32 %v1544_v46, %v1554_v54 }
 0xd9b   :  { %v1558_v55 = vmul.f32 %v1556_v40, %v1556_v40 }
 0xd9d   :  { %v1562_v56 = vsel %vm160_vm0, %v1558_v55, 0.0 }
 0xd9e   :  { %1563 = vadd.xlane.f32.xlu2 %v1562_v56 }
 0xe09   :  { %v1561_v57 = vpop.xlane.xlu0 %1560 }
 0xe0a   :  { %v1565_v41 = vmul.f32 %v1561_v57, %v2298_v44 }
 0xe0c   :  { %v1567_v58 = vadd.f32 1e-05, %v1565_v41 }
 0xe0e   :  { %1866 = vrsqrt.f32 %v1567_v58  ;;  %vm1575_vm5 = vweird.f32 %v1567_v58 }
 0xe11   :  { %v1564_v59 = vpop.xlane.xlu2 %1563 }
 0xe12   :  { %v1566_v60 = vmul.f32 %v1564_v59, %v2298_v44 }
 0xe14   :  { %v1867_v22 = vpop.eup %1866  ;;  %v1568_v61 = vadd.f32 1e-05, %v1566_v60 }
 0xe15   :  { %v1570_v62 = vmul.f32 %v1867_v22, %v1567_v58  ;;  %vm1576_vm4 = vweird.f32 %v1867_v22 }
 0xe16   :  { %1868 = vrsqrt.f32 %v1568_v61  ;;  %vm1577_vm6 = vmor %vm1575_vm5, %vm1576_vm4  ;;  %vm1585_vm8 = vweird.f32 %v1568_v61 }
 0xe17   :  { %v1571_v63 = vmul.f32 %v1867_v22, %v1570_v62 }
 0xe19   :  { %v1572_v0 = vmul.f32 0.5, %v1571_v63 }
 0xe1b   :  { %v1573_v1 = vsub.f32 1.5, %v1572_v0 }
 0xe1c   :  { %v1869_v5 = vpop.eup %1868 }
 0xe1d   :  { %v1574_v6 = vmul.f32 %v1867_v22, %v1573_v1  ;;  %v1580_v7 = vmul.f32 %v1869_v5, %v1568_v61  ;;  %vm1586_vm7 = vweird.f32 %v1869_v5 }
 0xe1e   :  { %vm1587_vm9 = vmor %vm1585_vm8, %vm1586_vm7 }
 0xe1f   :  { %v1578_v4 = vsel %vm1577_vm6, %v1867_v22, %v1574_v6  ;;  %v1581_v9 = vmul.f32 %v1869_v5, %v1580_v7 }
 0xe20   :  { %v1589_v11 = vmul.f32 %v1578_v4, %v1555_v49 }
 0xe21   :  { %v1582_v13 = vmul.f32 0.5, %v1581_v9 }
 0xe22   :  { %v1594_v44 = vmul.f32 %v1790_v8, %v1589_v11 }
 0xe23   :  { %v1583_v14 = vsub.f32 1.5, %v1582_v13 }
 0xe24   :  { %v1599_v15 = vadd.f32 %v1791_v10, %v1594_v44 }
 0xe25   :  { %v1584_v16 = vmul.f32 %v1869_v5, %v1583_v14 }
 0xe26   :  { %1601 = vst.msk [vmem:[%s2523_s24] sm:$0xff] %vm160_vm0, %v1599_v15 }
 0xe27   :  { %v1588_v17 = vsel %vm1587_vm9, %v1869_v5, %v1584_v16 }
 0xe28   :  { %v1590_v18 = vmul.f32 %v1588_v17, %v1556_v40 }
 0xe2a   :  { %v1595_v19 = vmul.f32 %v1790_v8, %v1590_v18 }
 0xe2c   :  { %v1600_v12 = vadd.f32 %v1791_v10, %v1595_v19 }
 0xe2e   :  { %1602 = vst.msk [vmem:[%s2523_s24 + $0x8] sm:$0xff] %vm160_vm0, %v1600_v12 }
 0xe2f   :  { %1607 = vsyncpa [#allocation3], 1 }
 0xe30   :  { %1608 = vsyncpa [#allocation5], 1 }
 0xe31   :  { %1609 = vsyncpa [#allocation8], 1 }

// kernel: transformer_decoder_forward.3
= control target key start
LH: loop header
LB: loop body
LE: loop exit
PB: predicated region body
PF: predicated region fallthrough
CT: control target
= control target key end

     0   :  { %vm105_vm0 = vcmask 261120   ;;  %s1811_s26 = smov 80   ;;  %s1813_s28 = smov 72   ;;  %vm149_vm1 = vcmask 64512   ;;  %vm222_vm2 = vcmask 1043456   ;;  %vm628_vm3 = vcmask 130048   ;;  %s2331_s4 = inlined_call_operand.vmem [shape: bf16[32,96], index: 4, kind: input, shape index: {}]   ;;  %s2332_s0 = inlined_call_operand.vmem [shape: f32[2,8,32], index: 0, kind: input, shape index: {}]   ;;  %s2333_s5 = inlined_call_operand.vmem [shape: f32[1,96], index: 5, kind: input, shape index: {}]   ;;  %s2334_s3 = inlined_call_operand.vmem [shape: f32[2,8], index: 3, kind: input, shape index: {}]   ;;  %s2335_s2 = inlined_call_operand.vmem [shape: f32[8,8], index: 2, kind: input, shape index: {}]   ;;  %s2336_s7 = inlined_call_operand.vmem [shape: f32[1,32], index: 7, kind: input, shape index: {}]   ;;  %s2337_s6 = inlined_call_operand.vmem [shape: bf16[32,32], index: 6, kind: input, shape index: {}]   ;;  %s2338_s8 = inlined_call_operand.vmem [shape: f32[1,32], index: 8, kind: input, shape index: {}]   ;;  %s2339_s9 = inlined_call_operand.vmem [shape: f32[1,32], index: 9, kind: input, shape index: {}]   ;;  %s2340_s12 = inlined_call_operand.vmem [shape: bf16[32,64], index: 12, kind: input, shape index: {}]   ;;  %s2341_s1 = inlined_call_operand.vmem [shape: f32[2,16,32], index: 1, kind: input, shape index: {}]   ;;  %s2342_s13 = inlined_call_operand.vmem [shape: f32[1,64], index: 13, kind: input, shape index: {}]   ;;  %s2343_s11 = inlined_call_operand.vmem [shape: f32[1,32], index: 11, kind: input, shape index: {}]   ;;  %s2344_s10 = inlined_call_operand.vmem [shape: bf16[32,32], index: 10, kind: input, shape index: {}]   ;;  %s2345_s15 = inlined_call_operand.vmem [shape: f32[1,32], index: 15, kind: input, shape index: {}]   ;;  %s2346_s14 = inlined_call_operand.vmem [shape: bf16[32,32], index: 14, kind: input, shape index: {}]   ;;  %s2347_s16 = inlined_call_operand.vmem [shape: f32[1,32], index: 16, kind: input, shape index: {}]   ;;  %s2348_s17 = inlined_call_operand.vmem [shape: f32[1,32], index: 17, kind: input, shape index: {}]   ;;  %s2349_s19 = inlined_call_operand.vmem [shape: f32[1,64], index: 19, kind: input, shape index: {}]   ;;  %s2350_s18 = inlined_call_operand.vmem [shape: bf16[32,64], index: 18, kind: input, shape index: {}]   ;;  %s2351_s20 = inlined_call_operand.vmem [shape: bf16[64,32], index: 20, kind: input, shape index: {}]   ;;  %s2352_s21 = inlined_call_operand.vmem [shape: f32[1,32], index: 21, kind: input, shape index: {}]   ;;  %s2353_s22 = inlined_call_operand.vmem [shape: f32[1,32], index: 22, kind: input, shape index: {}]   ;;  %s2354_s23 = inlined_call_operand.vmem [shape: f32[1,32], index: 23, kind: input, shape index: {}]   ;;  %s2355_s24 = inlined_call_operand.vmem [shape: f32[2,8,32], index: 24, kind: output, shape index: {}]  }
   0x1   :  { %2362 = sst [smem:[#allocation2_spill]] %s2331_s4  ;;  %s1815_s25 = smov 64   ;;  %vm631_vm4 = vcmask 195584  }
   0x2   :  { %2363 = sst [smem:[#allocation3_spill]] %s2332_s0  ;;  %s1809_s0 = smov 96  }
   0x3   :  { %2364 = sst [smem:[#allocation4_spill]] %s2333_s5  ;;  %s1817_s5 = smov 48  }
   0x4   :  { %2365 = sst [smem:[#allocation5_spill]] %s2334_s3  ;;  %s1818_s29 = smov 40  }
   0x5   :  { %2366 = sst [smem:[#allocation6_spill]] %s2335_s2  ;;  %s1808_s2 = smov 88  }
   0x6   :  { %2367 = sst [smem:[#allocation7_spill]] %s2336_s7  ;;  %s1810_s7 = smov 120  }
   0x7   :  { %2368 = sst [smem:[#allocation8_spill]] %s2337_s6  ;;  %s1814_s6 = smov 104  }
   0x8   :  { %2369 = sst [smem:[#allocation9_spill]] %s2338_s8  ;;  %s2360_s8 = smov 16  }
   0x9   :  { %2370 = sst [smem:[#allocation10_spill]] %s2339_s9  ;;  %s2359_s30 = smov 24  }
   0xa   :  { %s2371_s27 = sld [smem:[#allocation2_spill]] }
   0xb   :  { %s2372_s3 = sld [smem:[#allocation3_spill]] }
   0xc   :  { %s2373_s9 = sld [smem:[#allocation4_spill]] }
   0xd   :  { %s2375_s4 = sld [smem:[#allocation6_spill]] }
  0x10   :  { %v1657_v0 = vld [vmem:[%s2371_s27 + $0x8] sm:$0xff]  ;;  %v1656_v1 = vld [vmem:[%s2371_s27] sm:$0xff]  ;;  %s1812_s27 = smov 112  }
  0x11   :  { %115 = vmatpush.bf16.msra.mxu0 %v1657_v0  ;;  %v1957_v2 = vld [vmem:[%s2372_s3] sm:$0xff]  ;;  %v1962_v3 = vld [vmem:[%s2372_s3 + $0x8] sm:$0xff]  ;;  %s2374_s3 = sld [smem:[#allocation5_spill]] }
  0x12   :  { %v84_v4 = vpack.c.bf16 %v1962_v3, %v1957_v2  ;;  %v1717_v5 = vld [vmem:[%s2373_s9] ss:$0 sm:$0xff]  ;;  %s1816_s9 = smov 56  }
  0x13   :  { %v125_v48 = vld [vmem:[%s2375_s4] sm:$0xff] }
  0x15   :  { %116 = vmatpush.bf16.msra.mxu0 %v1656_v1 }
  0x17   :  { %v126_v46 = vld [vmem:[%s2374_s3] sm:$0x3]  ;;  %s2361_s3 = smov 8  }
  0x18   :  { %1560 = vmatmul.msk.bf16.vlgmr.msra.gmra.mxu0 %vm105_vm0, %v84_v4  ;;  %v129_v47 = vperm.slane %v126_v46, 0  ;;  %v128_v56 = vrot.slane %v126_v46, 1 }
  0x1a   :  { %v133_v49 = vadd.f32 %v129_v47, %v125_v48  ;;  %v130_v57 = vperm.slane %v128_v56, 0 }
  0x1c   :  { %v134_v60 = vadd.f32 %v130_v57, %v125_v48 }
  0x95   :  { %v118_v6 = vpop.f32.mrf.mxu0 }
  0x96   :  { %v119_v7 = vadd.f32 %v1717_v5, %v118_v6 }
  0x98   :  { %v123_v8 = vmul.f32 0.35355338, %v119_v7  ;;  %v142_v9 = vpack.c.bf16 %v119_v7, %v119_v7 }
  0x9a   :  { %v140_v10 = vpack.c.bf16 %v123_v8, %v123_v8  ;;  %v145_v11 = vunpack.c.l.b16 %v142_v9 }
  0x9c   :  { %v1970_v12 = vpack.c.b16 %v145_v11, %v145_v11  ;;  %v261_v13 = vunpack.c.l.b16 %v140_v10 }
  0x9d   :  { %v120_v14 = vpop.f32.mrf.mxu0 }
  0x9e   :  { %v121_v15 = vadd.f32 %v1717_v5, %v120_v14  ;;  %265 = vrot.lane.b32.xlu1 %v1970_v12, %s1808_s2  ;;  %147 = vrot.lane.b32.xlu0 %v1970_v12, %s1809_s0  ;;  %v262_v16 = vpack.c.b16 %v261_v13, %v261_v13 }
  0xa0   :  { %v124_v17 = vmul.f32 0.35355338, %v121_v15  ;;  %v143_v18 = vpack.c.bf16 %v121_v15, %v121_v15  ;;  %263 = vrot.lane.b32.xlu2 %v262_v16, %s1810_s7 }
  0xa2   :  { %v141_v19 = vpack.c.bf16 %v124_v17, %v124_v17  ;;  %v170_v20 = vunpack.c.l.b16 %v143_v18 }
  0xa4   :  { %v1977_v21 = vpack.c.b16 %v170_v20, %v170_v20  ;;  %v287_v22 = vunpack.c.l.b16 %v141_v19 }
  0xa6   :  { %291 = vrot.lane.b32.xlu1 %v1977_v21, %s1808_s2  ;;  %172 = vrot.lane.b32.xlu0 %v1977_v21, %s1809_s0  ;;  %v288_v23 = vpack.c.b16 %v287_v22, %v287_v22 }
  0xa8   :  { %289 = vrot.lane.b32.xlu2 %v288_v23, %s1810_s7 }
  0xae   :  { %403 = vrot.lane.b32.xlu1 %v1977_v21, %s1811_s26  ;;  %380 = vrot.lane.b32.xlu0 %v1970_v12, %s1811_s26 }
  0xb0   :  { %378 = vrot.lane.b32.xlu2 %v262_v16, %s1812_s27 }
  0xb6   :  { %492 = vrot.lane.b32.xlu1 %v1970_v12, %s1813_s28  ;;  %401 = vrot.lane.b32.xlu0 %v288_v23, %s1812_s27 }
  0xb8   :  { %515 = vrot.lane.b32.xlu2 %v1977_v21, %s1813_s28 }
  0xbe   :  { %513 = vrot.lane.b32.xlu1 %v288_v23, %s1814_s6  ;;  %490 = vrot.lane.b32.xlu0 %v262_v16, %s1814_s6 }
  0xfa   :  { %v264_v24 = vpop.permute.xlu2 %263 }
 0x102   :  { %v290_v29 = vpop.permute.xlu2 %289 }
 0x10a   :  { %v379_v34 = vpop.permute.xlu2 %378 }
 0x110   :  { %v266_v25 = vpop.permute.xlu1 %265  ;;  %v148_v26 = vpop.permute.xlu0 %147 }
 0x111   :  { %v154_v27 = vsel %vm149_vm1, %v148_v26, 0  ;;  %v271_v28 = vsel %vm149_vm1, %v266_v25, 0 }
 0x112   :  { %163 = vmatpush.bf16.xpose.msra.mxu1 %v154_v27  ;;  %280 = vmatpush.bf16.xpose.msrb.mxu0 %v271_v28  ;;  %v516_v39 = vpop.permute.xlu2 %515 }
 0x113   :  { %v521_v41 = vsel %vm149_vm1, %v516_v39, 0 }
 0x118   :  { %v292_v30 = vpop.permute.xlu1 %291  ;;  %v173_v31 = vpop.permute.xlu0 %172 }
 0x119   :  { %1561 = vmatmul.msk.bf16.vlgmr.msra.gmra.mxu1 %vm149_vm1, %v140_v10  ;;  %1565 = vmatmul.msk.bf16.vlgmr.msrb.gmra.mxu0 %vm149_vm1, %v264_v24  ;;  %v178_v32 = vsel %vm149_vm1, %v173_v31, 0  ;;  %v297_v33 = vsel %vm149_vm1, %v292_v30, 0 }
 0x11a   :  { %187 = vmatpush.bf16.xpose.msra.mxu2 %v178_v32  ;;  %306 = vmatpush.bf16.xpose.msrb.mxu1 %v297_v33 }
 0x120   :  { %v404_v35 = vpop.permute.xlu1 %403  ;;  %v381_v36 = vpop.permute.xlu0 %380 }
 0x121   :  { %v409_v37 = vsel %vm149_vm1, %v404_v35, 0  ;;  %v386_v38 = vsel %vm149_vm1, %v381_v36, 0  ;;  %1562 = vmatmul.msk.bf16.vlgmr.msra.gmra.mxu2 %vm149_vm1, %v141_v19 }
 0x122   :  { %395 = vmatpush.bf16.xpose.msra.mxu0 %v386_v38  ;;  %418 = vmatpush.bf16.xpose.msra.mxu1 %v409_v37 }
 0x128   :  { %v493_v40 = vpop.permute.xlu1 %492  ;;  %v402_v43 = vpop.permute.xlu0 %401 }
 0x129   :  { %v498_v42 = vsel %vm149_vm1, %v493_v40, 0  ;;  %1566 = vmatmul.msk.bf16.vlgmr.msrb.gmra.mxu1 %vm149_vm1, %v290_v29  ;;  %1569 = vmatmul.msk.bf16.vlgmr.msra.gmra.mxu0 %vm149_vm1, %v379_v34 }
 0x12a   :  { %530 = vmatpush.bf16.xpose.msrb.mxu1 %v521_v41  ;;  %507 = vmatpush.bf16.xpose.msrb.mxu0 %v498_v42 }
 0x130   :  { %v491_v44 = vpop.permute.xlu0 %490  ;;  %v514_v45 = vpop.permute.xlu1 %513 }
 0x139   :  { %1570 = vmatmul.msk.bf16.vlgmr.msra.gmra.mxu1 %vm149_vm1, %v402_v43  ;;  %1573 = vmatmul.msk.bf16.vlgmr.msrb.gmra.mxu0 %vm149_vm1, %v491_v44 }
 0x149   :  { %1574 = vmatmul.msk.bf16.vlgmr.msrb.gmra.mxu1 %vm149_vm1, %v514_v45 }
 0x196   :  { %v165_v50 = vpop.f32.mrf.mxu1  ;;  %v282_v51 = vpop.f32.mrf.mxu0 }
 0x197   :  { %v166_v52 = vadd.f32 %v165_v50, %v133_v49  ;;  %v283_v53 = vadd.f32 %v282_v51, %v133_v49 }
 0x199   :  { %v312_v54 = vsel %vm149_vm1, %v283_v53, -inf  ;;  %v193_v55 = vsel %vm149_vm1, %v166_v52, -inf }
 0x19a   :  { %313 = vmax.xlane.f32.xlu1 %v312_v54  ;;  %194 = vmax.xlane.f32.xlu2 %v193_v55 }
 0x19e   :  { %v167_v58 = vpop.f32.mrf.mxu1  ;;  %v284_v59 = vpop.f32.mrf.mxu0 }
 0x1a4   :  { %v189_v61 = vpop.f32.mrf.mxu2 }
 0x1a5   :  { %v190_v62 = vadd.f32 %v189_v61, %v134_v60 }
 0x1a6   :  { %v308_v63 = vpop.f32.mrf.mxu1  ;;  %v397_v0 = vpop.f32.mrf.mxu0 }
 0x1a7   :  { %v309_v1 = vadd.f32 %v308_v63, %v134_v60  ;;  %v2020_v4 = vadd.f32 %v397_v0, %v133_v49  ;;  %v196_v5 = vsel %vm149_vm1, %v190_v62, -inf }
 0x1a8   :  { %197 = vmax.xlane.f32.xlu0 %v196_v5 }
 0x1a9   :  { %v315_v6 = vsel %vm149_vm1, %v309_v1, -inf  ;;  %v424_v23 = vsel %vm149_vm1, %v2020_v4, -inf }
 0x1aa   :  { %316 = vmax.xlane.f32.xlu2 %v315_v6 }
 0x1ac   :  { %v191_v7 = vpop.f32.mrf.mxu2 }
 0x1ae   :  { %v310_v8 = vpop.f32.mrf.mxu1  ;;  %v399_v9 = vpop.f32.mrf.mxu0 }
 0x1b3   :  { %239 = vrot.lane.b32.xlu1 %v1977_v21, %s1815_s25 }
 0x1b6   :  { %v420_v10 = vpop.f32.mrf.mxu1  ;;  %v509_v11 = vpop.f32.mrf.mxu0 }
 0x1b7   :  { %v421_v18 = vadd.f32 %v420_v10, %v134_v60  ;;  %v510_v22 = vadd.f32 %v509_v11, %v133_v49 }
 0x1b9   :  { %v427_v20 = vsel %vm149_vm1, %v421_v18, -inf  ;;  %v536_v24 = vsel %vm149_vm1, %v510_v22, -inf }
 0x1bb   :  { %357 = vrot.lane.b32.xlu1 %v1977_v21, %s1816_s9 }
 0x1bc   :  { %336 = vrot.lane.b32.xlu0 %v1970_v12, %s1816_s9  ;;  %s2376_s9 = sld [smem:[#allocation8_spill]] }
 0x1be   :  { %v422_v13 = vpop.f32.mrf.mxu1  ;;  %v511_v14 = vpop.f32.mrf.mxu0 }
 0x1c2   :  { %217 = vrot.lane.b32.xlu2 %v1970_v12, %s1815_s25 }
 0x1c6   :  { %v532_v15 = vpop.f32.mrf.mxu1 }
 0x1c7   :  { %v533_v17 = vadd.f32 %v532_v15, %v134_v60 }
 0x1c9   :  { %v539_v19 = vsel %vm149_vm1, %v533_v17, -inf }
 0x1ce   :  { %v534_v16 = vpop.f32.mrf.mxu1 }
 0x1e5   :  { %540 = vmax.xlane.f32.xlu1 %v539_v19 }
 0x1e6   :  { %428 = vmax.xlane.f32.xlu0 %v427_v20 }
 0x1eb   :  { %425 = vmax.xlane.f32.xlu2 %v424_v23 }
 0x1ee   :  { %537 = vmax.xlane.f32.xlu0 %v536_v24 }
 0x20d   :  { %v314_v25 = vpop.xlane.xlu1 %313  ;;  %v195_v26 = vpop.xlane.xlu2 %194 }
 0x20e   :  { %v318_v27 = vsub.f32 %v283_v53, %v314_v25  ;;  %v199_v28 = vsub.f32 %v166_v52, %v195_v26 }
 0x210   :  { %v320_v29 = vmul.f32 1.442695, %v318_v27  ;;  %v201_v30 = vmul.f32 1.442695, %v199_v28 }
 0x212   :  { %1730 = vpow2.f32 %v320_v29 }
 0x213   :  { %1732 = vpow2.f32 %v201_v30 }
 0x218   :  { %v2033_v31 = vpop.eup %1730 }
 0x219   :  { %v2035_v32 = vpop.eup %1732  ;;  %v324_v33 = vsel %vm149_vm1, %v2033_v31, 0.0 }
 0x21a   :  { %325 = vadd.xlane.f32.xlu0 %v324_v33  ;;  %v205_v34 = vsel %vm149_vm1, %v2035_v32, 0.0 }
 0x21b   :  { %206 = vadd.xlane.f32.xlu1 %v205_v34  ;;  %v198_v35 = vpop.xlane.xlu0 %197 }
 0x21c   :  { %v200_v36 = vsub.f32 %v190_v62, %v198_v35 }
 0x21d   :  { %v317_v37 = vpop.xlane.xlu2 %316 }
 0x21e   :  { %v203_v38 = vmul.f32 1.442695, %v200_v36  ;;  %v319_v39 = vsub.f32 %v309_v1, %v317_v37 }
 0x220   :  { %1734 = vpow2.f32 %v203_v38  ;;  %v322_v40 = vmul.f32 1.442695, %v319_v39 }
 0x222   :  { %1736 = vpow2.f32 %v322_v40 }
 0x225   :  { %v240_v41 = vpop.permute.xlu1 %239  ;;  %v218_v42 = vpop.permute.xlu2 %217 }
 0x226   :  { %v2041_v43 = vpop.eup %1734  ;;  %v224_v44 = vsel %vm222_vm2, %v218_v42, 0  ;;  %v245_v45 = vsel %vm222_vm2, %v240_v41, 0 }
 0x227   :  { %233 = vmatpush.bf16.msra.mxu3 %v224_v44  ;;  %v208_v46 = vsel %vm149_vm1, %v2041_v43, 0.0 }
 0x228   :  { %v2047_v47 = vpop.eup %1736  ;;  %209 = vadd.xlane.f32.xlu0 %v208_v46 }
 0x229   :  { %v327_v48 = vsel %vm149_vm1, %v2047_v47, 0.0 }
 0x22a   :  { %328 = vadd.xlane.f32.xlu2 %v327_v48 }
 0x22b   :  { %254 = vmatpush.bf16.msrb.mxu3 %v245_v45 }
 0x22d   :  { %v358_v51 = vpop.permute.xlu1 %357 }
 0x22e   :  { %v337_v49 = vpop.permute.xlu0 %336  ;;  %v363_v19 = vsel %vm222_vm2, %v358_v51, 0 }
 0x22f   :  { %v342_v50 = vsel %vm222_vm2, %v337_v49, 0 }
 0x230   :  { %351 = vmatpush.bf16.msrb.mxu2 %v342_v50 }
 0x234   :  { %469 = vrot.lane.b32.xlu1 %v1977_v21, %s1817_s5 }
 0x242   :  { %448 = vrot.lane.b32.xlu2 %v1970_v12, %s1817_s5 }
 0x258   :  { %v541_v52 = vpop.xlane.xlu1 %540 }
 0x259   :  { %v543_v53 = vsub.f32 %v533_v17, %v541_v52  ;;  %v429_v54 = vpop.xlane.xlu0 %428 }
 0x25a   :  { %v431_v55 = vsub.f32 %v421_v18, %v429_v54 }
 0x25b   :  { %v546_v57 = vmul.f32 1.442695, %v543_v53 }
 0x25c   :  { %v434_v56 = vmul.f32 1.442695, %v431_v55 }
 0x25e   :  { %1738 = vpow2.f32 %v434_v56  ;;  %v426_v58 = vpop.xlane.xlu2 %425 }
 0x25f   :  { %v430_v59 = vsub.f32 %v2020_v4, %v426_v58  ;;  %1740 = vpow2.f32 %v546_v57 }
 0x261   :  { %v432_v60 = vmul.f32 1.442695, %v430_v59  ;;  %v538_v61 = vpop.xlane.xlu0 %537 }
 0x262   :  { %v542_v62 = vsub.f32 %v510_v22, %v538_v61 }
 0x263   :  { %1742 = vpow2.f32 %v432_v60 }
 0x264   :  { %v1739_v63 = vpop.eup %1738  ;;  %v544_v0 = vmul.f32 1.442695, %v542_v62 }
 0x265   :  { %v439_v1 = vsel %vm149_vm1, %v1739_v63, 0.0  ;;  %v2056_v5 = vpop.eup %1740 }
 0x266   :  { %1744 = vpow2.f32 %v544_v0  ;;  %440 = vadd.xlane.f32.xlu0 %v439_v1  ;;  %v551_v7 = vsel %vm149_vm1, %v2056_v5, 0.0 }
 0x269   :  { %v1743_v6 = vpop.eup %1742 }
 0x26a   :  { %v436_v8 = vsel %vm149_vm1, %v1743_v6, 0.0 }
 0x26b   :  { %552 = vadd.xlane.f32.xlu2 %v551_v7  ;;  %437 = vadd.xlane.f32.xlu1 %v436_v8 }
 0x26c   :  { %v1745_v4 = vpop.eup %1744 }
 0x26d   :  { %v548_v9 = vsel %vm149_vm1, %v1745_v4, 0.0 }
 0x26e   :  { %549 = vadd.xlane.f32.xlu0 %v548_v9  ;;  %v1658_v9 = vld [vmem:[%s2376_s9] sm:$0xff] }
 0x282   :  { %560 = vrot.lane.b32.xlu0 %v1970_v12, %s1818_s29 }
 0x284   :  { %581 = vrot.lane.b32.xlu1 %v1977_v21, %s1818_s29  ;;  %s2379_s29 = sld [smem:[#allocation10_spill]] }
 0x28d   :  { %v326_v10 = vpop.xlane.xlu0 %325 }
 0x28e   :  { %1746 = vrcp.f32 %v326_v10  ;;  %v207_v11 = vpop.xlane.xlu1 %206 }
 0x28f   :  { %1748 = vrcp.f32 %v207_v11 }
 0x294   :  { %v1747_v13 = vpop.eup %1746 }
 0x295   :  { %v1749_v14 = vpop.eup %1748  ;;  %v332_v15 = vmul.f32 %v1747_v13, %v2033_v31 }
 0x296   :  { %v213_v16 = vmul.f32 %v1749_v14, %v2035_v32 }
 0x297   :  { %v334_v17 = vpack.c.bf16 %v332_v15, %v332_v15 }
 0x298   :  { %v215_v18 = vpack.c.bf16 %v213_v16, %v213_v16 }
 0x299   :  { %1567 = vmatmul.msk.bf16.vlgmr.msrb.gmra.mxu2 %vm149_vm1, %v334_v17 }
 0x29a   :  { %1563 = vmatmul.msk.bf16.vlgmr.msra.gmra.mxu3 %vm149_vm1, %v215_v18 }
 0x29b   :  { %372 = vmatpush.bf16.msra.mxu3 %v363_v19  ;;  %v210_v12 = vpop.xlane.xlu0 %209 }
 0x29c   :  { %1750 = vrcp.f32 %v210_v12 }
 0x29d   :  { %v329_v21 = vpop.xlane.xlu2 %328 }
 0x29e   :  { %1752 = vrcp.f32 %v329_v21 }
 0x2a2   :  { %v1751_v20 = vpop.eup %1750 }
 0x2a3   :  { %v214_v22 = vmul.f32 %v1751_v20, %v2041_v43 }
 0x2a4   :  { %v1753_v28 = vpop.eup %1752 }
 0x2a5   :  { %v449_v23 = vpop.permute.xlu2 %448  ;;  %v216_v26 = vpack.c.bf16 %v214_v22, %v214_v22  ;;  %v333_v29 = vmul.f32 %v1753_v28, %v2047_v47 }
 0x2a6   :  { %v454_v24 = vsel %vm222_vm2, %v449_v23, 0  ;;  %v470_v25 = vpop.permute.xlu1 %469 }
 0x2a7   :  { %463 = vmatpush.bf16.msra.mxu2 %v454_v24  ;;  %v475_v27 = vsel %vm222_vm2, %v470_v25, 0  ;;  %v335_v30 = vpack.c.bf16 %v333_v29, %v333_v29 }
 0x2aa   :  { %1564 = vmatmul.msk.bf16.vlgmr.msrb.gmra.mxu3 %vm149_vm1, %v216_v26 }
 0x2ab   :  { %484 = vmatpush.bf16.msrb.mxu3 %v475_v27 }
 0x2ba   :  { %1568 = vmatmul.msk.bf16.vlgmr.msra.gmra.mxu3 %vm149_vm1, %v335_v30 }
 0x2d9   :  { %v441_v31 = vpop.xlane.xlu0 %440 }
 0x2da   :  { %1754 = vrcp.f32 %v441_v31 }
 0x2de   :  { %v438_v32 = vpop.xlane.xlu1 %437  ;;  %v553_v40 = vpop.xlane.xlu2 %552 }
 0x2df   :  { %1756 = vrcp.f32 %v438_v32 }
 0x2e0   :  { %v1755_v33 = vpop.eup %1754 }
 0x2e1   :  { %v445_v34 = vmul.f32 %v1755_v33, %v1739_v63  ;;  %v550_v39 = vpop.xlane.xlu0 %549 }
 0x2e2   :  { %1758 = vrcp.f32 %v550_v39 }
 0x2e3   :  { %v447_v35 = vpack.c.bf16 %v445_v34, %v445_v34  ;;  %1760 = vrcp.f32 %v553_v40  ;;  %v81_v40 = vld [vmem:[%s2341_s1 + $0x8] sm:$0xff] }
 0x2e5   :  { %v1757_v36 = vpop.eup %1756  ;;  %1572 = vmatmul.msk.bf16.vlgmr.msrb.gmra.mxu3 %vm149_vm1, %v447_v35  ;;  %v1822_v35 = vmov 32.0  }
 0x2e6   :  { %v444_v37 = vmul.f32 %v1757_v36, %v1743_v6  ;;  %1762 = vrcp.f32 %v1822_v35 }
 0x2e8   :  { %v446_v38 = vpack.c.bf16 %v444_v37, %v444_v37  ;;  %v1759_v41 = vpop.eup %1758 }
 0x2e9   :  { %v1761_v42 = vpop.eup %1760  ;;  %v556_v43 = vmul.f32 %v1759_v41, %v1745_v4  ;;  %v1659_v4 = vld [vmem:[%s2376_s9 + $0x8] sm:$0xff]  ;;  %s2377_s9 = sld [smem:[#allocation7_spill]] }
 0x2ea   :  { %1571 = vmatmul.msk.bf16.vlgmr.msra.gmra.mxu2 %vm149_vm1, %v446_v38  ;;  %v557_v45 = vmul.f32 %v1761_v42, %v2056_v5  ;;  %659 = vmatpush.bf16.msra.mxu0 %v1659_v4  ;;  %v1663_v38 = vld [vmem:[%s2340_s12 + $0x8] sm:$0xff] }
 0x2eb   :  { %v558_v49 = vpack.c.bf16 %v556_v43, %v556_v43 }
 0x2ec   :  { %v559_v50 = vpack.c.bf16 %v557_v45, %v557_v45  ;;  %v1763_v36 = vpop.eup %1762 }
 0x2ed   :  { %v678_v37 = vmul.f32 32.0, %v1763_v36  ;;  %vm682_vm5 = vweird.f32 %v1763_v36 }
 0x2ee   :  { %660 = vmatpush.bf16.msra.mxu0 %v1658_v9 }
 0x2ef   :  { %v1718_v26 = vld [vmem:[%s2377_s9] ss:$0 sm:$0xff]  ;;  %v679_v39 = vsub.f32 1.0, %v678_v37 }
 0x2f1   :  { %v680_v42 = vmul.f32 %v1763_v36, %v679_v39 }
 0x2f3   :  { %v681_v43 = vadd.f32 %v1763_v36, %v680_v42 }
 0x2f4   :  { %v561_v44 = vpop.permute.xlu0 %560 }
 0x2f5   :  { %v566_v46 = vsel %vm222_vm2, %v561_v44, 0  ;;  %v2118_v44 = vsel %vm682_vm5, %v1763_v36, %v681_v43 }
 0x2f6   :  { %v582_v47 = vpop.permute.xlu1 %581  ;;  %575 = vmatpush.bf16.msrb.mxu2 %v566_v46 }
 0x2f7   :  { %v587_v48 = vsel %vm222_vm2, %v582_v47, 0  ;;  %v82_v47 = vld [vmem:[%s2341_s1 + $0x10] sm:$0xff] }
 0x2f8   :  { %596 = vmatpush.bf16.msra.mxu3 %v587_v48  ;;  %v83_v48 = vld [vmem:[%s2341_s1 + $0x18] sm:$0xff] }
 0x2fa   :  { %1575 = vmatmul.msk.bf16.vlgmr.msrb.gmra.mxu2 %vm149_vm1, %v558_v49 }
 0x2fb   :  { %1576 = vmatmul.msk.bf16.vlgmr.msra.gmra.mxu3 %vm149_vm1, %v559_v50  ;;  %806 = vmatpush.bf16.msra.mxu2 %v1663_v38 }
 0x31c   :  { %v353_v51 = vpop.f32.mrf.mxu2 }
 0x31d   :  { %v235_v52 = vpop.f32.mrf.mxu3 }
 0x324   :  { %v355_v53 = vpop.f32.mrf.mxu2 }
 0x325   :  { %v237_v54 = vpop.f32.mrf.mxu3 }
 0x32d   :  { %v256_v55 = vpop.f32.mrf.mxu3 }
 0x335   :  { %v258_v56 = vpop.f32.mrf.mxu3 }
 0x33d   :  { %v374_v57 = vpop.f32.mrf.mxu3 }
 0x33e   :  { %v1687_v58 = vpack.i.bf16 %v374_v57, %v353_v51  ;;  %v773_v51 = vpack.c.bf16 %v83_v48, %v82_v47 }
 0x340   :  { %1688 = vrot.lane.b32.xlu0 %v1687_v58, %s2361_s3 }
 0x345   :  { %v376_v59 = vpop.f32.mrf.mxu3 }
 0x346   :  { %v1661_v59 = vld [vmem:[%s2344_s10 + $0x8] sm:$0xff] }
 0x347   :  { %762 = vmatpush.bf16.msra.mxu1 %v1661_v59 }
 0x368   :  { %v486_v60 = vpop.f32.mrf.mxu3 }
 0x36d   :  { %v465_v61 = vpop.f32.mrf.mxu2 }
 0x36e   :  { %v1692_v62 = vpack.i.bf16 %v486_v60, %v465_v61 }
 0x370   :  { %v488_v63 = vpop.f32.mrf.mxu3  ;;  %1693 = vrot.lane.b32.xlu1 %v1692_v62, %s2360_s8  ;;  %v1660_v62 = vld [vmem:[%s2344_s10] sm:$0xff] }
 0x371   :  { %763 = vmatpush.bf16.msra.mxu1 %v1660_v62 }
 0x375   :  { %v467_v0 = vpop.f32.mrf.mxu2 }
 0x37d   :  { %v577_v1 = vpop.f32.mrf.mxu2 }
 0x37e   :  { %v598_v5 = vpop.f32.mrf.mxu3 }
 0x37f   :  { %v1697_v6 = vpack.i.bf16 %v598_v5, %v577_v1  ;;  %v1721_v1 = vld [vmem:[%s2342_s13] ss:$0 sm:$0xff] }
 0x381   :  { %1698 = vrot.lane.b32.xlu0 %v1697_v6, %s2359_s30 }
 0x385   :  { %v579_v7 = vpop.f32.mrf.mxu2 }
 0x386   :  { %v600_v8 = vpop.f32.mrf.mxu3 }
 0x3b2   :  { %v1689_v10 = vpop.permute.xlu0 %1688 }
 0x3b3   :  { %v1691_v13 = vunpack.i.h.bf16 %v1689_v10  ;;  %v1690_v14 = vunpack.i.l.bf16 %v1689_v10 }
 0x3b5   :  { %v627_v18 = vsel %vm149_vm1, %v256_v55, %v1691_v13  ;;  %v626_v19 = vsel %vm149_vm1, %v235_v52, %v1690_v14 }
 0x3e2   :  { %v1694_v11 = vpop.permute.xlu1 %1693 }
 0x3e3   :  { %v1696_v15 = vunpack.i.h.bf16 %v1694_v11  ;;  %v1695_v16 = vunpack.i.l.bf16 %v1694_v11 }
 0x3e5   :  { %v630_v20 = vsel %vm628_vm3, %v627_v18, %v1696_v15  ;;  %v629_v22 = vsel %vm628_vm3, %v626_v19, %v1695_v16 }
 0x3f3   :  { %v1699_v17 = vpop.permute.xlu0 %1698 }
 0x3f4   :  { %v1701_v12 = vunpack.i.h.bf16 %v1699_v17  ;;  %v1700_v21 = vunpack.i.l.bf16 %v1699_v17 }
 0x3f6   :  { %v633_v23 = vsel %vm631_vm4, %v630_v20, %v1701_v12  ;;  %v632_v24 = vsel %vm631_vm4, %v629_v22, %v1700_v21 }
 0x3f7   :  { %v634_v25 = vpack.c.bf16 %v633_v23, %v632_v24 }
 0x3f9   :  { %1585 = vmatmul.msk.bf16.vlgmr.msra.gmra.mxu0 %vm105_vm0, %v634_v25 }
 0x476   :  { %v662_v27 = vpop.f32.mrf.mxu0 }
 0x477   :  { %v663_v28 = vadd.f32 %v1718_v26, %v662_v27 }
 0x479   :  { %v667_v29 = vadd.f32 %v663_v28, %v1957_v2  ;;  %v1662_v2 = vld [vmem:[%s2340_s12] sm:$0xff]  ;;  %s2378_s12 = sld [smem:[#allocation9_spill]] }
 0x47a   :  { %807 = vmatpush.bf16.msra.mxu2 %v1662_v2 }
 0x47b   :  { %v671_v30 = vsel %vm105_vm0, %v667_v29, 0.0 }
 0x47c   :  { %672 = vadd.xlane.f32.xlu1 %v671_v30 }
 0x47e   :  { %v664_v31 = vpop.f32.mrf.mxu0 }
 0x47f   :  { %v665_v32 = vadd.f32 %v1718_v26, %v664_v31 }
 0x481   :  { %v668_v33 = vadd.f32 %v665_v32, %v1962_v3  ;;  %v80_v3 = vld [vmem:[%s2341_s1] sm:$0xff] }
 0x482   :  { %v772_v41 = vpack.c.bf16 %v81_v40, %v80_v3 }
 0x483   :  { %v674_v34 = vsel %vm105_vm0, %v668_v33, 0.0 }
 0x484   :  { %675 = vadd.xlane.f32.xlu2 %v674_v34  ;;  %1603 = vmatmul.msk.bf16.vlgmr.msra.gmra.mxu2 %vm105_vm0, %v772_v41  ;;  %v1720_v34 = vld [vmem:[%s2379_s29] ss:$0 sm:$0xff] }
 0x494   :  { %1604 = vmatmul.msk.bf16.gmra.mxu2 %vm105_vm0, %v773_v51 }
 0x4ef   :  { %v673_v45 = vpop.xlane.xlu1 %672 }
 0x4f0   :  { %v684_v46 = vmul.f32 %v2118_v44, %v673_v45 }
 0x4f2   :  { %v686_v49 = vsub.f32 %v667_v29, %v684_v46  ;;  %v1719_v29 = vld [vmem:[%s2378_s12] ss:$0 sm:$0xff] }
 0x4f4   :  { %v688_v50 = vmul.f32 %v686_v49, %v686_v49 }
 0x4f6   :  { %v690_v52 = vsel %vm105_vm0, %v688_v50, 0.0  ;;  %v1722_v50 = vld [vmem:[%s2343_s11] ss:$0 sm:$0xff]  ;;  %s2380_s11 = smov 8  }
 0x4f7   :  { %v676_v53 = vpop.xlane.xlu2 %675  ;;  %691 = vadd.xlane.f32.xlu0 %v690_v52 }
 0x4f8   :  { %v685_v54 = vmul.f32 %v2118_v44, %v676_v53 }
 0x4fa   :  { %v687_v55 = vsub.f32 %v668_v33, %v685_v54 }
 0x4fc   :  { %v689_v56 = vmul.f32 %v687_v55, %v687_v55 }
 0x4fe   :  { %v693_v57 = vsel %vm105_vm0, %v689_v56, 0.0 }
 0x4ff   :  { %694 = vadd.xlane.f32.xlu2 %v693_v57 }
 0x507   :  { %v809_v63 = vpop.f32.mrf.mxu2 }
 0x508   :  { %v810_v6 = vadd.f32 %v1721_v1, %v809_v63 }
 0x50a   :  { %v826_v10 = vpack.c.bf16 %v810_v6, %v810_v6 }
 0x50c   :  { %v832_v16 = vunpack.c.l.b16 %v826_v10 }
 0x50f   :  { %v811_v11 = vpop.f32.mrf.mxu2 }
 0x510   :  { %v812_v14 = vadd.f32 %v1721_v1, %v811_v11 }
 0x512   :  { %v827_v17 = vpack.c.bf16 %v812_v14, %v812_v14 }
 0x514   :  { %v833_v21 = vunpack.c.l.b16 %v827_v17 }
 0x516   :  { %v2142_v22 = vpack.c.b16 %v833_v21, %v832_v16 }
 0x517   :  { %v814_v23 = vpop.f32.mrf.mxu2 }
 0x518   :  { %945 = vrot.lane.b32.xlu1 %v2142_v22, %s1810_s7  ;;  %902 = vrot.lane.b32.xlu2 %v2142_v22, %s1809_s0  ;;  %v839_v26 = vsel %vm149_vm1, %v2142_v22, 0  ;;  %v815_v28 = vadd.f32 %v1721_v1, %v814_v23 }
 0x519   :  { %848 = vmatpush.bf16.xpose.msrb.mxu3 %v839_v26 }
 0x51a   :  { %v828_v33 = vpack.c.bf16 %v815_v28, %v815_v28 }
 0x51c   :  { %v856_v2 = vunpack.c.l.b16 %v828_v33 }
 0x51f   :  { %v816_v37 = vpop.f32.mrf.mxu2 }
 0x520   :  { %v817_v38 = vadd.f32 %v1721_v1, %v816_v37 }
 0x522   :  { %v829_v3 = vpack.c.bf16 %v817_v38, %v817_v38 }
 0x524   :  { %v857_v42 = vunpack.c.l.b16 %v829_v3 }
 0x526   :  { %v2162_v45 = vpack.c.b16 %v857_v42, %v856_v2 }
 0x528   :  { %971 = vrot.lane.b32.xlu0 %v2162_v45, %s1810_s7  ;;  %v863_v46 = vsel %vm149_vm1, %v2162_v45, 0 }
 0x529   :  { %872 = vmatpush.bf16.xpose.msrb.mxu0 %v863_v46 }
 0x530   :  { %1056 = vrot.lane.b32.xlu0 %v2142_v22, %s1812_s27 }
 0x56a   :  { %v692_v58 = vpop.xlane.xlu0 %691 }
 0x56b   :  { %v696_v60 = vmul.f32 %v692_v58, %v2118_v44 }
 0x56d   :  { %v698_v61 = vadd.f32 1e-05, %v696_v60 }
 0x56f   :  { %1764 = vrsqrt.f32 %v698_v61  ;;  %vm706_vm7 = vweird.f32 %v698_v61 }
 0x572   :  { %v695_v0 = vpop.xlane.xlu2 %694 }
 0x573   :  { %v697_v5 = vmul.f32 %v695_v0, %v2118_v44 }
 0x575   :  { %v1765_v7 = vpop.eup %1764  ;;  %v699_v8 = vadd.f32 1e-05, %v697_v5 }
 0x576   :  { %v701_v4 = vmul.f32 %v1765_v7, %v698_v61  ;;  %vm707_vm6 = vweird.f32 %v1765_v7 }
 0x577   :  { %1766 = vrsqrt.f32 %v699_v8  ;;  %vm708_vm8 = vmor %vm706_vm7, %vm707_vm6  ;;  %vm716_vm10 = vweird.f32 %v699_v8 }
 0x578   :  { %v702_v9 = vmul.f32 %v1765_v7, %v701_v4 }
 0x57a   :  { %v703_v13 = vmul.f32 0.5, %v702_v9  ;;  %v903_v47 = vpop.permute.xlu2 %902 }
 0x57b   :  { %915 = vmatpush.bf16.msrb.mxu1 %v903_v47 }
 0x57c   :  { %v704_v15 = vsub.f32 1.5, %v703_v13 }
 0x57d   :  { %v1767_v18 = vpop.eup %1766 }
 0x57e   :  { %v705_v19 = vmul.f32 %v1765_v7, %v704_v15  ;;  %v711_v12 = vmul.f32 %v1767_v18, %v699_v8  ;;  %vm717_vm9 = vweird.f32 %v1767_v18 }
 0x57f   :  { %vm718_vm11 = vmor %vm716_vm10, %vm717_vm9 }
 0x580   :  { %v712_v20 = vmul.f32 %v1767_v18, %v711_v12  ;;  %v709_v24 = vsel %vm708_vm8, %v1765_v7, %v705_v19 }
 0x581   :  { %v720_v30 = vmul.f32 %v709_v24, %v686_v49 }
 0x582   :  { %v713_v25 = vmul.f32 0.5, %v712_v20 }
 0x583   :  { %v725_v35 = vmul.f32 %v1719_v29, %v720_v30 }
 0x584   :  { %v714_v27 = vsub.f32 1.5, %v713_v25 }
 0x585   :  { %v2156_v40 = vadd.f32 %v1720_v34, %v725_v35 }
 0x586   :  { %v715_v31 = vmul.f32 %v1767_v18, %v714_v27 }
 0x588   :  { %v719_v32 = vsel %vm718_vm11, %v1767_v18, %v715_v31 }
 0x589   :  { %v721_v36 = vmul.f32 %v719_v32, %v687_v55 }
 0x58a   :  { %v946_v54 = vpop.permute.xlu1 %945 }
 0x58b   :  { %v726_v39 = vmul.f32 %v1719_v29, %v721_v36  ;;  %v951_v55 = vsel %vm149_vm1, %v946_v54, 0 }
 0x58c   :  { %960 = vmatpush.bf16.xpose.msra.mxu0 %v951_v55 }
 0x58d   :  { %v2158_v41 = vadd.f32 %v1720_v34, %v726_v39 }
 0x58f   :  { %v732_v43 = vpack.c.bf16 %v2158_v41, %v2156_v40 }
 0x591   :  { %1594 = vmatmul.msk.bf16.vlgmr.msra.gmra.mxu1 %vm105_vm0, %v732_v43 }
 0x59a   :  { %v972_v48 = vpop.permute.xlu0 %971 }
 0x59b   :  { %v977_v49 = vsel %vm149_vm1, %v972_v48, 0 }
 0x59c   :  { %986 = vmatpush.bf16.xpose.msra.mxu1 %v977_v49 }
 0x5a2   :  { %v1057_v59 = vpop.permute.xlu0 %1056 }
 0x5a3   :  { %v1062_v62 = vsel %vm149_vm1, %v1057_v59, 0 }
 0x60e   :  { %v765_v51 = vpop.f32.mrf.mxu1 }
 0x60f   :  { %v766_v52 = vadd.f32 %v1722_v50, %v765_v51 }
 0x611   :  { %v770_v53 = vmul.f32 0.35355338, %v766_v52 }
 0x613   :  { %v824_v56 = vpack.c.bf16 %v770_v53, %v770_v53 }
 0x615   :  { %1605 = vmatmul.msk.bf16.vlgmr.msrb.gmra.mxu3 %vm149_vm1, %v824_v56  ;;  %v941_v1 = vunpack.c.l.b16 %v824_v56 }
 0x616   :  { %v767_v57 = vpop.f32.mrf.mxu1 }
 0x617   :  { %v768_v58 = vadd.f32 %v1722_v50, %v767_v57  ;;  %v942_v5 = vpack.c.b16 %v941_v1, %v941_v1 }
 0x619   :  { %v771_v60 = vmul.f32 0.35355338, %v768_v58 }
 0x61b   :  { %v825_v61 = vpack.c.bf16 %v771_v60, %v771_v60 }
 0x61d   :  { %v967_v63 = vunpack.c.l.b16 %v825_v61  ;;  %1606 = vmatmul.msk.bf16.vlgmr.msrb.gmra.mxu0 %vm149_vm1, %v825_v61 }
 0x61e   :  { %1071 = vmatpush.bf16.xpose.msrb.mxu0 %v1062_v62 }
 0x61f   :  { %v968_v0 = vpack.c.b16 %v967_v63, %v967_v63 }
 0x621   :  { %1077 = vrot.lane.b32.xlu0 %v968_v0, %s1812_s27  ;;  %969 = vrot.lane.b32.xlu1 %v968_v0, %s1810_s7 }
 0x629   :  { %1162 = vrot.lane.b32.xlu0 %v942_v5, %s1814_s6  ;;  %1054 = vrot.lane.b32.xlu1 %v942_v5, %s1812_s27 }
 0x631   :  { %1187 = vrot.lane.b32.xlu1 %v2162_v45, %s1814_s6 }
 0x693   :  { %v970_v18 = vpop.permute.xlu1 %969  ;;  %v1078_v33 = vpop.permute.xlu0 %1077 }
 0x698   :  { %v850_v6 = vpop.f32.mrf.mxu3 }
 0x699   :  { %v878_v7 = vsel %vm628_vm3, %v850_v6, -inf }
 0x69a   :  { %v874_v8 = vpop.f32.mrf.mxu0  ;;  %879 = vmax.xlane.f32.xlu2 %v878_v7 }
 0x69b   :  { %v881_v4 = vsel %vm628_vm3, %v874_v8, -inf  ;;  %v1055_v19 = vpop.permute.xlu1 %1054  ;;  %v1163_v2 = vpop.permute.xlu0 %1162 }
 0x69c   :  { %882 = vmax.xlane.f32.xlu1 %v881_v4 }
 0x6a0   :  { %v852_v9 = vpop.f32.mrf.mxu3 }
 0x6a2   :  { %v876_v10 = vpop.f32.mrf.mxu0 }
 0x6a3   :  { %v1188_v12 = vpop.permute.xlu1 %1187 }
 0x6a4   :  { %v1193_v3 = vsel %vm149_vm1, %v1188_v12, 0 }
 0x6b2   :  { %943 = vrot.lane.b32.xlu2 %v942_v5, %s1810_s7 }
 0x70d   :  { %v880_v11 = vpop.xlane.xlu2 %879 }
 0x70e   :  { %v884_v13 = vsub.f32 %v850_v6, %v880_v11 }
 0x70f   :  { %v883_v21 = vpop.xlane.xlu1 %882 }
 0x710   :  { %v886_v14 = vmul.f32 1.442695, %v884_v13  ;;  %v885_v20 = vsub.f32 %v874_v8, %v883_v21 }
 0x712   :  { %1768 = vpow2.f32 %v886_v14  ;;  %v888_v24 = vmul.f32 1.442695, %v885_v20 }
 0x715   :  { %v944_v15 = vpop.permute.xlu2 %943 }
 0x716   :  { %1609 = vmatmul.msk.bf16.vlgmr.msra.gmra.mxu0 %vm149_vm1, %v944_v15 }
 0x718   :  { %v1769_v16 = vpop.eup %1768 }
 0x719   :  { %v890_v17 = vsel %vm628_vm3, %v1769_v16, 0.0 }
 0x71a   :  { %891 = vadd.xlane.f32.xlu2 %v890_v17 }
 0x726   :  { %1613 = vmatmul.msk.bf16.vlgmr.msrb.gmra.mxu0 %vm149_vm1, %v1055_v19 }
 0x732   :  { %1079 = vrot.lane.b32.xlu2 %v2162_v45, %s1812_s27 }
 0x73a   :  { %1164 = vrot.lane.b32.xlu2 %v2142_v22, %s1814_s6 }
 0x742   :  { %1185 = vrot.lane.b32.xlu2 %v968_v0, %s1814_s6 }
 0x78d   :  { %v892_v23 = vpop.xlane.xlu2 %891 }
 0x78e   :  { %1770 = vrcp.f32 %v892_v23 }
 0x78f   :  { %1772 = vpow2.f32 %v888_v24 }
 0x793   :  { %v962_v25 = vpop.f32.mrf.mxu0 }
 0x794   :  { %v1771_v26 = vpop.eup %1770  ;;  %v992_v27 = vsel %vm628_vm3, %v962_v25, -inf }
 0x795   :  { %v898_v28 = vmul.f32 %v1771_v26, %v1769_v16  ;;  %993 = vmax.xlane.f32.xlu0 %v992_v27  ;;  %v1080_v29 = vpop.permute.xlu2 %1079  ;;  %v2197_v31 = vpop.eup %1772 }
 0x796   :  { %v1085_v32 = vsel %vm149_vm1, %v1080_v29, 0  ;;  %v893_v35 = vsel %vm628_vm3, %v2197_v31, 0.0 }
 0x797   :  { %v900_v30 = vpack.c.bf16 %v898_v28, %v898_v28 }
 0x799   :  { %1607 = vmatmul.msk.bf16.vlgmr.msrb.gmra.mxu1 %vm628_vm3, %v900_v30 }
 0x79a   :  { %1094 = vmatpush.bf16.xpose.msrb.mxu1 %v1085_v32 }
 0x79b   :  { %v964_v34 = vpop.f32.mrf.mxu0 }
 0x79d   :  { %894 = vadd.xlane.f32.xlu0 %v893_v35  ;;  %v1165_v36 = vpop.permute.xlu2 %1164 }
 0x79e   :  { %v1170_v37 = vsel %vm149_vm1, %v1165_v36, 0 }
 0x79f   :  { %1179 = vmatpush.bf16.xpose.msra.mxu0 %v1170_v37 }
 0x7a3   :  { %v1073_v38 = vpop.f32.mrf.mxu0 }
 0x7a4   :  { %v1100_v39 = vsel %vm628_vm3, %v1073_v38, -inf }
 0x7a5   :  { %1101 = vmax.xlane.f32.xlu1 %v1100_v39  ;;  %v1186_v43 = vpop.permute.xlu2 %1185 }
 0x7a6   :  { %1617 = vmatmul.msk.bf16.vlgmr.msra.gmra.mxu0 %vm149_vm1, %v1163_v2 }
 0x7a9   :  { %1610 = vmatmul.msk.bf16.vlgmr.msra.gmra.mxu1 %vm149_vm1, %v970_v18 }
 0x7aa   :  { %1202 = vmatpush.bf16.xpose.msra.mxu1 %v1193_v3 }
 0x7ab   :  { %v1075_v42 = vpop.f32.mrf.mxu0 }
 0x7b9   :  { %1614 = vmatmul.msk.bf16.vlgmr.msrb.gmra.mxu1 %vm149_vm1, %v1078_v33 }
 0x7c9   :  { %1618 = vmatmul.msk.bf16.vlgmr.msra.gmra.mxu1 %vm149_vm1, %v1186_v43 }
 0x808   :  { %v994_v46 = vpop.xlane.xlu0 %993 }
 0x809   :  { %v998_v47 = vsub.f32 %v962_v25, %v994_v46 }
 0x80b   :  { %v1000_v48 = vmul.f32 1.442695, %v998_v47 }
 0x80d   :  { %1774 = vpow2.f32 %v1000_v48 }
 0x810   :  { %v895_v10 = vpop.xlane.xlu0 %894 }
 0x813   :  { %v1775_v49 = vpop.eup %1774 }
 0x814   :  { %v1004_v50 = vsel %vm628_vm3, %v1775_v49, 0.0 }
 0x815   :  { %1005 = vadd.xlane.f32.xlu1 %v1004_v50 }
 0x816   :  { %v2211_v51 = vpop.f32.mrf.mxu1 }
 0x818   :  { %v1102_v0 = vpop.xlane.xlu1 %1101 }
 0x819   :  { %v1106_v1 = vsub.f32 %v1073_v38, %v1102_v0 }
 0x81b   :  { %v1108_v6 = vmul.f32 1.442695, %v1106_v1 }
 0x81d   :  { %1776 = vpow2.f32 %v1108_v6 }
 0x81e   :  { %v919_v52 = vpop.f32.mrf.mxu1 }
 0x823   :  { %v1181_v53 = vpop.f32.mrf.mxu0  ;;  %v1777_v7 = vpop.eup %1776 }
 0x824   :  { %v1208_v54 = vsel %vm628_vm3, %v1181_v53, -inf  ;;  %v1112_v8 = vsel %vm628_vm3, %v1777_v7, 0.0 }
 0x825   :  { %1209 = vmax.xlane.f32.xlu2 %v1208_v54 }
 0x826   :  { %v988_v55 = vpop.f32.mrf.mxu1 }
 0x827   :  { %v995_v57 = vsel %vm628_vm3, %v988_v55, -inf }
 0x82b   :  { %v1183_v56 = vpop.f32.mrf.mxu0 }
 0x82d   :  { %996 = vmax.xlane.f32.xlu2 %v995_v57 }
 0x82e   :  { %1016 = vrot.lane.b32.xlu1 %v2142_v22, %s1808_s2  ;;  %v990_v58 = vpop.f32.mrf.mxu1 }
 0x836   :  { %1124 = vrot.lane.b32.xlu1 %v2142_v22, %s1811_s26  ;;  %v1096_v59 = vpop.f32.mrf.mxu1 }
 0x837   :  { %v1103_v60 = vsel %vm628_vm3, %v1096_v59, -inf }
 0x838   :  { %1104 = vmax.xlane.f32.xlu0 %v1103_v60 }
 0x83e   :  { %v1098_v61 = vpop.f32.mrf.mxu1 }
 0x845   :  { %921 = vrot.lane.b32.xlu2 %v2162_v45, %s1809_s0  ;;  %s2382_s0 = smov 24  }
 0x846   :  { %v1204_v62 = vpop.f32.mrf.mxu1 }
 0x847   :  { %v1211_v5 = vsel %vm628_vm3, %v1204_v62, -inf }
 0x84c   :  { %1035 = vrot.lane.b32.xlu0 %v2162_v45, %s1808_s2  ;;  %s2381_s2 = smov 16  }
 0x84e   :  { %v1206_v63 = vpop.f32.mrf.mxu1 }
 0x860   :  { %1212 = vmax.xlane.f32.xlu1 %v1211_v5 }
 0x86e   :  { %1113 = vadd.xlane.f32.xlu2 %v1112_v8 }
 0x879   :  { %1143 = vrot.lane.b32.xlu1 %v2162_v45, %s1811_s26 }
 0x888   :  { %v1006_v4 = vpop.xlane.xlu1 %1005 }
 0x889   :  { %1778 = vrcp.f32 %v1006_v4 }
 0x88a   :  { %1780 = vrcp.f32 %v895_v10 }
 0x88f   :  { %v1779_v13 = vpop.eup %1778 }
 0x890   :  { %v1012_v15 = vmul.f32 %v1779_v13, %v1775_v49  ;;  %v1781_v19 = vpop.eup %1780 }
 0x891   :  { %v899_v24 = vmul.f32 %v1781_v19, %v2197_v31 }
 0x892   :  { %v1014_v12 = vpack.c.bf16 %v1012_v15, %v1012_v15 }
 0x893   :  { %v901_v27 = vpack.c.bf16 %v899_v24, %v899_v24 }
 0x898   :  { %v1210_v9 = vpop.xlane.xlu2 %1209 }
 0x899   :  { %v1214_v11 = vsub.f32 %v1181_v53, %v1210_v9 }
 0x89b   :  { %v1216_v14 = vmul.f32 1.442695, %v1214_v11 }
 0x89d   :  { %1782 = vpow2.f32 %v1216_v14 }
 0x8a0   :  { %v1017_v16 = vpop.permute.xlu1 %1016  ;;  %v997_v17 = vpop.xlane.xlu2 %996 }
 0x8a1   :  { %v999_v18 = vsub.f32 %v988_v55, %v997_v17  ;;  %1029 = vmatpush.bf16.msrb.mxu2 %v1017_v16 }
 0x8a3   :  { %v2228_v21 = vpop.eup %1782  ;;  %v1002_v20 = vmul.f32 1.442695, %v999_v18 }
 0x8a4   :  { %1611 = vmatmul.msk.bf16.vlgmr.msrb.gmra.mxu2 %vm628_vm3, %v1014_v12  ;;  %v1220_v23 = vsel %vm628_vm3, %v2228_v21, 0.0 }
 0x8a5   :  { %1784 = vpow2.f32 %v1002_v20  ;;  %1221 = vadd.xlane.f32.xlu1 %v1220_v23  ;;  %v1664_v20 = vld [vmem:[%s2346_s14] sm:$0xff] }
 0x8a8   :  { %v1125_v25 = vpop.permute.xlu1 %1124  ;;  %v922_v26 = vpop.permute.xlu2 %921 }
 0x8a9   :  { %934 = vmatpush.bf16.msra.mxu3 %v922_v26  ;;  %1137 = vmatpush.bf16.msra.mxu2 %v1125_v25 }
 0x8ab   :  { %v1785_v28 = vpop.eup %1784  ;;  %v1105_v29 = vpop.xlane.xlu0 %1104 }
 0x8ac   :  { %v1107_v30 = vsub.f32 %v1096_v59, %v1105_v29  ;;  %1608 = vmatmul.msk.bf16.vlgmr.msra.gmra.mxu3 %vm628_vm3, %v901_v27  ;;  %v1007_v32 = vsel %vm628_vm3, %v1785_v28, 0.0 }
 0x8ad   :  { %1008 = vadd.xlane.f32.xlu0 %v1007_v32 }
 0x8ae   :  { %v1110_v33 = vmul.f32 1.442695, %v1107_v30 }
 0x8b0   :  { %1786 = vpow2.f32 %v1110_v33 }
 0x8b6   :  { %v1787_v34 = vpop.eup %1786 }
 0x8b7   :  { %v1115_v35 = vsel %vm628_vm3, %v1787_v34, 0.0 }
 0x8b8   :  { %1116 = vadd.xlane.f32.xlu0 %v1115_v35 }
 0x8be   :  { %v1036_v31 = vpop.permute.xlu0 %1035 }
 0x8bf   :  { %1048 = vmatpush.bf16.msrb.mxu3 %v1036_v31 }
 0x8cc   :  { %1251 = vrot.lane.b32.xlu0 %v2162_v45, %s1813_s28 }
 0x8d3   :  { %v1213_v36 = vpop.xlane.xlu1 %1212 }
 0x8d4   :  { %v1215_v37 = vsub.f32 %v1204_v62, %v1213_v36 }
 0x8d6   :  { %v1218_v38 = vmul.f32 1.442695, %v1215_v37 }
 0x8d8   :  { %1788 = vpow2.f32 %v1218_v38 }
 0x8de   :  { %v1789_v39 = vpop.eup %1788 }
 0x8df   :  { %v1223_v2 = vsel %vm628_vm3, %v1789_v39, 0.0 }
 0x8e0   :  { %1224 = vadd.xlane.f32.xlu2 %v1223_v2 }
 0x8e1   :  { %v1114_v3 = vpop.xlane.xlu2 %1113 }
 0x8e2   :  { %1790 = vrcp.f32 %v1114_v3 }
 0x8e8   :  { %v1791_v42 = vpop.eup %1790 }
 0x8e9   :  { %v1120_v43 = vmul.f32 %v1791_v42, %v1777_v7 }
 0x8eb   :  { %v1122_v46 = vpack.c.bf16 %v1120_v43, %v1120_v43  ;;  %v1144_v47 = vpop.permute.xlu1 %1143 }
 0x8ec   :  { %1156 = vmatpush.bf16.msra.mxu3 %v1144_v47 }
 0x8ed   :  { %1615 = vmatmul.msk.bf16.vlgmr.msra.gmra.mxu2 %vm628_vm3, %v1122_v46 }
 0x8f8   :  { %1232 = vrot.lane.b32.xlu2 %v2142_v22, %s1813_s28 }
 0x918   :  { %v1222_v22 = vpop.xlane.xlu1 %1221 }
 0x920   :  { %v1009_v45 = vpop.xlane.xlu0 %1008 }
 0x921   :  { %1792 = vrcp.f32 %v1009_v45 }
 0x927   :  { %v1793_v48 = vpop.eup %1792  ;;  %v1031_v49 = vpop.f32.mrf.mxu2 }
 0x928   :  { %v1013_v50 = vmul.f32 %v1793_v48, %v1785_v28 }
 0x92a   :  { %v1015_v52 = vpack.c.bf16 %v1013_v50, %v1013_v50 }
 0x92b   :  { %v1117_v53 = vpop.xlane.xlu0 %1116 }
 0x92c   :  { %1612 = vmatmul.msk.bf16.vlgmr.msrb.gmra.mxu3 %vm628_vm3, %v1015_v52  ;;  %1794 = vrcp.f32 %v1117_v53 }
 0x92d   :  { %1796 = vrcp.f32 %v1222_v22  ;;  %v1666_v22 = vld [vmem:[%s2350_s18] sm:$0xff] }
 0x92f   :  { %v936_v54 = vpop.f32.mrf.mxu3  ;;  %v1033_v55 = vpop.f32.mrf.mxu2 }
 0x932   :  { %v1795_v56 = vpop.eup %1794 }
 0x933   :  { %v1121_v57 = vmul.f32 %v1795_v56, %v1787_v34  ;;  %v1797_v62 = vpop.eup %1796 }
 0x934   :  { %v1228_v63 = vmul.f32 %v1797_v62, %v2228_v21  ;;  %v1665_v21 = vld [vmem:[%s2346_s14 + $0x8] sm:$0xff] }
 0x935   :  { %v1123_v59 = vpack.c.bf16 %v1121_v57, %v1121_v57  ;;  %1325 = vmatpush.bf16.msrb.mxu0 %v1665_v21 }
 0x936   :  { %v1230_v6 = vpack.c.bf16 %v1228_v63, %v1228_v63 }
 0x937   :  { %v938_v58 = vpop.f32.mrf.mxu3 }
 0x938   :  { %v1667_v58 = vld [vmem:[%s2350_s18 + $0x8] sm:$0xff] }
 0x939   :  { %1326 = vmatpush.bf16.msrb.mxu0 %v1664_v20  ;;  %1421 = vmatpush.bf16.msrb.mxu1 %v1667_v58 }
 0x93c   :  { %1616 = vmatmul.msk.bf16.vlgmr.msra.gmra.mxu3 %vm628_vm3, %v1123_v59 }
 0x93d   :  { %1422 = vmatpush.bf16.msrb.mxu1 %v1666_v22 }
 0x93e   :  { %v1252_v60 = vpop.permute.xlu0 %1251 }
 0x93f   :  { %1264 = vmatpush.bf16.msrb.mxu3 %v1252_v60 }
 0x953   :  { %v1225_v61 = vpop.xlane.xlu2 %1224 }
 0x954   :  { %1798 = vrcp.f32 %v1225_v61 }
 0x95a   :  { %v1799_v0 = vpop.eup %1798 }
 0x95b   :  { %v1229_v1 = vmul.f32 %v1799_v0, %v1789_v39  ;;  %v1233_v5 = vpop.permute.xlu2 %1232  ;;  %v1723_v39 = vld [vmem:[%s2345_s15] ss:$0 sm:$0xff] }
 0x95c   :  { %1245 = vmatpush.bf16.msrb.mxu2 %v1233_v5 }
 0x95d   :  { %v1231_v7 = vpack.c.bf16 %v1229_v1, %v1229_v1 }
 0x95f   :  { %1619 = vmatmul.msk.bf16.vlgmr.msrb.gmra.mxu2 %vm628_vm3, %v1230_v6  ;;  %1620 = vmatmul.msk.bf16.vlgmr.msrb.gmra.mxu3 %vm628_vm3, %v1231_v7 }
 0x970   :  { %v1139_v8 = vpop.f32.mrf.mxu2 }
 0x978   :  { %v1141_v4 = vpop.f32.mrf.mxu2 }
 0x9af   :  { %v1050_v9 = vpop.f32.mrf.mxu3 }
 0x9b0   :  { %v1702_v10 = vpack.i.bf16 %v1050_v9, %v1031_v49 }
 0x9b2   :  { %1703 = vrot.lane.b32.xlu2 %v1702_v10, %s2380_s11 }
 0x9b7   :  { %v1052_v11 = vpop.f32.mrf.mxu3 }
 0x9bf   :  { %v1158_v13 = vpop.f32.mrf.mxu3 }
 0x9c0   :  { %v1707_v14 = vpack.i.bf16 %v1158_v13, %v1139_v8 }
 0x9c2   :  { %1708 = vrot.lane.b32.xlu0 %v1707_v14, %s2381_s2 }
 0x9c7   :  { %v1160_v15 = vpop.f32.mrf.mxu3 }
 0x9c8   :  { %v1724_v15 = vld [vmem:[%s2347_s16] ss:$0 sm:$0xff] }
 0x9e2   :  { %v1247_v16 = vpop.f32.mrf.mxu2  ;;  %v1266_v17 = vpop.f32.mrf.mxu3 }
 0x9e3   :  { %v1712_v18 = vpack.i.bf16 %v1266_v17, %v1247_v16 }
 0x9e5   :  { %1713 = vrot.lane.b32.xlu1 %v1712_v18, %s2382_s0 }
 0x9ea   :  { %v1249_v19 = vpop.f32.mrf.mxu2  ;;  %v1268_v12 = vpop.f32.mrf.mxu3 }
 0x9eb   :  { %v1725_v19 = vld [vmem:[%s2348_s17] ss:$0 sm:$0xff] }
 0xa0c   :  { %v1704_v23 = vpop.permute.xlu2 %1703 }
 0xa0d   :  { %v1706_v25 = vunpack.i.h.bf16 %v1704_v23  ;;  %v1705_v26 = vunpack.i.l.bf16 %v1704_v23 }
 0xa0f   :  { %v1295_v30 = vsel %vm149_vm1, %v936_v54, %v1706_v25  ;;  %v1294_v32 = vsel %vm149_vm1, %v2211_v51, %v1705_v26  ;;  %v1671_v26 = vld [vmem:[%s2351_s20 + $0x18] sm:$0xff] }
 0xa10   :  { %1472 = vmatpush.bf16.msra.mxu2 %v1671_v26 }
 0xa34   :  { %v1709_v24 = vpop.permute.xlu0 %1708 }
 0xa35   :  { %v1711_v27 = vunpack.i.h.bf16 %v1709_v24  ;;  %v1710_v28 = vunpack.i.l.bf16 %v1709_v24 }
 0xa37   :  { %v1297_v35 = vsel %vm628_vm3, %v1295_v30, %v1711_v27  ;;  %v1296_v31 = vsel %vm628_vm3, %v1294_v32, %v1710_v28  ;;  %v1670_v27 = vld [vmem:[%s2351_s20 + $0x10] sm:$0xff]  ;;  %v1669_v28 = vld [vmem:[%s2351_s20 + $0x8] sm:$0xff]  ;;  %v1726_v32 = vld [vmem:[%s2349_s19] ss:$0 sm:$0xff]  ;;  %vm1464_vm3 = vcmask 523264  }
 0xa38   :  { %1473 = vmatpush.bf16.msra.mxu2 %v1670_v27 }
 0xa3c   :  { %1474 = vmatpush.bf16.msra.mxu2 %v1669_v28 }
 0xa57   :  { %v1714_v29 = vpop.permute.xlu1 %1713 }
 0xa58   :  { %v1716_v33 = vunpack.i.h.bf16 %v1714_v29  ;;  %v1715_v34 = vunpack.i.l.bf16 %v1714_v29  ;;  %v1668_v29 = vld [vmem:[%s2351_s20] sm:$0xff] }
 0xa59   :  { %1475 = vmatpush.bf16.msra.mxu2 %v1668_v29 }
 0xa5a   :  { %v1299_v36 = vsel %vm631_vm4, %v1297_v35, %v1716_v33  ;;  %v1298_v37 = vsel %vm631_vm4, %v1296_v31, %v1715_v34 }
 0xa5b   :  { %v1300_v38 = vpack.c.bf16 %v1299_v36, %v1298_v37 }
 0xa5d   :  { %1629 = vmatmul.msk.bf16.vlgmr.msrb.gmra.mxu0 %vm105_vm0, %v1300_v38  ;;  %v1727_v38 = vld [vmem:[%s2352_s21] ss:$0 sm:$0xff] }
 0xada   :  { %v1328_v2 = vpop.f32.mrf.mxu0 }
 0xadb   :  { %v1329_v3 = vadd.f32 %v1723_v39, %v1328_v2 }
 0xadd   :  { %v1333_v51 = vadd.f32 %v1329_v3, %v2156_v40 }
 0xadf   :  { %v1337_v42 = vsel %vm105_vm0, %v1333_v51, 0.0 }
 0xae0   :  { %1338 = vadd.xlane.f32.xlu2 %v1337_v42 }
 0xae2   :  { %v1330_v43 = vpop.f32.mrf.mxu0 }
 0xae3   :  { %v1331_v46 = vadd.f32 %v1723_v39, %v1330_v43 }
 0xae5   :  { %v1334_v47 = vadd.f32 %v1331_v46, %v2158_v41 }
 0xae7   :  { %v1340_v45 = vsel %vm105_vm0, %v1334_v47, 0.0 }
 0xae8   :  { %1341 = vadd.xlane.f32.xlu0 %v1340_v45 }
 0xb53   :  { %v1339_v48 = vpop.xlane.xlu2 %1338 }
 0xb54   :  { %v1343_v49 = vmul.f32 %v1339_v48, %v2118_v44 }
 0xb56   :  { %v1345_v50 = vsub.f32 %v1333_v51, %v1343_v49 }
 0xb58   :  { %v1347_v52 = vmul.f32 %v1345_v50, %v1345_v50 }
 0xb5a   :  { %v1349_v53 = vsel %vm105_vm0, %v1347_v52, 0.0 }
 0xb5b   :  { %v1342_v54 = vpop.xlane.xlu0 %1341  ;;  %1350 = vadd.xlane.f32.xlu1 %v1349_v53 }
 0xb5c   :  { %v1344_v40 = vmul.f32 %v1342_v54, %v2118_v44 }
 0xb5e   :  { %v1346_v55 = vsub.f32 %v1334_v47, %v1344_v40 }
 0xb60   :  { %v1348_v56 = vmul.f32 %v1346_v55, %v1346_v55 }
 0xb62   :  { %v1352_v57 = vsel %vm105_vm0, %v1348_v56, 0.0 }
 0xb63   :  { %1353 = vadd.xlane.f32.xlu2 %v1352_v57 }
 0xbce   :  { %v1351_v41 = vpop.xlane.xlu1 %1350 }
 0xbcf   :  { %v1355_v59 = vmul.f32 %v1351_v41, %v2118_v44 }
 0xbd1   :  { %v1357_v60 = vadd.f32 1e-05, %v1355_v59 }
 0xbd3   :  { %1800 = vrsqrt.f32 %v1357_v60  ;;  %vm1365_vm13 = vweird.f32 %v1357_v60 }
 0xbd6   :  { %v1354_v61 = vpop.xlane.xlu2 %1353 }
 0xbd7   :  { %v1356_v62 = vmul.f32 %v1354_v61, %v2118_v44 }
 0xbd9   :  { %v1801_v63 = vpop.eup %1800  ;;  %v1358_v0 = vadd.f32 1e-05, %v1356_v62 }
 0xbda   :  { %v1360_v1 = vmul.f32 %v1801_v63, %v1357_v60  ;;  %vm1366_vm12 = vweird.f32 %v1801_v63 }
 0xbdb   :  { %1802 = vrsqrt.f32 %v1358_v0  ;;  %vm1367_vm14 = vmor %vm1365_vm13, %vm1366_vm12  ;;  %vm1375_vm1 = vweird.f32 %v1358_v0 }
 0xbdc   :  { %v1361_v5 = vmul.f32 %v1801_v63, %v1360_v1 }
 0xbde   :  { %v1362_v6 = vmul.f32 0.5, %v1361_v5 }
 0xbe0   :  { %v1363_v7 = vsub.f32 1.5, %v1362_v6 }
 0xbe1   :  { %v1803_v8 = vpop.eup %1802 }
 0xbe2   :  { %v1364_v4 = vmul.f32 %v1801_v63, %v1363_v7  ;;  %v1370_v9 = vmul.f32 %v1803_v8, %v1358_v0  ;;  %vm1376_vm15 = vweird.f32 %v1803_v8 }
 0xbe3   :  { %vm1377_vm2 = vmor %vm1375_vm1, %vm1376_vm15 }
 0xbe4   :  { %v1371_v10 = vmul.f32 %v1803_v8, %v1370_v9  ;;  %v1368_v11 = vsel %vm1367_vm14, %v1801_v63, %v1364_v4 }
 0xbe5   :  { %v1379_v16 = vmul.f32 %v1368_v11, %v1345_v50 }
 0xbe6   :  { %v1372_v13 = vmul.f32 0.5, %v1371_v10 }
 0xbe7   :  { %v1384_v12 = vmul.f32 %v1724_v15, %v1379_v16 }
 0xbe8   :  { %v1373_v14 = vsub.f32 1.5, %v1372_v13 }
 0xbe9   :  { %v1389_v23 = vadd.f32 %v1725_v19, %v1384_v12 }
 0xbea   :  { %v1374_v17 = vmul.f32 %v1803_v8, %v1373_v14 }
 0xbec   :  { %v1378_v18 = vsel %vm1377_vm2, %v1803_v8, %v1374_v17  ;;  %v1728_v8 = vld [vmem:[%s2353_s22] ss:$0 sm:$0xff] }
 0xbed   :  { %v1380_v21 = vmul.f32 %v1378_v18, %v1346_v55 }
 0xbef   :  { %v1385_v20 = vmul.f32 %v1724_v15, %v1380_v21 }
 0xbf1   :  { %v1390_v24 = vadd.f32 %v1725_v19, %v1385_v20 }
 0xbf3   :  { %v1391_v25 = vpack.c.bf16 %v1390_v24, %v1389_v23 }
 0xbf5   :  { %1638 = vmatmul.msk.bf16.vlgmr.msrb.gmra.mxu1 %vm105_vm0, %v1391_v25 }
 0xc72   :  { %v1424_v30 = vpop.f32.mrf.mxu1 }
 0xc73   :  { %v1425_v33 = vadd.f32 %v1726_v32, %v1424_v30 }
 0xc75   :  { %v1429_v31 = vmax.f32 %v1425_v33, 0.0 }
 0xc7a   :  { %v1426_v34 = vpop.f32.mrf.mxu1 }
 0xc7b   :  { %v1427_v35 = vadd.f32 %v1726_v32, %v1426_v34 }
 0xc7d   :  { %v1430_v36 = vmax.f32 %v1427_v35, 0.0 }
 0xc7f   :  { %v1431_v37 = vpack.c.bf16 %v1430_v36, %v1429_v31 }
 0xc81   :  { %1655 = vmatmul.msk.bf16.vlgmr.msra.gmra.mxu2 %vm1464_vm3, %v1431_v37 }
 0xd04   :  { %v1477_v39 = vpop.f32.mrf.mxu2 }
 0xd05   :  { %v1482_v2 = vadd.f32 %v1477_v39, %v1389_v23 }
 0xd07   :  { %v1488_v3 = vadd.f32 %v1727_v38, %v1482_v2 }
 0xd09   :  { %v1492_v51 = vsel %vm105_vm0, %v1488_v3, 0.0 }
 0xd0a   :  { %1493 = vadd.xlane.f32.xlu0 %v1492_v51 }
 0xd0c   :  { %v1479_v42 = vpop.f32.mrf.mxu2 }
 0xd0d   :  { %v1483_v43 = vadd.f32 %v1479_v42, %v1390_v24 }
 0xd0f   :  { %v1489_v46 = vadd.f32 %v1727_v38, %v1483_v43 }
 0xd11   :  { %v1495_v47 = vsel %vm105_vm0, %v1489_v46, 0.0 }
 0xd12   :  { %1496 = vadd.xlane.f32.xlu2 %v1495_v47 }
 0xd7d   :  { %v1494_v45 = vpop.xlane.xlu0 %1493 }
 0xd7e   :  { %v1498_v48 = vmul.f32 %v1494_v45, %v2118_v44 }
 0xd80   :  { %v1500_v49 = vsub.f32 %v1488_v3, %v1498_v48 }
 0xd82   :  { %v1502_v50 = vmul.f32 %v1500_v49, %v1500_v49 }
 0xd84   :  { %v1504_v52 = vsel %vm105_vm0, %v1502_v50, 0.0 }
 0xd85   :  { %1505 = vadd.xlane.f32.xlu0 %v1504_v52  ;;  %v1497_v53 = vpop.xlane.xlu2 %1496 }
 0xd86   :  { %v1499_v54 = vmul.f32 %v1497_v53, %v2118_v44 }
 0xd88   :  { %v1501_v40 = vsub.f32 %v1489_v46, %v1499_v54 }
 0xd8a   :  { %v1503_v55 = vmul.f32 %v1501_v40, %v1501_v40 }
 0xd8c   :  { %v1507_v56 = vsel %vm105_vm0, %v1503_v55, 0.0 }
 0xd8d   :  { %1508 = vadd.xlane.f32.xlu2 %v1507_v56 }
 0xdf8   :  { %v1506_v57 = vpop.xlane.xlu0 %1505 }
 0xdf9   :  { %v1510_v41 = vmul.f32 %v1506_v57, %v2118_v44 }
 0xdfb   :  { %v1512_v58 = vadd.f32 1e-05, %v1510_v41 }
 0xdfd   :  { %1804 = vrsqrt.f32 %v1512_v58  ;;  %vm1520_vm5 = vweird.f32 %v1512_v58 }
 0xe00   :  { %v1509_v59 = vpop.xlane.xlu2 %1508 }
 0xe01   :  { %v1511_v60 = vmul.f32 %v1509_v59, %v2118_v44  ;;  %v1729_v44 = vld [vmem:[%s2354_s23] ss:$0 sm:$0xff] }
 0xe03   :  { %v1805_v22 = vpop.eup %1804  ;;  %v1513_v61 = vadd.f32 1e-05, %v1511_v60 }
 0xe04   :  { %v1515_v62 = vmul.f32 %v1805_v22, %v1512_v58  ;;  %vm1521_vm4 = vweird.f32 %v1805_v22 }
 0xe05   :  { %1806 = vrsqrt.f32 %v1513_v61  ;;  %vm1522_vm6 = vmor %vm1520_vm5, %vm1521_vm4  ;;  %vm1530_vm8 = vweird.f32 %v1513_v61 }
 0xe06   :  { %v1516_v63 = vmul.f32 %v1805_v22, %v1515_v62 }
 0xe08   :  { %v1517_v0 = vmul.f32 0.5, %v1516_v63 }
 0xe0a   :  { %v1518_v1 = vsub.f32 1.5, %v1517_v0 }
 0xe0b   :  { %v1807_v5 = vpop.eup %1806 }
 0xe0c   :  { %v1519_v6 = vmul.f32 %v1805_v22, %v1518_v1  ;;  %v1525_v7 = vmul.f32 %v1807_v5, %v1513_v61  ;;  %vm1531_vm7 = vweird.f32 %v1807_v5 }
 0xe0d   :  { %vm1532_vm9 = vmor %vm1530_vm8, %vm1531_vm7 }
 0xe0e   :  { %v1523_v4 = vsel %vm1522_vm6, %v1805_v22, %v1519_v6  ;;  %v1526_v9 = vmul.f32 %v1807_v5, %v1525_v7 }
 0xe0f   :  { %v1534_v10 = vmul.f32 %v1523_v4, %v1500_v49 }
 0xe10   :  { %v1527_v11 = vmul.f32 0.5, %v1526_v9 }
 0xe11   :  { %v1539_v13 = vmul.f32 %v1728_v8, %v1534_v10 }
 0xe12   :  { %v1528_v14 = vsub.f32 1.5, %v1527_v11 }
 0xe13   :  { %v1544_v15 = vadd.f32 %v1729_v44, %v1539_v13 }
 0xe14   :  { %v1529_v16 = vmul.f32 %v1807_v5, %v1528_v14 }
 0xe15   :  { %1546 = vst.msk [vmem:[%s2355_s24] sm:$0xff] %vm105_vm0, %v1544_v15 }
 0xe16   :  { %v1533_v17 = vsel %vm1532_vm9, %v1807_v5, %v1529_v16 }
 0xe17   :  { %v1535_v18 = vmul.f32 %v1533_v17, %v1501_v40 }
 0xe19   :  { %v1540_v19 = vmul.f32 %v1728_v8, %v1535_v18 }
 0xe1b   :  { %v1545_v12 = vadd.f32 %v1729_v44, %v1540_v19 }
 0xe1d   :  { %1547 = vst.msk [vmem:[%s2355_s24 + $0x8] sm:$0xff] %vm105_vm0, %v1545_v12 }

</bundles_post_ra>
